<compile_context>
chip_gen: v5e
topology: v5e:2x2
jax: 0.10.0
libtpu: 0.0.40
codegen_flags: <defaults>
</compile_context>

<pallas_src>
import math

import jax
import jax.numpy as jnp
from jax.experimental import pallas as pl
from jax.experimental.pallas import tpu as pltpu


# --------------------------------------------------------------------- hw-aware knobs

def _vmem_limit_bytes():
    """96 MiB scoped VMEM on 128-MiB chips (v5e/v6e), 48 MiB on v7x (64 MiB physical)."""
    try:
        info_fn = getattr(pltpu, "get_tpu_info", None)
        if info_fn is not None:
            info = info_fn()
            for name in ("vmem_capacity_bytes", "vmem_bytes", "vmem_size_bytes"):
                cap = getattr(info, name, None)
                if cap:
                    return (96 if cap >= 128 * 1024 * 1024 else 48) * 1024 * 1024
    except Exception:
        pass
    return 48 * 1024 * 1024


_VMEM_LIMIT = _vmem_limit_bytes()


def _params(*dims):
    return pltpu.CompilerParams(dimension_semantics=dims,
                                vmem_limit_bytes=_VMEM_LIMIT)


def _pick_tile(dim, max_tile, align=128):
    """Largest tile <= max_tile that divides `dim` (prefers 128-, then 8-multiples).

    Small dims use the full extent.  TODO(synk): pad + mask instead of the
    arbitrary-divisor last resort for awkward (prime-ish) large dims.
    """
    if dim <= max_tile:
        return dim
    for step in (align, 8, 1):
        t = (max_tile // step) * step
        while t >= step:
            if dim % t == 0:
                return t
            t -= step
    return dim


# --------------------------------------------------------------------- tiled matmul

def _make_matmul_kernel(relu, has_residual):
    def kernel(*refs):
        x_ref, w_ref = refs[0], refs[1]
        if has_residual:
            res_ref, o_ref, acc_ref = refs[2], refs[3], refs[4]
        else:
            o_ref, acc_ref = refs[2], refs[3]

        @pl.when(pl.program_id(2) == 0)
        def _():
            acc_ref[...] = jnp.zeros_like(acc_ref)

        acc_ref[...] += jnp.dot(x_ref[...], w_ref[...],
                                preferred_element_type=jnp.float32)

        @pl.when(pl.program_id(2) == pl.num_programs(2) - 1)
        def _():
            r = acc_ref[...]
            if relu:
                r = jnp.maximum(r, 0.0)
            if has_residual:
                r = r + res_ref[...].astype(jnp.float32)
            o_ref[...] = r.astype(o_ref.dtype)
    return kernel


def pallas_matmul(x, w, relu=False, residual=None, out_dtype=jnp.bfloat16):
    """out = [relu](x @ w) [+ residual], bf16 MXU with f32 accumulation."""
    M, K = x.shape
    _, N = w.shape
    tm = _pick_tile(M, 512)
    tn = _pick_tile(N, 1024)
    tk = _pick_tile(K, 1024)
    has_res = residual is not None
    in_specs = [pl.BlockSpec((tm, tk), lambda i, j, k: (i, k)),
                pl.BlockSpec((tk, tn), lambda i, j, k: (k, j))]
    args = [x, w]
    if has_res:
        in_specs.append(pl.BlockSpec((tm, tn), lambda i, j, k: (i, j)))
        args.append(residual)
    return pl.pallas_call(
        _make_matmul_kernel(relu, has_res),
        out_shape=jax.ShapeDtypeStruct((M, N), out_dtype),
        grid=(M // tm, N // tn, K // tk),
        in_specs=in_specs,
        out_specs=pl.BlockSpec((tm, tn), lambda i, j, k: (i, j)),
        scratch_shapes=[pltpu.VMEM((tm, tn), jnp.float32)],
        compiler_params=_params("parallel", "parallel", "arbitrary"),
    )(*args)


# ------------------------------------------------------- fused multi-output projections

def _make_multi_matmul_kernel(n_out):
    def kernel(*refs):
        x_ref = refs[0]
        w_refs = refs[1:1 + n_out]
        o_refs = refs[1 + n_out:1 + 2 * n_out]
        acc_refs = refs[1 + 2 * n_out:]

        @pl.when(pl.program_id(2) == 0)
        def _():
            for a in acc_refs:
                a[...] = jnp.zeros_like(a)

        x = x_ref[...]                       # one activation read, n_out matmuls
        for w_ref, a in zip(w_refs, acc_refs):
            a[...] += jnp.dot(x, w_ref[...], preferred_element_type=jnp.float32)

        @pl.when(pl.program_id(2) == pl.num_programs(2) - 1)
        def _():
            for a, o in zip(acc_refs, o_refs):
                o[...] = a[...].astype(o.dtype)
    return kernel


def pallas_multi_matmul(x, ws, out_dtype=jnp.bfloat16):
    """Fused Q/K/V-style projections: one x read, n outputs x @ ws[i] (same N)."""
    M, K = x.shape
    N = ws[0].shape[1]
    n_out = len(ws)
    tm = _pick_tile(M, 256)
    tn = _pick_tile(N, 1024)
    tk = _pick_tile(K, 1024)
    in_specs = ([pl.BlockSpec((tm, tk), lambda i, j, k: (i, k))]
                + [pl.BlockSpec((tk, tn), lambda i, j, k: (k, j)) for _ in ws])
    out_specs = tuple(pl.BlockSpec((tm, tn), lambda i, j, k: (i, j)) for _ in ws)
    out_shape = tuple(jax.ShapeDtypeStruct((M, N), out_dtype) for _ in ws)
    return pl.pallas_call(
        _make_multi_matmul_kernel(n_out),
        out_shape=out_shape,
        grid=(M // tm, N // tn, K // tk),
        in_specs=in_specs,
        out_specs=out_specs,
        scratch_shapes=[pltpu.VMEM((tm, tn), jnp.float32) for _ in ws],
        compiler_params=_params("parallel", "parallel", "arbitrary"),
    )(x, *ws)


# --------------------------------------------------------------------- fused FFN

def _make_ffn_kernel(has_residual):
    def kernel(*refs):
        x_ref, w1_ref, w2_ref = refs[0], refs[1], refs[2]
        if has_residual:
            res_ref, o_ref, acc_ref = refs[3], refs[4], refs[5]
        else:
            o_ref, acc_ref = refs[3], refs[4]
        f = pl.program_id(1)

        @pl.when(f == 0)
        def _():
            acc_ref[...] = jnp.zeros_like(acc_ref)

        h = jnp.dot(x_ref[...], w1_ref[...], preferred_element_type=jnp.float32)
        h = jnp.maximum(h, 0.0).astype(x_ref.dtype)     # ReLU, intermediate stays in VMEM
        acc_ref[...] += jnp.dot(h, w2_ref[...], preferred_element_type=jnp.float32)

        @pl.when(f == pl.num_programs(1) - 1)
        def _():
            r = acc_ref[...]
            if has_residual:
                r = r + res_ref[...].astype(jnp.float32)
            o_ref[...] = r.astype(o_ref.dtype)
    return kernel


def pallas_ffn(x, w1, w2, residual=None, out_dtype=jnp.bfloat16):
    """relu(x @ w1) @ w2 [+ residual]; the (M, F) intermediate never hits HBM."""
    M, D = x.shape
    F = w1.shape[1]
    tm = _pick_tile(M, 512)
    tf = _pick_tile(F, 512)
    has_res = residual is not None
    in_specs = [pl.BlockSpec((tm, D), lambda i, f: (i, 0)),
                pl.BlockSpec((D, tf), lambda i, f: (0, f)),
                pl.BlockSpec((tf, D), lambda i, f: (f, 0))]
    args = [x, w1, w2]
    if has_res:
        in_specs.append(pl.BlockSpec((tm, D), lambda i, f: (i, 0)))
        args.append(residual)
    return pl.pallas_call(
        _make_ffn_kernel(has_res),
        out_shape=jax.ShapeDtypeStruct((M, D), out_dtype),
        grid=(M // tm, F // tf),
        in_specs=in_specs,
        out_specs=pl.BlockSpec((tm, D), lambda i, f: (i, 0)),
        scratch_shapes=[pltpu.VMEM((tm, D), jnp.float32)],
        compiler_params=_params("parallel", "arbitrary"),
    )(*args)


# --------------------------------------------------------------------- RMSNorm

def _rmsnorm_kernel(x_ref, w_ref, o_ref):
    x = x_ref[...].astype(jnp.float32)
    var = jnp.mean(x * x, axis=-1, keepdims=True)
    o_ref[...] = (x * jax.lax.rsqrt(var + 1e-6)
                  * w_ref[...].astype(jnp.float32)).astype(o_ref.dtype)


def pallas_rmsnorm(x2d, w):
    M, D = x2d.shape
    tm = _pick_tile(M, 1024)
    return pl.pallas_call(
        _rmsnorm_kernel,
        out_shape=jax.ShapeDtypeStruct((M, D), jnp.bfloat16),
        grid=(M // tm,),
        in_specs=[pl.BlockSpec((tm, D), lambda i: (i, 0)),
                  pl.BlockSpec((1, D), lambda i: (0, 0))],
        out_specs=pl.BlockSpec((tm, D), lambda i: (i, 0)),
        compiler_params=_params("parallel"),
    )(x2d, w.reshape(1, D))


# ---------------------------------------------------------------- flash attention

def _make_attention_kernel(num_heads, d_head, has_bias, has_mask):
    def kernel(*refs):
        q_ref, k_ref, v_ref = refs[0], refs[1], refs[2]
        idx = 3
        bias_ref = None
        mask_ref = None
        if has_bias:
            bias_ref = refs[idx]; idx += 1
        if has_mask:
            mask_ref = refs[idx]; idx += 1
        o_ref, m_sc, l_sc, acc_sc = refs[idx], refs[idx + 1], refs[idx + 2], refs[idx + 3]

        kk = pl.program_id(2)

        @pl.when(kk == 0)
        def _():
            m_sc[...] = jnp.full_like(m_sc, -jnp.inf)
            l_sc[...] = jnp.zeros_like(l_sc)
            acc_sc[...] = jnp.zeros_like(acc_sc)

        tq = q_ref.shape[1]
        tk = k_ref.shape[1]
        # (1, t, H*Dh) lane-dense blocks -> head-major (H, t, Dh) inside VMEM (no HBM relayout)
        q = jnp.transpose(q_ref[0].reshape(tq, num_heads, d_head), (1, 0, 2))
        k = jnp.transpose(k_ref[0].reshape(tk, num_heads, d_head), (1, 0, 2))
        v = jnp.transpose(v_ref[0].reshape(tk, num_heads, d_head), (1, 0, 2))

        # NOTE: T5 attention has NO 1/sqrt(d) scaling.  Scores & softmax stats in f32.
        s = jnp.einsum('hqd,hkd->hqk', q, k, preferred_element_type=jnp.float32)
        if has_bias:
            s = s + bias_ref[0].astype(jnp.float32)          # (H, tq, tk) bf16 -> f32
        if has_mask:
            s = s + mask_ref[...].astype(jnp.float32)        # (1, 1, tk) additive mask

        m_prev = m_sc[...]
        m_new = jnp.maximum(m_prev, jnp.max(s, axis=-1, keepdims=True))
        alpha = jnp.exp(m_prev - m_new)
        p = jnp.exp(s - m_new)
        l_sc[...] = l_sc[...] * alpha + jnp.sum(p, axis=-1, keepdims=True)
        acc_sc[...] = acc_sc[...] * alpha + jnp.einsum(
            'hqk,hkd->hqd', p.astype(v.dtype), v, preferred_element_type=jnp.float32)
        m_sc[...] = m_new

        @pl.when(kk == pl.num_programs(2) - 1)
        def _():
            # normalize AFTER the PV matmul: H*tq*Dh multiplies instead of H*tq*Lk
            ctx = acc_sc[...] * pl.reciprocal(l_sc[...], approx=True)
            o_ref[...] = jnp.transpose(ctx, (1, 0, 2)).reshape(
                1, tq, num_heads * d_head).astype(o_ref.dtype)
    return kernel


def pallas_attention(q, k, v, num_heads, bias=None, mask=None):
    """Flash-style attention in the natural (B, L, H*Dh) layout.

    q,k,v: (B, Lq|Lk, H*Dh) bf16.  bias: (1, H, Lq, Lk) bf16 or None.
    mask:  (B, 1, Lk) f32 additive padding mask or None.
    """
    B, Lq, HD = q.shape
    Lk = k.shape[1]
    Dh = HD // num_heads
    tq = _pick_tile(Lq, 256)
    tk = _pick_tile(Lk, 512)

    in_specs = [pl.BlockSpec((1, tq, HD), lambda b, qi, kk: (b, qi, 0)),
                pl.BlockSpec((1, tk, HD), lambda b, qi, kk: (b, kk, 0)),
                pl.BlockSpec((1, tk, HD), lambda b, qi, kk: (b, kk, 0))]
    args = [q, k, v]
    if bias is not None:
        in_specs.append(pl.BlockSpec((1, num_heads, tq, tk),
                                     lambda b, qi, kk: (0, 0, qi, kk)))
        args.append(bias)
    if mask is not None:
        in_specs.append(pl.BlockSpec((1, 1, tk), lambda b, qi, kk: (b, 0, kk)))
        args.append(mask)

    return pl.pallas_call(
        _make_attention_kernel(num_heads, Dh, bias is not None, mask is not None),
        out_shape=jax.ShapeDtypeStruct((B, Lq, HD), jnp.bfloat16),
        grid=(B, Lq // tq, Lk // tk),
        in_specs=in_specs,
        out_specs=pl.BlockSpec((1, tq, HD), lambda b, qi, kk: (b, qi, 0)),
        scratch_shapes=[pltpu.VMEM((num_heads, tq, 1), jnp.float32),
                        pltpu.VMEM((num_heads, tq, 1), jnp.float32),
                        pltpu.VMEM((num_heads, tq, Dh), jnp.float32)],
        compiler_params=_params("parallel", "parallel", "arbitrary"),
    )(*args)


# ----------------------------------------------------------- fused LM head + cross-entropy

def _make_lmhead_kernel(scale, emit_logits):
    def kernel(*refs):
        seq_ref, emb_ref, lab_ref = refs[0], refs[1], refs[2]
        idx = 3
        logits_ref = None
        if emit_logits:
            logits_ref = refs[idx]; idx += 1
        loss_ref, cnt_ref = refs[idx], refs[idx + 1]
        m_sc, s_sc, p_sc = refs[idx + 2], refs[idx + 3], refs[idx + 4]

        j = pl.program_id(1)

        @pl.when(j == 0)
        def _():
            m_sc[...] = jnp.full_like(m_sc, -jnp.inf)
            s_sc[...] = jnp.zeros_like(s_sc)
            p_sc[...] = jnp.zeros_like(p_sc)

        # tied embedding consumed un-transposed; D**-0.5 tie-rescale folded in here.
        logits = jax.lax.dot_general(
            seq_ref[...], emb_ref[...], (((1,), (1,)), ((), ())),
            preferred_element_type=jnp.float32) * scale
        if emit_logits:
            logits_ref[...] = logits.astype(logits_ref.dtype)

        labels = lab_ref[...]                              # (tm, 1) int32
        tv = logits.shape[1]
        col = jax.lax.broadcasted_iota(jnp.int32, logits.shape, 1) + j * tv
        p_sc[...] += jnp.sum(jnp.where(col == labels, logits, 0.0),
                             axis=-1, keepdims=True)

        m_new = jnp.maximum(m_sc[...], jnp.max(logits, axis=-1, keepdims=True))
        s_sc[...] = (s_sc[...] * jnp.exp(m_sc[...] - m_new)
                     + jnp.sum(jnp.exp(logits - m_new), axis=-1, keepdims=True))
        m_sc[...] = m_new

        @pl.when(j == pl.num_programs(1) - 1)
        def _():
            valid = (labels != -100).astype(jnp.float32)
            loss_ref[...] = (m_sc[...] + jnp.log(s_sc[...]) - p_sc[...]) * valid
            cnt_ref[...] = valid
    return kernel


def pallas_lmhead_ce(seq, emb, labels, scale, return_logits=True,
                     logits_dtype=jnp.float32):
    """seq: (M, D) bf16, emb: (V, D) bf16 (tied), labels: (M,) int (-100 = ignore)."""
    M, D = seq.shape
    V = emb.shape[0]
    tm = _pick_tile(M, 512)
    tv = _pick_tile(V, 512)
    out_shape, out_specs = [], []
    if return_logits:
        out_shape.append(jax.ShapeDtypeStruct((M, V), logits_dtype))
        out_specs.append(pl.BlockSpec((tm, tv), lambda i, j: (i, j)))
    out_shape += [jax.ShapeDtypeStruct((M, 1), jnp.float32),
                  jax.ShapeDtypeStruct((M, 1), jnp.float32)]
    out_specs += [pl.BlockSpec((tm, 1), lambda i, j: (i, 0)),
                  pl.BlockSpec((tm, 1), lambda i, j: (i, 0))]
    return pl.pallas_call(
        _make_lmhead_kernel(scale, return_logits),
        out_shape=tuple(out_shape),
        grid=(M // tm, V // tv),
        in_specs=[pl.BlockSpec((tm, D), lambda i, j: (i, 0)),
                  pl.BlockSpec((tv, D), lambda i, j: (j, 0)),
                  pl.BlockSpec((tm, 1), lambda i, j: (i, 0))],
        out_specs=tuple(out_specs),
        scratch_shapes=[pltpu.VMEM((tm, 1), jnp.float32)] * 3,
        compiler_params=_params("parallel", "arbitrary"),
    )(seq, emb, labels.reshape(M, 1).astype(jnp.int32))


# --------------------------------------------------------------------- T5 glue

def _relative_position_bucket(relative_position, bidirectional, num_buckets, max_distance):
    relative_buckets = jnp.zeros_like(relative_position)
    if bidirectional:
        num_buckets //= 2
        relative_buckets += (relative_position > 0).astype(jnp.int32) * num_buckets
        relative_position = jnp.abs(relative_position)
    else:
        relative_position = -jnp.minimum(relative_position, 0)
    max_exact = num_buckets // 2
    is_small = relative_position < max_exact
    rp = jnp.maximum(relative_position, 1).astype(jnp.float32)
    rel_if_large = max_exact + (
        jnp.log(rp / max_exact) / math.log(max_distance / max_exact) * (num_buckets - max_exact)
    ).astype(jnp.int32)
    rel_if_large = jnp.minimum(rel_if_large, num_buckets - 1)
    relative_buckets += jnp.where(is_small, relative_position, rel_if_large)
    return relative_buckets


def compute_position_bias(rel_table, q_len, k_len, bidirectional, cfg):
    # TODO(synk): rel-pos bucket arithmetic + table gather stay in plain JAX
    #             (data-dependent gather).
    context_position = jnp.arange(q_len)[:, None]
    memory_position = jnp.arange(k_len)[None, :]
    relative_position = memory_position - context_position
    buckets = _relative_position_bucket(
        relative_position, bidirectional, cfg["num_buckets"], cfg["max_distance"])
    values = rel_table[buckets]                                        # (q, k, H)
    return jnp.transpose(values, (2, 0, 1))[None].astype(jnp.float32)  # (1, H, q, k)


def encoder_forward(params, cfg, input_ids, attention_mask):
    B, L = input_ids.shape
    D = cfg["d_model"]
    H = cfg["num_heads"]
    HD = H * cfg["d_kv"]
    # TODO(synk): embedding gather stays in plain JAX (data-dependent row gather).
    x = params["shared"][input_ids].reshape(B * L, D)
    ext_mask = (1.0 - attention_mask.astype(jnp.float32)).reshape(B, 1, L) * -1e9
    pos_bias = compute_position_bias(params["enc_rel_bias"], L, L, True, cfg
                                     ).astype(jnp.bfloat16)
    for lyr in params["encoder"]:
        h = pallas_rmsnorm(x, lyr["ln1"])
        q, k, v = pallas_multi_matmul(h, [lyr["wq"], lyr["wk"], lyr["wv"]])
        ctx = pallas_attention(q.reshape(B, L, HD), k.reshape(B, L, HD),
                               v.reshape(B, L, HD), H, bias=pos_bias, mask=ext_mask)
        x = pallas_matmul(ctx.reshape(B * L, HD), lyr["wo"], residual=x)
        h = pallas_rmsnorm(x, lyr["ln2"])
        x = pallas_ffn(h, lyr["wi"], lyr["wo_ff"], residual=x)
    return pallas_rmsnorm(x, params["enc_final_ln"]).reshape(B, L, D)


def decoder_forward(params, cfg, dec_input_ids, enc_out, enc_mask):
    B, L = dec_input_ids.shape
    D = cfg["d_model"]
    H = cfg["num_heads"]
    HD = H * cfg["d_kv"]
    Lk = enc_out.shape[1]
    x = params["shared"][dec_input_ids].reshape(B * L, D)
    enc2d = enc_out.reshape(B * Lk, D)
    causal = jnp.where(jnp.arange(L)[None, :] <= jnp.arange(L)[:, None], 0.0, -1e9)
    self_bias = (compute_position_bias(params["dec_rel_bias"], L, L, False, cfg)
                 + causal[None, None, :, :]).astype(jnp.bfloat16)
    cross_mask = (1.0 - enc_mask.astype(jnp.float32)).reshape(B, 1, Lk) * -1e9
    for lyr in params["decoder"]:
        # self-attention: rel-pos + causal bias, no padding mask (no zero tensors DMA'd)
        h = pallas_rmsnorm(x, lyr["ln1"])
        q, k, v = pallas_multi_matmul(h, [lyr["sq"], lyr["sk"], lyr["sv"]])
        ctx = pallas_attention(q.reshape(B, L, HD), k.reshape(B, L, HD),
                               v.reshape(B, L, HD), H, bias=self_bias, mask=None)
        x = pallas_matmul(ctx.reshape(B * L, HD), lyr["so"], residual=x)
        # cross-attention: no positional bias, only the encoder padding mask
        h = pallas_rmsnorm(x, lyr["ln2"])
        q = pallas_matmul(h, lyr["cq"])
        k, v = pallas_multi_matmul(enc2d, [lyr["ck"], lyr["cv"]])
        ctx = pallas_attention(q.reshape(B, L, HD), k.reshape(B, Lk, HD),
                               v.reshape(B, Lk, HD), H, bias=None, mask=cross_mask)
        x = pallas_matmul(ctx.reshape(B * L, HD), lyr["co"], residual=x)
        # FFN (fused, residual in epilogue)
        h = pallas_rmsnorm(x, lyr["ln3"])
        x = pallas_ffn(h, lyr["wi"], lyr["wo_ff"], residual=x)
    return pallas_rmsnorm(x, params["dec_final_ln"]).reshape(B, L, D)


def shift_right(labels, cfg):
    start = jnp.full((labels.shape[0], 1), cfg["decoder_start_token_id"], labels.dtype)
    shifted = jnp.concatenate([start, labels[:, :-1]], axis=1)
    return jnp.where(shifted == -100, cfg["pad_token_id"], shifted)


def kg2text_forward(params, cfg, input_ids, attention_mask, labels, return_logits=True):
    """Mirrors Kg2TextModel.forward -> (loss, lm_logits)."""
    dec_input_ids = shift_right(labels, cfg)
    enc_out = encoder_forward(params, cfg, input_ids, attention_mask)
    dec_out = decoder_forward(params, cfg, dec_input_ids, enc_out, attention_mask)
    B, L = labels.shape
    D = cfg["d_model"]
    seq = dec_out.reshape(B * L, D)     # tied-embedding D**-0.5 rescale folded in-kernel
    outs = pallas_lmhead_ce(seq, params["shared"], labels.reshape(B * L),
                            scale=D ** -0.5, return_logits=return_logits)
    if return_logits:
        logits, loss_per, cnt = outs
    else:
        loss_per, cnt = outs
        logits = None
    loss = jnp.sum(loss_per) / jnp.maximum(jnp.sum(cnt), 1.0)
    if return_logits:
        return loss, logits.reshape(B, L, cfg["vocab"])
    return loss


# --------------------------------------------------------------------- params

def init_params(key, cfg):
    D, F, H, Dh, V = cfg["d_model"], cfg["d_ff"], cfg["num_heads"], cfg["d_kv"], cfg["vocab"]
    keys = iter(jax.random.split(key, 128))

    def nrm(shape, scale=0.05):
        return (jax.random.normal(next(keys), shape, jnp.float32) * scale).astype(jnp.bfloat16)

    ones = lambda: jnp.ones((D,), jnp.bfloat16)

    def enc_layer():
        return dict(wq=nrm((D, H * Dh)), wk=nrm((D, H * Dh)), wv=nrm((D, H * Dh)),
                    wo=nrm((H * Dh, D)), wi=nrm((D, F)), wo_ff=nrm((F, D)),
                    ln1=ones(), ln2=ones())

    def dec_layer():
        return dict(sq=nrm((D, H * Dh)), sk=nrm((D, H * Dh)), sv=nrm((D, H * Dh)), so=nrm((H * Dh, D)),
                    cq=nrm((D, H * Dh)), ck=nrm((D, H * Dh)), cv=nrm((D, H * Dh)), co=nrm((H * Dh, D)),
                    wi=nrm((D, F)), wo_ff=nrm((F, D)),
                    ln1=ones(), ln2=ones(), ln3=ones())

    return dict(
        shared=nrm((V, D)),
        enc_rel_bias=nrm((cfg["num_buckets"], H)),
        dec_rel_bias=nrm((cfg["num_buckets"], H)),
        encoder=[enc_layer() for _ in range(cfg["num_layers"])],
        decoder=[dec_layer() for _ in range(cfg["num_layers"])],
        enc_final_ln=ones(),
        dec_final_ln=ones(),
    )


# --------------------------------------------------------------------- main

if __name__ == "__main__":
    cfg = dict(vocab=64, d_model=32, d_ff=64, num_heads=4, d_kv=8, num_layers=2,
               num_buckets=32, max_distance=128, pad_token_id=0, decoder_start_token_id=0)

    key = jax.random.PRNGKey(0)
    pk, ik, lk = jax.random.split(key, 3)
    params = init_params(pk, cfg)

    B, L = 2, 8
    input_ids = jax.random.randint(ik, (B, L), 1, cfg["vocab"], dtype=jnp.int32)
    attention_mask = jnp.concatenate(
        [jnp.ones((B, 6), jnp.int32), jnp.zeros((B, 2), jnp.int32)], axis=1)
    labels = jax.random.randint(lk, (B, L), 1, cfg["vocab"], dtype=jnp.int32)
    labels = labels.at[:, -1].set(-100)  # exercise ignore_index=-100

    fwd = jax.jit(lambda p, i, m, l: kg2text_forward(p, cfg, i, m, l))
    loss, logits = fwd(params, input_ids, attention_mask, labels)
    jax.block_until_ready((loss, logits))
    assert logits.shape == (B, L, cfg["vocab"]) and loss.shape == ()
    assert bool(jnp.isfinite(loss))
    print("KERNEL_OK")
</pallas_src>

<mosaic_0001>
module attributes {stable_mosaic.version = 11 : i64} {
  func.func @_rmsnorm_kernel(%arg0: i32, %arg1: memref<16x32xbf16, #tpu.memory_space<vmem>>, %arg2: memref<1x32xbf16, #tpu.memory_space<vmem>>, %arg3: memref<16x32xbf16, #tpu.memory_space<vmem>>) attributes {dimension_semantics = [#tpu.dimension_semantics<parallel>], iteration_bounds = array<i64: 1>, scalar_prefetch = 0 : i64, scratch_operands = 0 : i64, tpu.core_type = #tpu.core_type<tc>, window_params = [{transform_indices = @transform_0, window_bounds = array<i64: 16, 32>}, {pipeline_mode = #tpu.pipeline_mode<synchronous>, transform_indices = @transform_1, window_bounds = array<i64: 1, 32>}, {transform_indices = @transform_2, window_bounds = array<i64: 16, 32>}]} {
    %c0 = arith.constant 0 : index
    %c0_0 = arith.constant 0 : index
    %0 = vector.load %arg1[%c0, %c0_0] : memref<16x32xbf16, #tpu.memory_space<vmem>>, vector<16x32xbf16>
    %1 = arith.extf %0 : vector<16x32xbf16> to vector<16x32xf32>
    %2 = arith.mulf %1, %1 : vector<16x32xf32>
    %cst = arith.constant dense<0.000000e+00> : vector<16xf32>
    %3 = vector.multi_reduction <add>, %2, %cst [1] : vector<16x32xf32> to vector<16xf32>
    %4 = vector.shape_cast %3 : vector<16xf32> to vector<16x1xf32>
    %cst_1 = arith.constant 3.200000e+01 : f32
    %5 = vector.broadcast %cst_1 : f32 to vector<16x1xf32>
    %6 = arith.divf %4, %5 : vector<16x1xf32>
    %cst_2 = arith.constant 9.99999997E-7 : f32
    %7 = vector.broadcast %cst_2 : f32 to vector<16x1xf32>
    %8 = arith.addf %6, %7 : vector<16x1xf32>
    %9 = math.rsqrt %8 : vector<16x1xf32>
    %10 = vector.broadcast %9 : vector<16x1xf32> to vector<16x32xf32>
    %11 = arith.mulf %1, %10 : vector<16x32xf32>
    %c0_3 = arith.constant 0 : index
    %c0_4 = arith.constant 0 : index
    %12 = vector.load %arg2[%c0_3, %c0_4] : memref<1x32xbf16, #tpu.memory_space<vmem>>, vector<1x32xbf16>
    %13 = arith.extf %12 : vector<1x32xbf16> to vector<1x32xf32>
    %14 = vector.broadcast %13 : vector<1x32xf32> to vector<16x32xf32>
    %15 = arith.mulf %11, %14 : vector<16x32xf32>
    %16 = arith.truncf %15 : vector<16x32xf32> to vector<16x32xbf16>
    %c0_5 = arith.constant 0 : index
    %c0_6 = arith.constant 0 : index
    %17 = vector.load %arg3[%c0_5, %c0_6] : memref<16x32xbf16, #tpu.memory_space<vmem>>, vector<16x32xbf16>
    tpu.vector_store %arg3[%c0_5, %c0_6], %16 {strides = array<i32>} : memref<16x32xbf16, #tpu.memory_space<vmem>>, vector<16x32xbf16>,
    return
  }
  func.func @transform_0(%arg0: i32) -> (i32, i32) {
    %c0_i32 = arith.constant 0 : i32
    %c0_i32_0 = arith.constant 0 : i32
    return %arg0, %c0_i32 : i32, i32
  }
  func.func @transform_1(%arg0: i32) -> (i32, i32) {
    %c0_i32 = arith.constant 0 : i32
    %c0_i32_0 = arith.constant 0 : i32
    %c0_i32_1 = arith.constant 0 : i32
    return %c0_i32, %c0_i32_0 : i32, i32
  }
  func.func @transform_2(%arg0: i32) -> (i32, i32) {
    %c0_i32 = arith.constant 0 : i32
    %c0_i32_0 = arith.constant 0 : i32
    return %arg0, %c0_i32 : i32, i32
  }
}

module attributes {stable_mosaic.version = 11 : i64} {
  func.func @kernel(%arg0: i32, %arg1: i32, %arg2: i32, %arg3: memref<16x32xbf16, #tpu.memory_space<vmem>>, %arg4: memref<32x32xbf16, #tpu.memory_space<vmem>>, %arg5: memref<32x32xbf16, #tpu.memory_space<vmem>>, %arg6: memref<32x32xbf16, #tpu.memory_space<vmem>>, %arg7: memref<16x32xbf16, #tpu.memory_space<vmem>>, %arg8: memref<16x32xbf16, #tpu.memory_space<vmem>>, %arg9: memref<16x32xbf16, #tpu.memory_space<vmem>>, %arg10: memref<16x32xf32, #tpu.memory_space<vmem>>, %arg11: memref<16x32xf32, #tpu.memory_space<vmem>>, %arg12: memref<16x32xf32, #tpu.memory_space<vmem>>) attributes {dimension_semantics = [#tpu.dimension_semantics<parallel>, #tpu.dimension_semantics<parallel>, #tpu.dimension_semantics<arbitrary>], iteration_bounds = array<i64: 1, 1, 1>, scalar_prefetch = 0 : i64, scratch_operands = 3 : i64, tpu.core_type = #tpu.core_type<tc>, window_params = [{transform_indices = @transform_0, window_bounds = array<i64: 16, 32>}, {transform_indices = @transform_1, window_bounds = array<i64: 32, 32>}, {transform_indices = @transform_2, window_bounds = array<i64: 32, 32>}, {transform_indices = @transform_3, window_bounds = array<i64: 32, 32>}, {transform_indices = @transform_4, window_bounds = array<i64: 16, 32>}, {transform_indices = @transform_5, window_bounds = array<i64: 16, 32>}, {transform_indices = @transform_6, window_bounds = array<i64: 16, 32>}]} {
    %c0_i32 = arith.constant 0 : i32
    %0 = arith.cmpi eq, %arg2, %c0_i32 : i32
    %1 = arith.extui %0 : i1 to i32
    %c0_i32_0 = arith.constant 0 : i32
    %2 = arith.cmpi ne, %1, %c0_i32_0 : i32
    scf.if %2 {
      %cst_24 = arith.constant 0.000000e+00 : f32
      %22 = vector.broadcast %cst_24 : f32 to vector<16x32xf32>
      %c0_25 = arith.constant 0 : index
      %c0_26 = arith.constant 0 : index
      %23 = vector.load %arg10[%c0_25, %c0_26] : memref<16x32xf32, #tpu.memory_space<vmem>>, vector<16x32xf32>
      tpu.vector_store %arg10[%c0_25, %c0_26], %22 {strides = array<i32>} : memref<16x32xf32, #tpu.memory_space<vmem>>, vector<16x32xf32>,
      %cst_27 = arith.constant 0.000000e+00 : f32
      %24 = vector.broadcast %cst_27 : f32 to vector<16x32xf32>
      %c0_28 = arith.constant 0 : index
      %c0_29 = arith.constant 0 : index
      %25 = vector.load %arg11[%c0_28, %c0_29] : memref<16x32xf32, #tpu.memory_space<vmem>>, vector<16x32xf32>
      tpu.vector_store %arg11[%c0_28, %c0_29], %24 {strides = array<i32>} : memref<16x32xf32, #tpu.memory_space<vmem>>, vector<16x32xf32>,
      %cst_30 = arith.constant 0.000000e+00 : f32
      %26 = vector.broadcast %cst_30 : f32 to vector<16x32xf32>
      %c0_31 = arith.constant 0 : index
      %c0_32 = arith.constant 0 : index
      %27 = vector.load %arg12[%c0_31, %c0_32] : memref<16x32xf32, #tpu.memory_space<vmem>>, vector<16x32xf32>
      tpu.vector_store %arg12[%c0_31, %c0_32], %26 {strides = array<i32>} : memref<16x32xf32, #tpu.memory_space<vmem>>, vector<16x32xf32>,
    } else {
    }
    %c0 = arith.constant 0 : index
    %c0_1 = arith.constant 0 : index
    %3 = vector.load %arg3[%c0, %c0_1] : memref<16x32xbf16, #tpu.memory_space<vmem>>, vector<16x32xbf16>
    %c0_2 = arith.constant 0 : index
    %c0_3 = arith.constant 0 : index
    %4 = vector.load %arg10[%c0_2, %c0_3] : memref<16x32xf32, #tpu.memory_space<vmem>>, vector<16x32xf32>
    %c0_4 = arith.constant 0 : index
    %c0_5 = arith.constant 0 : index
    %5 = vector.load %arg4[%c0_4, %c0_5] : memref<32x32xbf16, #tpu.memory_space<vmem>>, vector<32x32xbf16>
    %cst = arith.constant dense<0.000000e+00> : vector<16x32xf32>
    %6 = tpu.matmul %3, %5, %cst {dimension_numbers = #tpu.dot_dimension_numbers<[1], [0], [0], [1], [0, 0, 1, 1], [], []>} : vector<16x32xbf16>, vector<32x32xbf16>, vector<16x32xf32> -> vector<16x32xf32>
    %7 = arith.addf %4, %6 : vector<16x32xf32>
    %c0_6 = arith.constant 0 : index
    %c0_7 = arith.constant 0 : index
    %8 = vector.load %arg10[%c0_6, %c0_7] : memref<16x32xf32, #tpu.memory_space<vmem>>, vector<16x32xf32>
    tpu.vector_store %arg10[%c0_6, %c0_7], %7 {strides = array<i32>} : memref<16x32xf32, #tpu.memory_space<vmem>>, vector<16x32xf32>,
    %c0_8 = arith.constant 0 : index
    %c0_9 = arith.constant 0 : index
    %9 = vector.load %arg11[%c0_8, %c0_9] : memref<16x32xf32, #tpu.memory_space<vmem>>, vector<16x32xf32>
    %c0_10 = arith.constant 0 : index
    %c0_11 = arith.constant 0 : index
    %10 = vector.load %arg5[%c0_10, %c0_11] : memref<32x32xbf16, #tpu.memory_space<vmem>>, vector<32x32xbf16>
    %cst_12 = arith.constant dense<0.000000e+00> : vector<16x32xf32>
    %11 = tpu.matmul %3, %10, %cst_12 {dimension_numbers = #tpu.dot_dimension_numbers<[1], [0], [0], [1], [0, 0, 1, 1], [], []>} : vector<16x32xbf16>, vector<32x32xbf16>, vector<16x32xf32> -> vector<16x32xf32>
    %12 = arith.addf %9, %11 : vector<16x32xf32>
    %c0_13 = arith.constant 0 : index
    %c0_14 = arith.constant 0 : index
    %13 = vector.load %arg11[%c0_13, %c0_14] : memref<16x32xf32, #tpu.memory_space<vmem>>, vector<16x32xf32>
    tpu.vector_store %arg11[%c0_13, %c0_14], %12 {strides = array<i32>} : memref<16x32xf32, #tpu.memory_space<vmem>>, vector<16x32xf32>,
    %c0_15 = arith.constant 0 : index
    %c0_16 = arith.constant 0 : index
    %14 = vector.load %arg12[%c0_15, %c0_16] : memref<16x32xf32, #tpu.memory_space<vmem>>, vector<16x32xf32>
    %c0_17 = arith.constant 0 : index
    %c0_18 = arith.constant 0 : index
    %15 = vector.load %arg6[%c0_17, %c0_18] : memref<32x32xbf16, #tpu.memory_space<vmem>>, vector<32x32xbf16>
    %cst_19 = arith.constant dense<0.000000e+00> : vector<16x32xf32>
    %16 = tpu.matmul %3, %15, %cst_19 {dimension_numbers = #tpu.dot_dimension_numbers<[1], [0], [0], [1], [0, 0, 1, 1], [], []>} : vector<16x32xbf16>, vector<32x32xbf16>, vector<16x32xf32> -> vector<16x32xf32>
    %17 = arith.addf %14, %16 : vector<16x32xf32>
    %c0_20 = arith.constant 0 : index
    %c0_21 = arith.constant 0 : index
    %18 = vector.load %arg12[%c0_20, %c0_21] : memref<16x32xf32, #tpu.memory_space<vmem>>, vector<16x32xf32>
    tpu.vector_store %arg12[%c0_20, %c0_21], %17 {strides = array<i32>} : memref<16x32xf32, #tpu.memory_space<vmem>>, vector<16x32xf32>,
    %c0_i32_22 = arith.constant 0 : i32
    %19 = arith.cmpi eq, %arg2, %c0_i32_22 : i32
    %20 = arith.extui %19 : i1 to i32
    %c0_i32_23 = arith.constant 0 : i32
    %21 = arith.cmpi ne, %20, %c0_i32_23 : i32
    scf.if %21 {
      %c0_24 = arith.constant 0 : index
      %c0_25 = arith.constant 0 : index
      %22 = vector.load %arg10[%c0_24, %c0_25] : memref<16x32xf32, #tpu.memory_space<vmem>>, vector<16x32xf32>
      %23 = arith.truncf %22 : vector<16x32xf32> to vector<16x32xbf16>
      %c0_26 = arith.constant 0 : index
      %c0_27 = arith.constant 0 : index
      %24 = vector.load %arg7[%c0_26, %c0_27] : memref<16x32xbf16, #tpu.memory_space<vmem>>, vector<16x32xbf16>
      tpu.vector_store %arg7[%c0_26, %c0_27], %23 {strides = array<i32>} : memref<16x32xbf16, #tpu.memory_space<vmem>>, vector<16x32xbf16>,
      %c0_28 = arith.constant 0 : index
      %c0_29 = arith.constant 0 : index
      %25 = vector.load %arg11[%c0_28, %c0_29] : memref<16x32xf32, #tpu.memory_space<vmem>>, vector<16x32xf32>
      %26 = arith.truncf %25 : vector<16x32xf32> to vector<16x32xbf16>
      %c0_30 = arith.constant 0 : index
      %c0_31 = arith.constant 0 : index
      %27 = vector.load %arg8[%c0_30, %c0_31] : memref<16x32xbf16, #tpu.memory_space<vmem>>, vector<16x32xbf16>
      tpu.vector_store %arg8[%c0_30, %c0_31], %26 {strides = array<i32>} : memref<16x32xbf16, #tpu.memory_space<vmem>>, vector<16x32xbf16>,
      %c0_32 = arith.constant 0 : index
      %c0_33 = arith.constant 0 : index
      %28 = vector.load %arg12[%c0_32, %c0_33] : memref<16x32xf32, #tpu.memory_space<vmem>>, vector<16x32xf32>
      %29 = arith.truncf %28 : vector<16x32xf32> to vector<16x32xbf16>
      %c0_34 = arith.constant 0 : index
      %c0_35 = arith.constant 0 : index
      %30 = vector.load %arg9[%c0_34, %c0_35] : memref<16x32xbf16, #tpu.memory_space<vmem>>, vector<16x32xbf16>
      tpu.vector_store %arg9[%c0_34, %c0_35], %29 {strides = array<i32>} : memref<16x32xbf16, #tpu.memory_space<vmem>>, vector<16x32xbf16>,
    } else {
    }
    return
  }
  func.func @transform_0(%arg0: i32, %arg1: i32, %arg2: i32) -> (i32, i32) {
    %c0_i32 = arith.constant 0 : i32
    return %arg0, %arg2 : i32, i32
  }
  func.func @transform_1(%arg0: i32, %arg1: i32, %arg2: i32) -> (i32, i32) {
    %c0_i32 = arith.constant 0 : i32
    return %arg2, %arg1 : i32, i32
  }
  func.func @transform_2(%arg0: i32, %arg1: i32, %arg2: i32) -> (i32, i32) {
    %c0_i32 = arith.constant 0 : i32
    return %arg2, %arg1 : i32, i32
  }
  func.func @transform_3(%arg0: i32, %arg1: i32, %arg2: i32) -> (i32, i32) {
    %c0_i32 = arith.constant 0 : i32
    return %arg2, %arg1 : i32, i32
  }
  func.func @transform_4(%arg0: i32, %arg1: i32, %arg2: i32) -> (i32, i32) {
    %c0_i32 = arith.constant 0 : i32
    return %arg0, %arg1 : i32, i32
  }
  func.func @transform_5(%arg0: i32, %arg1: i32, %arg2: i32) -> (i32, i32) {
    %c0_i32 = arith.constant 0 : i32
    return %arg0, %arg1 : i32, i32
  }
  func.func @transform_6(%arg0: i32, %arg1: i32, %arg2: i32) -> (i32, i32) {
    %c0_i32 = arith.constant 0 : i32
    return %arg0, %arg1 : i32, i32
  }
}

module attributes {stable_mosaic.version = 11 : i64} {
  func.func @kernel(%arg0: i32, %arg1: i32, %arg2: i32, %arg3: memref<16x32xbf16, #tpu.memory_space<vmem>>, %arg4: memref<32x32xbf16, #tpu.memory_space<vmem>>, %arg5: memref<16x32xbf16, #tpu.memory_space<vmem>>, %arg6: memref<16x32xbf16, #tpu.memory_space<vmem>>, %arg7: memref<16x32xf32, #tpu.memory_space<vmem>>) attributes {dimension_semantics = [#tpu.dimension_semantics<parallel>, #tpu.dimension_semantics<parallel>, #tpu.dimension_semantics<arbitrary>], iteration_bounds = array<i64: 1, 1, 1>, scalar_prefetch = 0 : i64, scratch_operands = 1 : i64, tpu.core_type = #tpu.core_type<tc>, window_params = [{transform_indices = @transform_0, window_bounds = array<i64: 16, 32>}, {transform_indices = @transform_1, window_bounds = array<i64: 32, 32>}, {transform_indices = @transform_2, window_bounds = array<i64: 16, 32>}, {transform_indices = @transform_3, window_bounds = array<i64: 16, 32>}]} {
    %c0_i32 = arith.constant 0 : i32
    %0 = arith.cmpi eq, %arg2, %c0_i32 : i32
    %1 = arith.extui %0 : i1 to i32
    %c0_i32_0 = arith.constant 0 : i32
    %2 = arith.cmpi ne, %1, %c0_i32_0 : i32
    scf.if %2 {
      %cst_10 = arith.constant 0.000000e+00 : f32
      %12 = vector.broadcast %cst_10 : f32 to vector<16x32xf32>
      %c0_11 = arith.constant 0 : index
      %c0_12 = arith.constant 0 : index
      %13 = vector.load %arg7[%c0_11, %c0_12] : memref<16x32xf32, #tpu.memory_space<vmem>>, vector<16x32xf32>
      tpu.vector_store %arg7[%c0_11, %c0_12], %12 {strides = array<i32>} : memref<16x32xf32, #tpu.memory_space<vmem>>, vector<16x32xf32>,
    } else {
    }
    %c0 = arith.constant 0 : index
    %c0_1 = arith.constant 0 : index
    %3 = vector.load %arg7[%c0, %c0_1] : memref<16x32xf32, #tpu.memory_space<vmem>>, vector<16x32xf32>
    %c0_2 = arith.constant 0 : index
    %c0_3 = arith.constant 0 : index
    %4 = vector.load %arg3[%c0_2, %c0_3] : memref<16x32xbf16, #tpu.memory_space<vmem>>, vector<16x32xbf16>
    %c0_4 = arith.constant 0 : index
    %c0_5 = arith.constant 0 : index
    %5 = vector.load %arg4[%c0_4, %c0_5] : memref<32x32xbf16, #tpu.memory_space<vmem>>, vector<32x32xbf16>
    %cst = arith.constant dense<0.000000e+00> : vector<16x32xf32>
    %6 = tpu.matmul %4, %5, %cst {dimension_numbers = #tpu.dot_dimension_numbers<[1], [0], [0], [1], [0, 0, 1, 1], [], []>} : vector<16x32xbf16>, vector<32x32xbf16>, vector<16x32xf32> -> vector<16x32xf32>
    %7 = arith.addf %3, %6 : vector<16x32xf32>
    %c0_6 = arith.constant 0 : index
    %c0_7 = arith.constant 0 : index
    %8 = vector.load %arg7[%c0_6, %c0_7] : memref<16x32xf32, #tpu.memory_space<vmem>>, vector<16x32xf32>
    tpu.vector_store %arg7[%c0_6, %c0_7], %7 {strides = array<i32>} : memref<16x32xf32, #tpu.memory_space<vmem>>, vector<16x32xf32>,
    %c0_i32_8 = arith.constant 0 : i32
    %9 = arith.cmpi eq, %arg2, %c0_i32_8 : i32
    %10 = arith.extui %9 : i1 to i32
    %c0_i32_9 = arith.constant 0 : i32
    %11 = arith.cmpi ne, %10, %c0_i32_9 : i32
    scf.if %11 {
      %c0_10 = arith.constant 0 : index
      %c0_11 = arith.constant 0 : index
      %12 = vector.load %arg7[%c0_10, %c0_11] : memref<16x32xf32, #tpu.memory_space<vmem>>, vector<16x32xf32>
      %c0_12 = arith.constant 0 : index
      %c0_13 = arith.constant 0 : index
      %13 = vector.load %arg5[%c0_12, %c0_13] : memref<16x32xbf16, #tpu.memory_space<vmem>>, vector<16x32xbf16>
      %14 = arith.extf %13 : vector<16x32xbf16> to vector<16x32xf32>
      %15 = arith.addf %12, %14 : vector<16x32xf32>
      %16 = arith.truncf %15 : vector<16x32xf32> to vector<16x32xbf16>
      %c0_14 = arith.constant 0 : index
      %c0_15 = arith.constant 0 : index
      %17 = vector.load %arg6[%c0_14, %c0_15] : memref<16x32xbf16, #tpu.memory_space<vmem>>, vector<16x32xbf16>
      tpu.vector_store %arg6[%c0_14, %c0_15], %16 {strides = array<i32>} : memref<16x32xbf16, #tpu.memory_space<vmem>>, vector<16x32xbf16>,
    } else {
    }
    return
  }
  func.func @transform_0(%arg0: i32, %arg1: i32, %arg2: i32) -> (i32, i32) {
    %c0_i32 = arith.constant 0 : i32
    return %arg0, %arg2 : i32, i32
  }
  func.func @transform_1(%arg0: i32, %arg1: i32, %arg2: i32) -> (i32, i32) {
    %c0_i32 = arith.constant 0 : i32
    return %arg2, %arg1 : i32, i32
  }
  func.func @transform_2(%arg0: i32, %arg1: i32, %arg2: i32) -> (i32, i32) {
    %c0_i32 = arith.constant 0 : i32
    return %arg0, %arg1 : i32, i32
  }
  func.func @transform_3(%arg0: i32, %arg1: i32, %arg2: i32) -> (i32, i32) {
    %c0_i32 = arith.constant 0 : i32
    return %arg0, %arg1 : i32, i32
  }
}

module attributes {stable_mosaic.version = 11 : i64} {
  func.func @kernel(%arg0: i32, %arg1: i32, %arg2: i32, %arg3: memref<1x8x32xbf16, #tpu.memory_space<vmem>>, %arg4: memref<1x8x32xbf16, #tpu.memory_space<vmem>>, %arg5: memref<1x8x32xbf16, #tpu.memory_space<vmem>>, %arg6: memref<1x4x8x8xbf16, #tpu.memory_space<vmem>>, %arg7: memref<1x1x8xf32, #tpu.memory_space<vmem>>, %arg8: memref<1x8x32xbf16, #tpu.memory_space<vmem>>, %arg9: memref<4x8x1xf32, #tpu.memory_space<vmem>>, %arg10: memref<4x8x1xf32, #tpu.memory_space<vmem>>, %arg11: memref<4x8x8xf32, #tpu.memory_space<vmem>>) attributes {dimension_semantics = [#tpu.dimension_semantics<parallel>, #tpu.dimension_semantics<parallel>, #tpu.dimension_semantics<arbitrary>], iteration_bounds = array<i64: 2, 1, 1>, scalar_prefetch = 0 : i64, scratch_operands = 3 : i64, tpu.core_type = #tpu.core_type<tc>, window_params = [{transform_indices = @transform_0, window_bounds = array<i64: 1, 8, 32>}, {transform_indices = @transform_1, window_bounds = array<i64: 1, 8, 32>}, {transform_indices = @transform_2, window_bounds = array<i64: 1, 8, 32>}, {transform_indices = @transform_3, window_bounds = array<i64: 1, 4, 8, 8>}, {transform_indices = @transform_4, window_bounds = array<i64: 1, 1, 8>}, {transform_indices = @transform_5, window_bounds = array<i64: 1, 8, 32>}]} {
    %c0_i32 = arith.constant 0 : i32
    %0 = arith.cmpi eq, %arg2, %c0_i32 : i32
    %1 = arith.extui %0 : i1 to i32
    %c0_i32_0 = arith.constant 0 : i32
    %2 = arith.cmpi ne, %1, %c0_i32_0 : i32
    scf.if %2 {
      %cst_39 = arith.constant 0xFF800000 : f32
      %49 = vector.broadcast %cst_39 : f32 to vector<4x8x1xf32>
      %c0_40 = arith.constant 0 : index
      %c0_41 = arith.constant 0 : index
      %c0_42 = arith.constant 0 : index
      %50 = vector.load %arg9[%c0_40, %c0_41, %c0_42] : memref<4x8x1xf32, #tpu.memory_space<vmem>>, vector<4x8x1xf32>
      tpu.vector_store %arg9[%c0_40, %c0_41, %c0_42], %49 {strides = array<i32>} : memref<4x8x1xf32, #tpu.memory_space<vmem>>, vector<4x8x1xf32>,
      %cst_43 = arith.constant 0.000000e+00 : f32
      %51 = vector.broadcast %cst_43 : f32 to vector<4x8x1xf32>
      %c0_44 = arith.constant 0 : index
      %c0_45 = arith.constant 0 : index
      %c0_46 = arith.constant 0 : index
      %52 = vector.load %arg10[%c0_44, %c0_45, %c0_46] : memref<4x8x1xf32, #tpu.memory_space<vmem>>, vector<4x8x1xf32>
      tpu.vector_store %arg10[%c0_44, %c0_45, %c0_46], %51 {strides = array<i32>} : memref<4x8x1xf32, #tpu.memory_space<vmem>>, vector<4x8x1xf32>,
      %cst_47 = arith.constant 0.000000e+00 : f32
      %53 = vector.broadcast %cst_47 : f32 to vector<4x8x8xf32>
      %c0_48 = arith.constant 0 : index
      %c0_49 = arith.constant 0 : index
      %c0_50 = arith.constant 0 : index
      %54 = vector.load %arg11[%c0_48, %c0_49, %c0_50] : memref<4x8x8xf32, #tpu.memory_space<vmem>>, vector<4x8x8xf32>
      tpu.vector_store %arg11[%c0_48, %c0_49, %c0_50], %53 {strides = array<i32>} : memref<4x8x8xf32, #tpu.memory_space<vmem>>, vector<4x8x8xf32>,
    } else {
    }
    %c0 = arith.constant 0 : index
    %c0_1 = arith.constant 0 : index
    %c0_2 = arith.constant 0 : index
    %3 = vector.load %arg3[%c0, %c0_1, %c0_2] : memref<1x8x32xbf16, #tpu.memory_space<vmem>>, vector<1x8x32xbf16>
    %4 = vector.shape_cast %3 : vector<1x8x32xbf16> to vector<8x32xbf16>
    %5 = vector.shape_cast %4 : vector<8x32xbf16> to vector<8x4x8xbf16>
    %6 = tpu.transpose %5, [1, 0, 2] : vector<8x4x8xbf16> -> vector<4x8x8xbf16>
    %c0_3 = arith.constant 0 : index
    %c0_4 = arith.constant 0 : index
    %c0_5 = arith.constant 0 : index
    %7 = vector.load %arg4[%c0_3, %c0_4, %c0_5] : memref<1x8x32xbf16, #tpu.memory_space<vmem>>, vector<1x8x32xbf16>
    %8 = vector.shape_cast %7 : vector<1x8x32xbf16> to vector<8x32xbf16>
    %9 = vector.shape_cast %8 : vector<8x32xbf16> to vector<8x4x8xbf16>
    %10 = tpu.transpose %9, [1, 0, 2] : vector<8x4x8xbf16> -> vector<4x8x8xbf16>
    %c0_6 = arith.constant 0 : index
    %c0_7 = arith.constant 0 : index
    %c0_8 = arith.constant 0 : index
    %11 = vector.load %arg5[%c0_6, %c0_7, %c0_8] : memref<1x8x32xbf16, #tpu.memory_space<vmem>>, vector<1x8x32xbf16>
    %12 = vector.shape_cast %11 : vector<1x8x32xbf16> to vector<8x32xbf16>
    %13 = vector.shape_cast %12 : vector<8x32xbf16> to vector<8x4x8xbf16>
    %14 = tpu.transpose %13, [1, 0, 2] : vector<8x4x8xbf16> -> vector<4x8x8xbf16>
    "tpu.trace_start"() <{level = 10 : i32, message = "hqd,hkd->hqk"}> : () -> ()
    %cst = arith.constant dense<0.000000e+00> : vector<4x8x8xf32>
    %15 = tpu.matmul %6, %10, %cst {dimension_numbers = #tpu.dot_dimension_numbers<[2], [2], [1], [1], [0, 0, 0, 1, 1, 1], [0], [0]>} : vector<4x8x8xbf16>, vector<4x8x8xbf16>, vector<4x8x8xf32> -> vector<4x8x8xf32>
    "tpu.trace_stop"() : () -> ()
    %c0_9 = arith.constant 0 : index
    %c0_10 = arith.constant 0 : index
    %c0_11 = arith.constant 0 : index
    %c0_12 = arith.constant 0 : index
    %16 = vector.load %arg6[%c0_9, %c0_10, %c0_11, %c0_12] : memref<1x4x8x8xbf16, #tpu.memory_space<vmem>>, vector<1x4x8x8xbf16>
    %17 = vector.shape_cast %16 : vector<1x4x8x8xbf16> to vector<4x8x8xbf16>
    %18 = arith.extf %17 : vector<4x8x8xbf16> to vector<4x8x8xf32>
    %19 = arith.addf %15, %18 : vector<4x8x8xf32>
    %c0_13 = arith.constant 0 : index
    %c0_14 = arith.constant 0 : index
    %c0_15 = arith.constant 0 : index
    %20 = vector.load %arg7[%c0_13, %c0_14, %c0_15] : memref<1x1x8xf32, #tpu.memory_space<vmem>>, vector<1x1x8xf32>
    %21 = vector.broadcast %20 : vector<1x1x8xf32> to vector<4x8x8xf32>
    %22 = arith.addf %19, %21 : vector<4x8x8xf32>
    %c0_16 = arith.constant 0 : index
    %c0_17 = arith.constant 0 : index
    %c0_18 = arith.constant 0 : index
    %23 = vector.load %arg9[%c0_16, %c0_17, %c0_18] : memref<4x8x1xf32, #tpu.memory_space<vmem>>, vector<4x8x1xf32>
    %cst_19 = arith.constant dense<0xFF800000> : vector<4x8xf32>
    %24 = vector.multi_reduction <maximumf>, %22, %cst_19 [2] : vector<4x8x8xf32> to vector<4x8xf32>
    %25 = vector.shape_cast %24 : vector<4x8xf32> to vector<4x8x1xf32>
    %26 = arith.maximumf %23, %25 : vector<4x8x1xf32>
    %27 = arith.subf %23, %26 : vector<4x8x1xf32>
    %28 = math.exp %27 : vector<4x8x1xf32>
    %29 = vector.broadcast %26 : vector<4x8x1xf32> to vector<4x8x8xf32>
    %30 = arith.subf %22, %29 : vector<4x8x8xf32>
    %31 = math.exp %30 : vector<4x8x8xf32>
    %c0_20 = arith.constant 0 : index
    %c0_21 = arith.constant 0 : index
    %c0_22 = arith.constant 0 : index
    %32 = vector.load %arg10[%c0_20, %c0_21, %c0_22] : memref<4x8x1xf32, #tpu.memory_space<vmem>>, vector<4x8x1xf32>
    %33 = arith.mulf %32, %28 : vector<4x8x1xf32>
    %cst_23 = arith.constant dense<0.000000e+00> : vector<4x8xf32>
    %34 = vector.multi_reduction <add>, %31, %cst_23 [2] : vector<4x8x8xf32> to vector<4x8xf32>
    %35 = vector.shape_cast %34 : vector<4x8xf32> to vector<4x8x1xf32>
    %36 = arith.addf %33, %35 : vector<4x8x1xf32>
    %c0_24 = arith.constant 0 : index
    %c0_25 = arith.constant 0 : index
    %c0_26 = arith.constant 0 : index
    %37 = vector.load %arg10[%c0_24, %c0_25, %c0_26] : memref<4x8x1xf32, #tpu.memory_space<vmem>>, vector<4x8x1xf32>
    tpu.vector_store %arg10[%c0_24, %c0_25, %c0_26], %36 {strides = array<i32>} : memref<4x8x1xf32, #tpu.memory_space<vmem>>, vector<4x8x1xf32>,
    %c0_27 = arith.constant 0 : index
    %c0_28 = arith.constant 0 : index
    %c0_29 = arith.constant 0 : index
    %38 = vector.load %arg11[%c0_27, %c0_28, %c0_29] : memref<4x8x8xf32, #tpu.memory_space<vmem>>, vector<4x8x8xf32>
    %39 = vector.broadcast %28 : vector<4x8x1xf32> to vector<4x8x8xf32>
    %40 = arith.mulf %38, %39 : vector<4x8x8xf32>
    %41 = arith.truncf %31 : vector<4x8x8xf32> to vector<4x8x8xbf16>
    "tpu.trace_start"() <{level = 10 : i32, message = "hqk,hkd->hqd"}> : () -> ()
    %cst_30 = arith.constant dense<0.000000e+00> : vector<4x8x8xf32>
    %42 = tpu.matmul %41, %14, %cst_30 {dimension_numbers = #tpu.dot_dimension_numbers<[2], [1], [1], [2], [0, 0, 0, 1, 1, 2], [0], [0]>} : vector<4x8x8xbf16>, vector<4x8x8xbf16>, vector<4x8x8xf32> -> vector<4x8x8xf32>
    "tpu.trace_stop"() : () -> ()
    %43 = arith.addf %40, %42 : vector<4x8x8xf32>
    %c0_31 = arith.constant 0 : index
    %c0_32 = arith.constant 0 : index
    %c0_33 = arith.constant 0 : index
    %44 = vector.load %arg11[%c0_31, %c0_32, %c0_33] : memref<4x8x8xf32, #tpu.memory_space<vmem>>, vector<4x8x8xf32>
    tpu.vector_store %arg11[%c0_31, %c0_32, %c0_33], %43 {strides = array<i32>} : memref<4x8x8xf32, #tpu.memory_space<vmem>>, vector<4x8x8xf32>,
    %c0_34 = arith.constant 0 : index
    %c0_35 = arith.constant 0 : index
    %c0_36 = arith.constant 0 : index
    %45 = vector.load %arg9[%c0_34, %c0_35, %c0_36] : memref<4x8x1xf32, #tpu.memory_space<vmem>>, vector<4x8x1xf32>
    tpu.vector_store %arg9[%c0_34, %c0_35, %c0_36], %26 {strides = array<i32>} : memref<4x8x1xf32, #tpu.memory_space<vmem>>, vector<4x8x1xf32>,
    %c0_i32_37 = arith.constant 0 : i32
    %46 = arith.cmpi eq, %arg2, %c0_i32_37 : i32
    %47 = arith.extui %46 : i1 to i32
    %c0_i32_38 = arith.constant 0 : i32
    %48 = arith.cmpi ne, %47, %c0_i32_38 : i32
    scf.if %48 {
      %c0_39 = arith.constant 0 : index
      %c0_40 = arith.constant 0 : index
      %c0_41 = arith.constant 0 : index
      %49 = vector.load %arg11[%c0_39, %c0_40, %c0_41] : memref<4x8x8xf32, #tpu.memory_space<vmem>>, vector<4x8x8xf32>
      %c0_42 = arith.constant 0 : index
      %c0_43 = arith.constant 0 : index
      %c0_44 = arith.constant 0 : index
      %50 = vector.load %arg10[%c0_42, %c0_43, %c0_44] : memref<4x8x1xf32, #tpu.memory_space<vmem>>, vector<4x8x1xf32>
      %51 = tpu.reciprocal %50 {approx = true} : vector<4x8x1xf32> -> vector<4x8x1xf32>
      %52 = vector.broadcast %51 : vector<4x8x1xf32> to vector<4x8x8xf32>
      %53 = arith.mulf %49, %52 : vector<4x8x8xf32>
      %54 = tpu.transpose %53, [1, 0, 2] : vector<4x8x8xf32> -> vector<8x4x8xf32>
      %55 = vector.shape_cast %54 : vector<8x4x8xf32> to vector<1x8x32xf32>
      %56 = arith.truncf %55 : vector<1x8x32xf32> to vector<1x8x32xbf16>
      %c0_45 = arith.constant 0 : index
      %c0_46 = arith.constant 0 : index
      %c0_47 = arith.constant 0 : index
      %57 = vector.load %arg8[%c0_45, %c0_46, %c0_47] : memref<1x8x32xbf16, #tpu.memory_space<vmem>>, vector<1x8x32xbf16>
      tpu.vector_store %arg8[%c0_45, %c0_46, %c0_47], %56 {strides = array<i32>} : memref<1x8x32xbf16, #tpu.memory_space<vmem>>, vector<1x8x32xbf16>,
    } else {
    }
    return
  }
  func.func @transform_0(%arg0: i32, %arg1: i32, %arg2: i32) -> (i32, i32, i32) {
    %c0_i32 = arith.constant 0 : i32
    %c0_i32_0 = arith.constant 0 : i32
    return %arg0, %arg1, %c0_i32 : i32, i32, i32
  }
  func.func @transform_1(%arg0: i32, %arg1: i32, %arg2: i32) -> (i32, i32, i32) {
    %c0_i32 = arith.constant 0 : i32
    %c0_i32_0 = arith.constant 0 : i32
    return %arg0, %arg2, %c0_i32 : i32, i32, i32
  }
  func.func @transform_2(%arg0: i32, %arg1: i32, %arg2: i32) -> (i32, i32, i32) {
    %c0_i32 = arith.constant 0 : i32
    %c0_i32_0 = arith.constant 0 : i32
    return %arg0, %arg2, %c0_i32 : i32, i32, i32
  }
  func.func @transform_3(%arg0: i32, %arg1: i32, %arg2: i32) -> (i32, i32, i32, i32) {
    %c0_i32 = arith.constant 0 : i32
    %c0_i32_0 = arith.constant 0 : i32
    %c0_i32_1 = arith.constant 0 : i32
    return %c0_i32, %c0_i32_0, %arg1, %arg2 : i32, i32, i32, i32
  }
  func.func @transform_4(%arg0: i32, %arg1: i32, %arg2: i32) -> (i32, i32, i32) {
    %c0_i32 = arith.constant 0 : i32
    %c0_i32_0 = arith.constant 0 : i32
    return %arg0, %c0_i32, %arg2 : i32, i32, i32
  }
  func.func @transform_5(%arg0: i32, %arg1: i32, %arg2: i32) -> (i32, i32, i32) {
    %c0_i32 = arith.constant 0 : i32
    %c0_i32_0 = arith.constant 0 : i32
    return %arg0, %arg1, %c0_i32 : i32, i32, i32
  }
}

module attributes {stable_mosaic.version = 11 : i64} {
  func.func @kernel(%arg0: i32, %arg1: i32, %arg2: memref<16x32xbf16, #tpu.memory_space<vmem>>, %arg3: memref<32x64xbf16, #tpu.memory_space<vmem>>, %arg4: memref<64x32xbf16, #tpu.memory_space<vmem>>, %arg5: memref<16x32xbf16, #tpu.memory_space<vmem>>, %arg6: memref<16x32xbf16, #tpu.memory_space<vmem>>, %arg7: memref<16x32xf32, #tpu.memory_space<vmem>>) attributes {dimension_semantics = [#tpu.dimension_semantics<parallel>, #tpu.dimension_semantics<arbitrary>], iteration_bounds = array<i64: 1, 1>, scalar_prefetch = 0 : i64, scratch_operands = 1 : i64, tpu.core_type = #tpu.core_type<tc>, window_params = [{transform_indices = @transform_0, window_bounds = array<i64: 16, 32>}, {transform_indices = @transform_1, window_bounds = array<i64: 32, 64>}, {transform_indices = @transform_2, window_bounds = array<i64: 64, 32>}, {transform_indices = @transform_3, window_bounds = array<i64: 16, 32>}, {transform_indices = @transform_4, window_bounds = array<i64: 16, 32>}]} {
    %c0_i32 = arith.constant 0 : i32
    %0 = arith.cmpi eq, %arg1, %c0_i32 : i32
    %1 = arith.extui %0 : i1 to i32
    %c0_i32_0 = arith.constant 0 : i32
    %2 = arith.cmpi ne, %1, %c0_i32_0 : i32
    scf.if %2 {
      %cst_14 = arith.constant 0.000000e+00 : f32
      %17 = vector.broadcast %cst_14 : f32 to vector<16x32xf32>
      %c0_15 = arith.constant 0 : index
      %c0_16 = arith.constant 0 : index
      %18 = vector.load %arg7[%c0_15, %c0_16] : memref<16x32xf32, #tpu.memory_space<vmem>>, vector<16x32xf32>
      tpu.vector_store %arg7[%c0_15, %c0_16], %17 {strides = array<i32>} : memref<16x32xf32, #tpu.memory_space<vmem>>, vector<16x32xf32>,
    } else {
    }
    %c0 = arith.constant 0 : index
    %c0_1 = arith.constant 0 : index
    %3 = vector.load %arg2[%c0, %c0_1] : memref<16x32xbf16, #tpu.memory_space<vmem>>, vector<16x32xbf16>
    %c0_2 = arith.constant 0 : index
    %c0_3 = arith.constant 0 : index
    %4 = vector.load %arg3[%c0_2, %c0_3] : memref<32x64xbf16, #tpu.memory_space<vmem>>, vector<32x64xbf16>
    %cst = arith.constant dense<0.000000e+00> : vector<16x64xf32>
    %5 = tpu.matmul %3, %4, %cst {dimension_numbers = #tpu.dot_dimension_numbers<[1], [0], [0], [1], [0, 0, 1, 1], [], []>} : vector<16x32xbf16>, vector<32x64xbf16>, vector<16x64xf32> -> vector<16x64xf32>
    %cst_4 = arith.constant 0.000000e+00 : f32
    %6 = vector.broadcast %cst_4 : f32 to vector<16x64xf32>
    %7 = arith.maximumf %5, %6 : vector<16x64xf32>
    %8 = arith.truncf %7 : vector<16x64xf32> to vector<16x64xbf16>
    %c0_5 = arith.constant 0 : index
    %c0_6 = arith.constant 0 : index
    %9 = vector.load %arg7[%c0_5, %c0_6] : memref<16x32xf32, #tpu.memory_space<vmem>>, vector<16x32xf32>
    %c0_7 = arith.constant 0 : index
    %c0_8 = arith.constant 0 : index
    %10 = vector.load %arg4[%c0_7, %c0_8] : memref<64x32xbf16, #tpu.memory_space<vmem>>, vector<64x32xbf16>
    %cst_9 = arith.constant dense<0.000000e+00> : vector<16x32xf32>
    %11 = tpu.matmul %8, %10, %cst_9 {dimension_numbers = #tpu.dot_dimension_numbers<[1], [0], [0], [1], [0, 0, 1, 1], [], []>} : vector<16x64xbf16>, vector<64x32xbf16>, vector<16x32xf32> -> vector<16x32xf32>
    %12 = arith.addf %9, %11 : vector<16x32xf32>
    %c0_10 = arith.constant 0 : index
    %c0_11 = arith.constant 0 : index
    %13 = vector.load %arg7[%c0_10, %c0_11] : memref<16x32xf32, #tpu.memory_space<vmem>>, vector<16x32xf32>
    tpu.vector_store %arg7[%c0_10, %c0_11], %12 {strides = array<i32>} : memref<16x32xf32, #tpu.memory_space<vmem>>, vector<16x32xf32>,
    %c0_i32_12 = arith.constant 0 : i32
    %14 = arith.cmpi eq, %arg1, %c0_i32_12 : i32
    %15 = arith.extui %14 : i1 to i32
    %c0_i32_13 = arith.constant 0 : i32
    %16 = arith.cmpi ne, %15, %c0_i32_13 : i32
    scf.if %16 {
      %c0_14 = arith.constant 0 : index
      %c0_15 = arith.constant 0 : index
      %17 = vector.load %arg7[%c0_14, %c0_15] : memref<16x32xf32, #tpu.memory_space<vmem>>, vector<16x32xf32>
      %c0_16 = arith.constant 0 : index
      %c0_17 = arith.constant 0 : index
      %18 = vector.load %arg5[%c0_16, %c0_17] : memref<16x32xbf16, #tpu.memory_space<vmem>>, vector<16x32xbf16>
      %19 = arith.extf %18 : vector<16x32xbf16> to vector<16x32xf32>
      %20 = arith.addf %17, %19 : vector<16x32xf32>
      %21 = arith.truncf %20 : vector<16x32xf32> to vector<16x32xbf16>
      %c0_18 = arith.constant 0 : index
      %c0_19 = arith.constant 0 : index
      %22 = vector.load %arg6[%c0_18, %c0_19] : memref<16x32xbf16, #tpu.memory_space<vmem>>, vector<16x32xbf16>
      tpu.vector_store %arg6[%c0_18, %c0_19], %21 {strides = array<i32>} : memref<16x32xbf16, #tpu.memory_space<vmem>>, vector<16x32xbf16>,
    } else {
    }
    return
  }
  func.func @transform_0(%arg0: i32, %arg1: i32) -> (i32, i32) {
    %c0_i32 = arith.constant 0 : i32
    %c0_i32_0 = arith.constant 0 : i32
    return %arg0, %c0_i32 : i32, i32
  }
  func.func @transform_1(%arg0: i32, %arg1: i32) -> (i32, i32) {
    %c0_i32 = arith.constant 0 : i32
    %c0_i32_0 = arith.constant 0 : i32
    return %c0_i32, %arg1 : i32, i32
  }
  func.func @transform_2(%arg0: i32, %arg1: i32) -> (i32, i32) {
    %c0_i32 = arith.constant 0 : i32
    %c0_i32_0 = arith.constant 0 : i32
    return %arg1, %c0_i32 : i32, i32
  }
  func.func @transform_3(%arg0: i32, %arg1: i32) -> (i32, i32) {
    %c0_i32 = arith.constant 0 : i32
    %c0_i32_0 = arith.constant 0 : i32
    return %arg0, %c0_i32 : i32, i32
  }
  func.func @transform_4(%arg0: i32, %arg1: i32) -> (i32, i32) {
    %c0_i32 = arith.constant 0 : i32
    %c0_i32_0 = arith.constant 0 : i32
    return %arg0, %c0_i32 : i32, i32
  }
}

module attributes {stable_mosaic.version = 11 : i64} {
  func.func @kernel(%arg0: i32, %arg1: i32, %arg2: i32, %arg3: memref<16x32xbf16, #tpu.memory_space<vmem>>, %arg4: memref<32x32xbf16, #tpu.memory_space<vmem>>, %arg5: memref<32x32xbf16, #tpu.memory_space<vmem>>, %arg6: memref<16x32xbf16, #tpu.memory_space<vmem>>, %arg7: memref<16x32xbf16, #tpu.memory_space<vmem>>, %arg8: memref<16x32xf32, #tpu.memory_space<vmem>>, %arg9: memref<16x32xf32, #tpu.memory_space<vmem>>) attributes {dimension_semantics = [#tpu.dimension_semantics<parallel>, #tpu.dimension_semantics<parallel>, #tpu.dimension_semantics<arbitrary>], iteration_bounds = array<i64: 1, 1, 1>, scalar_prefetch = 0 : i64, scratch_operands = 2 : i64, tpu.core_type = #tpu.core_type<tc>, window_params = [{transform_indices = @transform_0, window_bounds = array<i64: 16, 32>}, {transform_indices = @transform_1, window_bounds = array<i64: 32, 32>}, {transform_indices = @transform_2, window_bounds = array<i64: 32, 32>}, {transform_indices = @transform_3, window_bounds = array<i64: 16, 32>}, {transform_indices = @transform_4, window_bounds = array<i64: 16, 32>}]} {
    %c0_i32 = arith.constant 0 : i32
    %0 = arith.cmpi eq, %arg2, %c0_i32 : i32
    %1 = arith.extui %0 : i1 to i32
    %c0_i32_0 = arith.constant 0 : i32
    %2 = arith.cmpi ne, %1, %c0_i32_0 : i32
    scf.if %2 {
      %cst_17 = arith.constant 0.000000e+00 : f32
      %17 = vector.broadcast %cst_17 : f32 to vector<16x32xf32>
      %c0_18 = arith.constant 0 : index
      %c0_19 = arith.constant 0 : index
      %18 = vector.load %arg8[%c0_18, %c0_19] : memref<16x32xf32, #tpu.memory_space<vmem>>, vector<16x32xf32>
      tpu.vector_store %arg8[%c0_18, %c0_19], %17 {strides = array<i32>} : memref<16x32xf32, #tpu.memory_space<vmem>>, vector<16x32xf32>,
      %cst_20 = arith.constant 0.000000e+00 : f32
      %19 = vector.broadcast %cst_20 : f32 to vector<16x32xf32>
      %c0_21 = arith.constant 0 : index
      %c0_22 = arith.constant 0 : index
      %20 = vector.load %arg9[%c0_21, %c0_22] : memref<16x32xf32, #tpu.memory_space<vmem>>, vector<16x32xf32>
      tpu.vector_store %arg9[%c0_21, %c0_22], %19 {strides = array<i32>} : memref<16x32xf32, #tpu.memory_space<vmem>>, vector<16x32xf32>,
    } else {
    }
    %c0 = arith.constant 0 : index
    %c0_1 = arith.constant 0 : index
    %3 = vector.load %arg3[%c0, %c0_1] : memref<16x32xbf16, #tpu.memory_space<vmem>>, vector<16x32xbf16>
    %c0_2 = arith.constant 0 : index
    %c0_3 = arith.constant 0 : index
    %4 = vector.load %arg8[%c0_2, %c0_3] : memref<16x32xf32, #tpu.memory_space<vmem>>, vector<16x32xf32>
    %c0_4 = arith.constant 0 : index
    %c0_5 = arith.constant 0 : index
    %5 = vector.load %arg4[%c0_4, %c0_5] : memref<32x32xbf16, #tpu.memory_space<vmem>>, vector<32x32xbf16>
    %cst = arith.constant dense<0.000000e+00> : vector<16x32xf32>
    %6 = tpu.matmul %3, %5, %cst {dimension_numbers = #tpu.dot_dimension_numbers<[1], [0], [0], [1], [0, 0, 1, 1], [], []>} : vector<16x32xbf16>, vector<32x32xbf16>, vector<16x32xf32> -> vector<16x32xf32>
    %7 = arith.addf %4, %6 : vector<16x32xf32>
    %c0_6 = arith.constant 0 : index
    %c0_7 = arith.constant 0 : index
    %8 = vector.load %arg8[%c0_6, %c0_7] : memref<16x32xf32, #tpu.memory_space<vmem>>, vector<16x32xf32>
    tpu.vector_store %arg8[%c0_6, %c0_7], %7 {strides = array<i32>} : memref<16x32xf32, #tpu.memory_space<vmem>>, vector<16x32xf32>,
    %c0_8 = arith.constant 0 : index
    %c0_9 = arith.constant 0 : index
    %9 = vector.load %arg9[%c0_8, %c0_9] : memref<16x32xf32, #tpu.memory_space<vmem>>, vector<16x32xf32>
    %c0_10 = arith.constant 0 : index
    %c0_11 = arith.constant 0 : index
    %10 = vector.load %arg5[%c0_10, %c0_11] : memref<32x32xbf16, #tpu.memory_space<vmem>>, vector<32x32xbf16>
    %cst_12 = arith.constant dense<0.000000e+00> : vector<16x32xf32>
    %11 = tpu.matmul %3, %10, %cst_12 {dimension_numbers = #tpu.dot_dimension_numbers<[1], [0], [0], [1], [0, 0, 1, 1], [], []>} : vector<16x32xbf16>, vector<32x32xbf16>, vector<16x32xf32> -> vector<16x32xf32>
    %12 = arith.addf %9, %11 : vector<16x32xf32>
    %c0_13 = arith.constant 0 : index
    %c0_14 = arith.constant 0 : index
    %13 = vector.load %arg9[%c0_13, %c0_14] : memref<16x32xf32, #tpu.memory_space<vmem>>, vector<16x32xf32>
    tpu.vector_store %arg9[%c0_13, %c0_14], %12 {strides = array<i32>} : memref<16x32xf32, #tpu.memory_space<vmem>>, vector<16x32xf32>,
    %c0_i32_15 = arith.constant 0 : i32
    %14 = arith.cmpi eq, %arg2, %c0_i32_15 : i32
    %15 = arith.extui %14 : i1 to i32
    %c0_i32_16 = arith.constant 0 : i32
    %16 = arith.cmpi ne, %15, %c0_i32_16 : i32
    scf.if %16 {
      %c0_17 = arith.constant 0 : index
      %c0_18 = arith.constant 0 : index
      %17 = vector.load %arg8[%c0_17, %c0_18] : memref<16x32xf32, #tpu.memory_space<vmem>>, vector<16x32xf32>
      %18 = arith.truncf %17 : vector<16x32xf32> to vector<16x32xbf16>
      %c0_19 = arith.constant 0 : index
      %c0_20 = arith.constant 0 : index
      %19 = vector.load %arg6[%c0_19, %c0_20] : memref<16x32xbf16, #tpu.memory_space<vmem>>, vector<16x32xbf16>
      tpu.vector_store %arg6[%c0_19, %c0_20], %18 {strides = array<i32>} : memref<16x32xbf16, #tpu.memory_space<vmem>>, vector<16x32xbf16>,
      %c0_21 = arith.constant 0 : index
      %c0_22 = arith.constant 0 : index
      %20 = vector.load %arg9[%c0_21, %c0_22] : memref<16x32xf32, #tpu.memory_space<vmem>>, vector<16x32xf32>
      %21 = arith.truncf %20 : vector<16x32xf32> to vector<16x32xbf16>
      %c0_23 = arith.constant 0 : index
      %c0_24 = arith.constant 0 : index
      %22 = vector.load %arg7[%c0_23, %c0_24] : memref<16x32xbf16, #tpu.memory_space<vmem>>, vector<16x32xbf16>
      tpu.vector_store %arg7[%c0_23, %c0_24], %21 {strides = array<i32>} : memref<16x32xbf16, #tpu.memory_space<vmem>>, vector<16x32xbf16>,
    } else {
    }
    return
  }
  func.func @transform_0(%arg0: i32, %arg1: i32, %arg2: i32) -> (i32, i32) {
    %c0_i32 = arith.constant 0 : i32
    return %arg0, %arg2 : i32, i32
  }
  func.func @transform_1(%arg0: i32, %arg1: i32, %arg2: i32) -> (i32, i32) {
    %c0_i32 = arith.constant 0 : i32
    return %arg2, %arg1 : i32, i32
  }
  func.func @transform_2(%arg0: i32, %arg1: i32, %arg2: i32) -> (i32, i32) {
    %c0_i32 = arith.constant 0 : i32
    return %arg2, %arg1 : i32, i32
  }
  func.func @transform_3(%arg0: i32, %arg1: i32, %arg2: i32) -> (i32, i32) {
    %c0_i32 = arith.constant 0 : i32
    return %arg0, %arg1 : i32, i32
  }
  func.func @transform_4(%arg0: i32, %arg1: i32, %arg2: i32) -> (i32, i32) {
    %c0_i32 = arith.constant 0 : i32
    return %arg0, %arg1 : i32, i32
  }
}

module attributes {stable_mosaic.version = 11 : i64} {
  func.func @kernel(%arg0: i32, %arg1: i32, %arg2: i32, %arg3: memref<1x8x32xbf16, #tpu.memory_space<vmem>>, %arg4: memref<1x8x32xbf16, #tpu.memory_space<vmem>>, %arg5: memref<1x8x32xbf16, #tpu.memory_space<vmem>>, %arg6: memref<1x4x8x8xbf16, #tpu.memory_space<vmem>>, %arg7: memref<1x8x32xbf16, #tpu.memory_space<vmem>>, %arg8: memref<4x8x1xf32, #tpu.memory_space<vmem>>, %arg9: memref<4x8x1xf32, #tpu.memory_space<vmem>>, %arg10: memref<4x8x8xf32, #tpu.memory_space<vmem>>) attributes {dimension_semantics = [#tpu.dimension_semantics<parallel>, #tpu.dimension_semantics<parallel>, #tpu.dimension_semantics<arbitrary>], iteration_bounds = array<i64: 2, 1, 1>, scalar_prefetch = 0 : i64, scratch_operands = 3 : i64, tpu.core_type = #tpu.core_type<tc>, window_params = [{transform_indices = @transform_0, window_bounds = array<i64: 1, 8, 32>}, {transform_indices = @transform_1, window_bounds = array<i64: 1, 8, 32>}, {transform_indices = @transform_2, window_bounds = array<i64: 1, 8, 32>}, {transform_indices = @transform_3, window_bounds = array<i64: 1, 4, 8, 8>}, {transform_indices = @transform_4, window_bounds = array<i64: 1, 8, 32>}]} {
    %c0_i32 = arith.constant 0 : i32
    %0 = arith.cmpi eq, %arg2, %c0_i32 : i32
    %1 = arith.extui %0 : i1 to i32
    %c0_i32_0 = arith.constant 0 : i32
    %2 = arith.cmpi ne, %1, %c0_i32_0 : i32
    scf.if %2 {
      %cst_36 = arith.constant 0xFF800000 : f32
      %46 = vector.broadcast %cst_36 : f32 to vector<4x8x1xf32>
      %c0_37 = arith.constant 0 : index
      %c0_38 = arith.constant 0 : index
      %c0_39 = arith.constant 0 : index
      %47 = vector.load %arg8[%c0_37, %c0_38, %c0_39] : memref<4x8x1xf32, #tpu.memory_space<vmem>>, vector<4x8x1xf32>
      tpu.vector_store %arg8[%c0_37, %c0_38, %c0_39], %46 {strides = array<i32>} : memref<4x8x1xf32, #tpu.memory_space<vmem>>, vector<4x8x1xf32>,
      %cst_40 = arith.constant 0.000000e+00 : f32
      %48 = vector.broadcast %cst_40 : f32 to vector<4x8x1xf32>
      %c0_41 = arith.constant 0 : index
      %c0_42 = arith.constant 0 : index
      %c0_43 = arith.constant 0 : index
      %49 = vector.load %arg9[%c0_41, %c0_42, %c0_43] : memref<4x8x1xf32, #tpu.memory_space<vmem>>, vector<4x8x1xf32>
      tpu.vector_store %arg9[%c0_41, %c0_42, %c0_43], %48 {strides = array<i32>} : memref<4x8x1xf32, #tpu.memory_space<vmem>>, vector<4x8x1xf32>,
      %cst_44 = arith.constant 0.000000e+00 : f32
      %50 = vector.broadcast %cst_44 : f32 to vector<4x8x8xf32>
      %c0_45 = arith.constant 0 : index
      %c0_46 = arith.constant 0 : index
      %c0_47 = arith.constant 0 : index
      %51 = vector.load %arg10[%c0_45, %c0_46, %c0_47] : memref<4x8x8xf32, #tpu.memory_space<vmem>>, vector<4x8x8xf32>
      tpu.vector_store %arg10[%c0_45, %c0_46, %c0_47], %50 {strides = array<i32>} : memref<4x8x8xf32, #tpu.memory_space<vmem>>, vector<4x8x8xf32>,
    } else {
    }
    %c0 = arith.constant 0 : index
    %c0_1 = arith.constant 0 : index
    %c0_2 = arith.constant 0 : index
    %3 = vector.load %arg3[%c0, %c0_1, %c0_2] : memref<1x8x32xbf16, #tpu.memory_space<vmem>>, vector<1x8x32xbf16>
    %4 = vector.shape_cast %3 : vector<1x8x32xbf16> to vector<8x32xbf16>
    %5 = vector.shape_cast %4 : vector<8x32xbf16> to vector<8x4x8xbf16>
    %6 = tpu.transpose %5, [1, 0, 2] : vector<8x4x8xbf16> -> vector<4x8x8xbf16>
    %c0_3 = arith.constant 0 : index
    %c0_4 = arith.constant 0 : index
    %c0_5 = arith.constant 0 : index
    %7 = vector.load %arg4[%c0_3, %c0_4, %c0_5] : memref<1x8x32xbf16, #tpu.memory_space<vmem>>, vector<1x8x32xbf16>
    %8 = vector.shape_cast %7 : vector<1x8x32xbf16> to vector<8x32xbf16>
    %9 = vector.shape_cast %8 : vector<8x32xbf16> to vector<8x4x8xbf16>
    %10 = tpu.transpose %9, [1, 0, 2] : vector<8x4x8xbf16> -> vector<4x8x8xbf16>
    %c0_6 = arith.constant 0 : index
    %c0_7 = arith.constant 0 : index
    %c0_8 = arith.constant 0 : index
    %11 = vector.load %arg5[%c0_6, %c0_7, %c0_8] : memref<1x8x32xbf16, #tpu.memory_space<vmem>>, vector<1x8x32xbf16>
    %12 = vector.shape_cast %11 : vector<1x8x32xbf16> to vector<8x32xbf16>
    %13 = vector.shape_cast %12 : vector<8x32xbf16> to vector<8x4x8xbf16>
    %14 = tpu.transpose %13, [1, 0, 2] : vector<8x4x8xbf16> -> vector<4x8x8xbf16>
    "tpu.trace_start"() <{level = 10 : i32, message = "hqd,hkd->hqk"}> : () -> ()
    %cst = arith.constant dense<0.000000e+00> : vector<4x8x8xf32>
    %15 = tpu.matmul %6, %10, %cst {dimension_numbers = #tpu.dot_dimension_numbers<[2], [2], [1], [1], [0, 0, 0, 1, 1, 1], [0], [0]>} : vector<4x8x8xbf16>, vector<4x8x8xbf16>, vector<4x8x8xf32> -> vector<4x8x8xf32>
    "tpu.trace_stop"() : () -> ()
    %c0_9 = arith.constant 0 : index
    %c0_10 = arith.constant 0 : index
    %c0_11 = arith.constant 0 : index
    %c0_12 = arith.constant 0 : index
    %16 = vector.load %arg6[%c0_9, %c0_10, %c0_11, %c0_12] : memref<1x4x8x8xbf16, #tpu.memory_space<vmem>>, vector<1x4x8x8xbf16>
    %17 = vector.shape_cast %16 : vector<1x4x8x8xbf16> to vector<4x8x8xbf16>
    %18 = arith.extf %17 : vector<4x8x8xbf16> to vector<4x8x8xf32>
    %19 = arith.addf %15, %18 : vector<4x8x8xf32>
    %c0_13 = arith.constant 0 : index
    %c0_14 = arith.constant 0 : index
    %c0_15 = arith.constant 0 : index
    %20 = vector.load %arg8[%c0_13, %c0_14, %c0_15] : memref<4x8x1xf32, #tpu.memory_space<vmem>>, vector<4x8x1xf32>
    %cst_16 = arith.constant dense<0xFF800000> : vector<4x8xf32>
    %21 = vector.multi_reduction <maximumf>, %19, %cst_16 [2] : vector<4x8x8xf32> to vector<4x8xf32>
    %22 = vector.shape_cast %21 : vector<4x8xf32> to vector<4x8x1xf32>
    %23 = arith.maximumf %20, %22 : vector<4x8x1xf32>
    %24 = arith.subf %20, %23 : vector<4x8x1xf32>
    %25 = math.exp %24 : vector<4x8x1xf32>
    %26 = vector.broadcast %23 : vector<4x8x1xf32> to vector<4x8x8xf32>
    %27 = arith.subf %19, %26 : vector<4x8x8xf32>
    %28 = math.exp %27 : vector<4x8x8xf32>
    %c0_17 = arith.constant 0 : index
    %c0_18 = arith.constant 0 : index
    %c0_19 = arith.constant 0 : index
    %29 = vector.load %arg9[%c0_17, %c0_18, %c0_19] : memref<4x8x1xf32, #tpu.memory_space<vmem>>, vector<4x8x1xf32>
    %30 = arith.mulf %29, %25 : vector<4x8x1xf32>
    %cst_20 = arith.constant dense<0.000000e+00> : vector<4x8xf32>
    %31 = vector.multi_reduction <add>, %28, %cst_20 [2] : vector<4x8x8xf32> to vector<4x8xf32>
    %32 = vector.shape_cast %31 : vector<4x8xf32> to vector<4x8x1xf32>
    %33 = arith.addf %30, %32 : vector<4x8x1xf32>
    %c0_21 = arith.constant 0 : index
    %c0_22 = arith.constant 0 : index
    %c0_23 = arith.constant 0 : index
    %34 = vector.load %arg9[%c0_21, %c0_22, %c0_23] : memref<4x8x1xf32, #tpu.memory_space<vmem>>, vector<4x8x1xf32>
    tpu.vector_store %arg9[%c0_21, %c0_22, %c0_23], %33 {strides = array<i32>} : memref<4x8x1xf32, #tpu.memory_space<vmem>>, vector<4x8x1xf32>,
    %c0_24 = arith.constant 0 : index
    %c0_25 = arith.constant 0 : index
    %c0_26 = arith.constant 0 : index
    %35 = vector.load %arg10[%c0_24, %c0_25, %c0_26] : memref<4x8x8xf32, #tpu.memory_space<vmem>>, vector<4x8x8xf32>
    %36 = vector.broadcast %25 : vector<4x8x1xf32> to vector<4x8x8xf32>
    %37 = arith.mulf %35, %36 : vector<4x8x8xf32>
    %38 = arith.truncf %28 : vector<4x8x8xf32> to vector<4x8x8xbf16>
    "tpu.trace_start"() <{level = 10 : i32, message = "hqk,hkd->hqd"}> : () -> ()
    %cst_27 = arith.constant dense<0.000000e+00> : vector<4x8x8xf32>
    %39 = tpu.matmul %38, %14, %cst_27 {dimension_numbers = #tpu.dot_dimension_numbers<[2], [1], [1], [2], [0, 0, 0, 1, 1, 2], [0], [0]>} : vector<4x8x8xbf16>, vector<4x8x8xbf16>, vector<4x8x8xf32> -> vector<4x8x8xf32>
    "tpu.trace_stop"() : () -> ()
    %40 = arith.addf %37, %39 : vector<4x8x8xf32>
    %c0_28 = arith.constant 0 : index
    %c0_29 = arith.constant 0 : index
    %c0_30 = arith.constant 0 : index
    %41 = vector.load %arg10[%c0_28, %c0_29, %c0_30] : memref<4x8x8xf32, #tpu.memory_space<vmem>>, vector<4x8x8xf32>
    tpu.vector_store %arg10[%c0_28, %c0_29, %c0_30], %40 {strides = array<i32>} : memref<4x8x8xf32, #tpu.memory_space<vmem>>, vector<4x8x8xf32>,
    %c0_31 = arith.constant 0 : index
    %c0_32 = arith.constant 0 : index
    %c0_33 = arith.constant 0 : index
    %42 = vector.load %arg8[%c0_31, %c0_32, %c0_33] : memref<4x8x1xf32, #tpu.memory_space<vmem>>, vector<4x8x1xf32>
    tpu.vector_store %arg8[%c0_31, %c0_32, %c0_33], %23 {strides = array<i32>} : memref<4x8x1xf32, #tpu.memory_space<vmem>>, vector<4x8x1xf32>,
    %c0_i32_34 = arith.constant 0 : i32
    %43 = arith.cmpi eq, %arg2, %c0_i32_34 : i32
    %44 = arith.extui %43 : i1 to i32
    %c0_i32_35 = arith.constant 0 : i32
    %45 = arith.cmpi ne, %44, %c0_i32_35 : i32
    scf.if %45 {
      %c0_36 = arith.constant 0 : index
      %c0_37 = arith.constant 0 : index
      %c0_38 = arith.constant 0 : index
      %46 = vector.load %arg10[%c0_36, %c0_37, %c0_38] : memref<4x8x8xf32, #tpu.memory_space<vmem>>, vector<4x8x8xf32>
      %c0_39 = arith.constant 0 : index
      %c0_40 = arith.constant 0 : index
      %c0_41 = arith.constant 0 : index
      %47 = vector.load %arg9[%c0_39, %c0_40, %c0_41] : memref<4x8x1xf32, #tpu.memory_space<vmem>>, vector<4x8x1xf32>
      %48 = tpu.reciprocal %47 {approx = true} : vector<4x8x1xf32> -> vector<4x8x1xf32>
      %49 = vector.broadcast %48 : vector<4x8x1xf32> to vector<4x8x8xf32>
      %50 = arith.mulf %46, %49 : vector<4x8x8xf32>
      %51 = tpu.transpose %50, [1, 0, 2] : vector<4x8x8xf32> -> vector<8x4x8xf32>
      %52 = vector.shape_cast %51 : vector<8x4x8xf32> to vector<1x8x32xf32>
      %53 = arith.truncf %52 : vector<1x8x32xf32> to vector<1x8x32xbf16>
      %c0_42 = arith.constant 0 : index
      %c0_43 = arith.constant 0 : index
      %c0_44 = arith.constant 0 : index
      %54 = vector.load %arg7[%c0_42, %c0_43, %c0_44] : memref<1x8x32xbf16, #tpu.memory_space<vmem>>, vector<1x8x32xbf16>
      tpu.vector_store %arg7[%c0_42, %c0_43, %c0_44], %53 {strides = array<i32>} : memref<1x8x32xbf16, #tpu.memory_space<vmem>>, vector<1x8x32xbf16>,
    } else {
    }
    return
  }
  func.func @transform_0(%arg0: i32, %arg1: i32, %arg2: i32) -> (i32, i32, i32) {
    %c0_i32 = arith.constant 0 : i32
    %c0_i32_0 = arith.constant 0 : i32
    return %arg0, %arg1, %c0_i32 : i32, i32, i32
  }
  func.func @transform_1(%arg0: i32, %arg1: i32, %arg2: i32) -> (i32, i32, i32) {
    %c0_i32 = arith.constant 0 : i32
    %c0_i32_0 = arith.constant 0 : i32
    return %arg0, %arg2, %c0_i32 : i32, i32, i32
  }
  func.func @transform_2(%arg0: i32, %arg1: i32, %arg2: i32) -> (i32, i32, i32) {
    %c0_i32 = arith.constant 0 : i32
    %c0_i32_0 = arith.constant 0 : i32
    return %arg0, %arg2, %c0_i32 : i32, i32, i32
  }
  func.func @transform_3(%arg0: i32, %arg1: i32, %arg2: i32) -> (i32, i32, i32, i32) {
    %c0_i32 = arith.constant 0 : i32
    %c0_i32_0 = arith.constant 0 : i32
    %c0_i32_1 = arith.constant 0 : i32
    return %c0_i32, %c0_i32_0, %arg1, %arg2 : i32, i32, i32, i32
  }
  func.func @transform_4(%arg0: i32, %arg1: i32, %arg2: i32) -> (i32, i32, i32) {
    %c0_i32 = arith.constant 0 : i32
    %c0_i32_0 = arith.constant 0 : i32
    return %arg0, %arg1, %c0_i32 : i32, i32, i32
  }
}

module attributes {stable_mosaic.version = 11 : i64} {
  func.func @kernel(%arg0: i32, %arg1: i32, %arg2: i32, %arg3: memref<16x32xbf16, #tpu.memory_space<vmem>>, %arg4: memref<32x32xbf16, #tpu.memory_space<vmem>>, %arg5: memref<16x32xbf16, #tpu.memory_space<vmem>>, %arg6: memref<16x32xf32, #tpu.memory_space<vmem>>) attributes {dimension_semantics = [#tpu.dimension_semantics<parallel>, #tpu.dimension_semantics<parallel>, #tpu.dimension_semantics<arbitrary>], iteration_bounds = array<i64: 1, 1, 1>, scalar_prefetch = 0 : i64, scratch_operands = 1 : i64, tpu.core_type = #tpu.core_type<tc>, window_params = [{transform_indices = @transform_0, window_bounds = array<i64: 16, 32>}, {transform_indices = @transform_1, window_bounds = array<i64: 32, 32>}, {transform_indices = @transform_2, window_bounds = array<i64: 16, 32>}]} {
    %c0_i32 = arith.constant 0 : i32
    %0 = arith.cmpi eq, %arg2, %c0_i32 : i32
    %1 = arith.extui %0 : i1 to i32
    %c0_i32_0 = arith.constant 0 : i32
    %2 = arith.cmpi ne, %1, %c0_i32_0 : i32
    scf.if %2 {
      %cst_10 = arith.constant 0.000000e+00 : f32
      %12 = vector.broadcast %cst_10 : f32 to vector<16x32xf32>
      %c0_11 = arith.constant 0 : index
      %c0_12 = arith.constant 0 : index
      %13 = vector.load %arg6[%c0_11, %c0_12] : memref<16x32xf32, #tpu.memory_space<vmem>>, vector<16x32xf32>
      tpu.vector_store %arg6[%c0_11, %c0_12], %12 {strides = array<i32>} : memref<16x32xf32, #tpu.memory_space<vmem>>, vector<16x32xf32>,
    } else {
    }
    %c0 = arith.constant 0 : index
    %c0_1 = arith.constant 0 : index
    %3 = vector.load %arg6[%c0, %c0_1] : memref<16x32xf32, #tpu.memory_space<vmem>>, vector<16x32xf32>
    %c0_2 = arith.constant 0 : index
    %c0_3 = arith.constant 0 : index
    %4 = vector.load %arg3[%c0_2, %c0_3] : memref<16x32xbf16, #tpu.memory_space<vmem>>, vector<16x32xbf16>
    %c0_4 = arith.constant 0 : index
    %c0_5 = arith.constant 0 : index
    %5 = vector.load %arg4[%c0_4, %c0_5] : memref<32x32xbf16, #tpu.memory_space<vmem>>, vector<32x32xbf16>
    %cst = arith.constant dense<0.000000e+00> : vector<16x32xf32>
    %6 = tpu.matmul %4, %5, %cst {dimension_numbers = #tpu.dot_dimension_numbers<[1], [0], [0], [1], [0, 0, 1, 1], [], []>} : vector<16x32xbf16>, vector<32x32xbf16>, vector<16x32xf32> -> vector<16x32xf32>
    %7 = arith.addf %3, %6 : vector<16x32xf32>
    %c0_6 = arith.constant 0 : index
    %c0_7 = arith.constant 0 : index
    %8 = vector.load %arg6[%c0_6, %c0_7] : memref<16x32xf32, #tpu.memory_space<vmem>>, vector<16x32xf32>
    tpu.vector_store %arg6[%c0_6, %c0_7], %7 {strides = array<i32>} : memref<16x32xf32, #tpu.memory_space<vmem>>, vector<16x32xf32>,
    %c0_i32_8 = arith.constant 0 : i32
    %9 = arith.cmpi eq, %arg2, %c0_i32_8 : i32
    %10 = arith.extui %9 : i1 to i32
    %c0_i32_9 = arith.constant 0 : i32
    %11 = arith.cmpi ne, %10, %c0_i32_9 : i32
    scf.if %11 {
      %c0_10 = arith.constant 0 : index
      %c0_11 = arith.constant 0 : index
      %12 = vector.load %arg6[%c0_10, %c0_11] : memref<16x32xf32, #tpu.memory_space<vmem>>, vector<16x32xf32>
      %13 = arith.truncf %12 : vector<16x32xf32> to vector<16x32xbf16>
      %c0_12 = arith.constant 0 : index
      %c0_13 = arith.constant 0 : index
      %14 = vector.load %arg5[%c0_12, %c0_13] : memref<16x32xbf16, #tpu.memory_space<vmem>>, vector<16x32xbf16>
      tpu.vector_store %arg5[%c0_12, %c0_13], %13 {strides = array<i32>} : memref<16x32xbf16, #tpu.memory_space<vmem>>, vector<16x32xbf16>,
    } else {
    }
    return
  }
  func.func @transform_0(%arg0: i32, %arg1: i32, %arg2: i32) -> (i32, i32) {
    %c0_i32 = arith.constant 0 : i32
    return %arg0, %arg2 : i32, i32
  }
  func.func @transform_1(%arg0: i32, %arg1: i32, %arg2: i32) -> (i32, i32) {
    %c0_i32 = arith.constant 0 : i32
    return %arg2, %arg1 : i32, i32
  }
  func.func @transform_2(%arg0: i32, %arg1: i32, %arg2: i32) -> (i32, i32) {
    %c0_i32 = arith.constant 0 : i32
    return %arg0, %arg1 : i32, i32
  }
}

module attributes {stable_mosaic.version = 11 : i64} {
  func.func @kernel(%arg0: i32, %arg1: i32, %arg2: i32, %arg3: memref<1x8x32xbf16, #tpu.memory_space<vmem>>, %arg4: memref<1x8x32xbf16, #tpu.memory_space<vmem>>, %arg5: memref<1x8x32xbf16, #tpu.memory_space<vmem>>, %arg6: memref<1x1x8xf32, #tpu.memory_space<vmem>>, %arg7: memref<1x8x32xbf16, #tpu.memory_space<vmem>>, %arg8: memref<4x8x1xf32, #tpu.memory_space<vmem>>, %arg9: memref<4x8x1xf32, #tpu.memory_space<vmem>>, %arg10: memref<4x8x8xf32, #tpu.memory_space<vmem>>) attributes {dimension_semantics = [#tpu.dimension_semantics<parallel>, #tpu.dimension_semantics<parallel>, #tpu.dimension_semantics<arbitrary>], iteration_bounds = array<i64: 2, 1, 1>, scalar_prefetch = 0 : i64, scratch_operands = 3 : i64, tpu.core_type = #tpu.core_type<tc>, window_params = [{transform_indices = @transform_0, window_bounds = array<i64: 1, 8, 32>}, {transform_indices = @transform_1, window_bounds = array<i64: 1, 8, 32>}, {transform_indices = @transform_2, window_bounds = array<i64: 1, 8, 32>}, {transform_indices = @transform_3, window_bounds = array<i64: 1, 1, 8>}, {transform_indices = @transform_4, window_bounds = array<i64: 1, 8, 32>}]} {
    %c0_i32 = arith.constant 0 : i32
    %0 = arith.cmpi eq, %arg2, %c0_i32 : i32
    %1 = arith.extui %0 : i1 to i32
    %c0_i32_0 = arith.constant 0 : i32
    %2 = arith.cmpi ne, %1, %c0_i32_0 : i32
    scf.if %2 {
      %cst_35 = arith.constant 0xFF800000 : f32
      %45 = vector.broadcast %cst_35 : f32 to vector<4x8x1xf32>
      %c0_36 = arith.constant 0 : index
      %c0_37 = arith.constant 0 : index
      %c0_38 = arith.constant 0 : index
      %46 = vector.load %arg8[%c0_36, %c0_37, %c0_38] : memref<4x8x1xf32, #tpu.memory_space<vmem>>, vector<4x8x1xf32>
      tpu.vector_store %arg8[%c0_36, %c0_37, %c0_38], %45 {strides = array<i32>} : memref<4x8x1xf32, #tpu.memory_space<vmem>>, vector<4x8x1xf32>,
      %cst_39 = arith.constant 0.000000e+00 : f32
      %47 = vector.broadcast %cst_39 : f32 to vector<4x8x1xf32>
      %c0_40 = arith.constant 0 : index
      %c0_41 = arith.constant 0 : index
      %c0_42 = arith.constant 0 : index
      %48 = vector.load %arg9[%c0_40, %c0_41, %c0_42] : memref<4x8x1xf32, #tpu.memory_space<vmem>>, vector<4x8x1xf32>
      tpu.vector_store %arg9[%c0_40, %c0_41, %c0_42], %47 {strides = array<i32>} : memref<4x8x1xf32, #tpu.memory_space<vmem>>, vector<4x8x1xf32>,
      %cst_43 = arith.constant 0.000000e+00 : f32
      %49 = vector.broadcast %cst_43 : f32 to vector<4x8x8xf32>
      %c0_44 = arith.constant 0 : index
      %c0_45 = arith.constant 0 : index
      %c0_46 = arith.constant 0 : index
      %50 = vector.load %arg10[%c0_44, %c0_45, %c0_46] : memref<4x8x8xf32, #tpu.memory_space<vmem>>, vector<4x8x8xf32>
      tpu.vector_store %arg10[%c0_44, %c0_45, %c0_46], %49 {strides = array<i32>} : memref<4x8x8xf32, #tpu.memory_space<vmem>>, vector<4x8x8xf32>,
    } else {
    }
    %c0 = arith.constant 0 : index
    %c0_1 = arith.constant 0 : index
    %c0_2 = arith.constant 0 : index
    %3 = vector.load %arg3[%c0, %c0_1, %c0_2] : memref<1x8x32xbf16, #tpu.memory_space<vmem>>, vector<1x8x32xbf16>
    %4 = vector.shape_cast %3 : vector<1x8x32xbf16> to vector<8x32xbf16>
    %5 = vector.shape_cast %4 : vector<8x32xbf16> to vector<8x4x8xbf16>
    %6 = tpu.transpose %5, [1, 0, 2] : vector<8x4x8xbf16> -> vector<4x8x8xbf16>
    %c0_3 = arith.constant 0 : index
    %c0_4 = arith.constant 0 : index
    %c0_5 = arith.constant 0 : index
    %7 = vector.load %arg4[%c0_3, %c0_4, %c0_5] : memref<1x8x32xbf16, #tpu.memory_space<vmem>>, vector<1x8x32xbf16>
    %8 = vector.shape_cast %7 : vector<1x8x32xbf16> to vector<8x32xbf16>
    %9 = vector.shape_cast %8 : vector<8x32xbf16> to vector<8x4x8xbf16>
    %10 = tpu.transpose %9, [1, 0, 2] : vector<8x4x8xbf16> -> vector<4x8x8xbf16>
    %c0_6 = arith.constant 0 : index
    %c0_7 = arith.constant 0 : index
    %c0_8 = arith.constant 0 : index
    %11 = vector.load %arg5[%c0_6, %c0_7, %c0_8] : memref<1x8x32xbf16, #tpu.memory_space<vmem>>, vector<1x8x32xbf16>
    %12 = vector.shape_cast %11 : vector<1x8x32xbf16> to vector<8x32xbf16>
    %13 = vector.shape_cast %12 : vector<8x32xbf16> to vector<8x4x8xbf16>
    %14 = tpu.transpose %13, [1, 0, 2] : vector<8x4x8xbf16> -> vector<4x8x8xbf16>
    "tpu.trace_start"() <{level = 10 : i32, message = "hqd,hkd->hqk"}> : () -> ()
    %cst = arith.constant dense<0.000000e+00> : vector<4x8x8xf32>
    %15 = tpu.matmul %6, %10, %cst {dimension_numbers = #tpu.dot_dimension_numbers<[2], [2], [1], [1], [0, 0, 0, 1, 1, 1], [0], [0]>} : vector<4x8x8xbf16>, vector<4x8x8xbf16>, vector<4x8x8xf32> -> vector<4x8x8xf32>
    "tpu.trace_stop"() : () -> ()
    %c0_9 = arith.constant 0 : index
    %c0_10 = arith.constant 0 : index
    %c0_11 = arith.constant 0 : index
    %16 = vector.load %arg6[%c0_9, %c0_10, %c0_11] : memref<1x1x8xf32, #tpu.memory_space<vmem>>, vector<1x1x8xf32>
    %17 = vector.broadcast %16 : vector<1x1x8xf32> to vector<4x8x8xf32>
    %18 = arith.addf %15, %17 : vector<4x8x8xf32>
    %c0_12 = arith.constant 0 : index
    %c0_13 = arith.constant 0 : index
    %c0_14 = arith.constant 0 : index
    %19 = vector.load %arg8[%c0_12, %c0_13, %c0_14] : memref<4x8x1xf32, #tpu.memory_space<vmem>>, vector<4x8x1xf32>
    %cst_15 = arith.constant dense<0xFF800000> : vector<4x8xf32>
    %20 = vector.multi_reduction <maximumf>, %18, %cst_15 [2] : vector<4x8x8xf32> to vector<4x8xf32>
    %21 = vector.shape_cast %20 : vector<4x8xf32> to vector<4x8x1xf32>
    %22 = arith.maximumf %19, %21 : vector<4x8x1xf32>
    %23 = arith.subf %19, %22 : vector<4x8x1xf32>
    %24 = math.exp %23 : vector<4x8x1xf32>
    %25 = vector.broadcast %22 : vector<4x8x1xf32> to vector<4x8x8xf32>
    %26 = arith.subf %18, %25 : vector<4x8x8xf32>
    %27 = math.exp %26 : vector<4x8x8xf32>
    %c0_16 = arith.constant 0 : index
    %c0_17 = arith.constant 0 : index
    %c0_18 = arith.constant 0 : index
    %28 = vector.load %arg9[%c0_16, %c0_17, %c0_18] : memref<4x8x1xf32, #tpu.memory_space<vmem>>, vector<4x8x1xf32>
    %29 = arith.mulf %28, %24 : vector<4x8x1xf32>
    %cst_19 = arith.constant dense<0.000000e+00> : vector<4x8xf32>
    %30 = vector.multi_reduction <add>, %27, %cst_19 [2] : vector<4x8x8xf32> to vector<4x8xf32>
    %31 = vector.shape_cast %30 : vector<4x8xf32> to vector<4x8x1xf32>
    %32 = arith.addf %29, %31 : vector<4x8x1xf32>
    %c0_20 = arith.constant 0 : index
    %c0_21 = arith.constant 0 : index
    %c0_22 = arith.constant 0 : index
    %33 = vector.load %arg9[%c0_20, %c0_21, %c0_22] : memref<4x8x1xf32, #tpu.memory_space<vmem>>, vector<4x8x1xf32>
    tpu.vector_store %arg9[%c0_20, %c0_21, %c0_22], %32 {strides = array<i32>} : memref<4x8x1xf32, #tpu.memory_space<vmem>>, vector<4x8x1xf32>,
    %c0_23 = arith.constant 0 : index
    %c0_24 = arith.constant 0 : index
    %c0_25 = arith.constant 0 : index
    %34 = vector.load %arg10[%c0_23, %c0_24, %c0_25] : memref<4x8x8xf32, #tpu.memory_space<vmem>>, vector<4x8x8xf32>
    %35 = vector.broadcast %24 : vector<4x8x1xf32> to vector<4x8x8xf32>
    %36 = arith.mulf %34, %35 : vector<4x8x8xf32>
    %37 = arith.truncf %27 : vector<4x8x8xf32> to vector<4x8x8xbf16>
    "tpu.trace_start"() <{level = 10 : i32, message = "hqk,hkd->hqd"}> : () -> ()
    %cst_26 = arith.constant dense<0.000000e+00> : vector<4x8x8xf32>
    %38 = tpu.matmul %37, %14, %cst_26 {dimension_numbers = #tpu.dot_dimension_numbers<[2], [1], [1], [2], [0, 0, 0, 1, 1, 2], [0], [0]>} : vector<4x8x8xbf16>, vector<4x8x8xbf16>, vector<4x8x8xf32> -> vector<4x8x8xf32>
    "tpu.trace_stop"() : () -> ()
    %39 = arith.addf %36, %38 : vector<4x8x8xf32>
    %c0_27 = arith.constant 0 : index
    %c0_28 = arith.constant 0 : index
    %c0_29 = arith.constant 0 : index
    %40 = vector.load %arg10[%c0_27, %c0_28, %c0_29] : memref<4x8x8xf32, #tpu.memory_space<vmem>>, vector<4x8x8xf32>
    tpu.vector_store %arg10[%c0_27, %c0_28, %c0_29], %39 {strides = array<i32>} : memref<4x8x8xf32, #tpu.memory_space<vmem>>, vector<4x8x8xf32>,
    %c0_30 = arith.constant 0 : index
    %c0_31 = arith.constant 0 : index
    %c0_32 = arith.constant 0 : index
    %41 = vector.load %arg8[%c0_30, %c0_31, %c0_32] : memref<4x8x1xf32, #tpu.memory_space<vmem>>, vector<4x8x1xf32>
    tpu.vector_store %arg8[%c0_30, %c0_31, %c0_32], %22 {strides = array<i32>} : memref<4x8x1xf32, #tpu.memory_space<vmem>>, vector<4x8x1xf32>,
    %c0_i32_33 = arith.constant 0 : i32
    %42 = arith.cmpi eq, %arg2, %c0_i32_33 : i32
    %43 = arith.extui %42 : i1 to i32
    %c0_i32_34 = arith.constant 0 : i32
    %44 = arith.cmpi ne, %43, %c0_i32_34 : i32
    scf.if %44 {
      %c0_35 = arith.constant 0 : index
      %c0_36 = arith.constant 0 : index
      %c0_37 = arith.constant 0 : index
      %45 = vector.load %arg10[%c0_35, %c0_36, %c0_37] : memref<4x8x8xf32, #tpu.memory_space<vmem>>, vector<4x8x8xf32>
      %c0_38 = arith.constant 0 : index
      %c0_39 = arith.constant 0 : index
      %c0_40 = arith.constant 0 : index
      %46 = vector.load %arg9[%c0_38, %c0_39, %c0_40] : memref<4x8x1xf32, #tpu.memory_space<vmem>>, vector<4x8x1xf32>
      %47 = tpu.reciprocal %46 {approx = true} : vector<4x8x1xf32> -> vector<4x8x1xf32>
      %48 = vector.broadcast %47 : vector<4x8x1xf32> to vector<4x8x8xf32>
      %49 = arith.mulf %45, %48 : vector<4x8x8xf32>
      %50 = tpu.transpose %49, [1, 0, 2] : vector<4x8x8xf32> -> vector<8x4x8xf32>
      %51 = vector.shape_cast %50 : vector<8x4x8xf32> to vector<1x8x32xf32>
      %52 = arith.truncf %51 : vector<1x8x32xf32> to vector<1x8x32xbf16>
      %c0_41 = arith.constant 0 : index
      %c0_42 = arith.constant 0 : index
      %c0_43 = arith.constant 0 : index
      %53 = vector.load %arg7[%c0_41, %c0_42, %c0_43] : memref<1x8x32xbf16, #tpu.memory_space<vmem>>, vector<1x8x32xbf16>
      tpu.vector_store %arg7[%c0_41, %c0_42, %c0_43], %52 {strides = array<i32>} : memref<1x8x32xbf16, #tpu.memory_space<vmem>>, vector<1x8x32xbf16>,
    } else {
    }
    return
  }
  func.func @transform_0(%arg0: i32, %arg1: i32, %arg2: i32) -> (i32, i32, i32) {
    %c0_i32 = arith.constant 0 : i32
    %c0_i32_0 = arith.constant 0 : i32
    return %arg0, %arg1, %c0_i32 : i32, i32, i32
  }
  func.func @transform_1(%arg0: i32, %arg1: i32, %arg2: i32) -> (i32, i32, i32) {
    %c0_i32 = arith.constant 0 : i32
    %c0_i32_0 = arith.constant 0 : i32
    return %arg0, %arg2, %c0_i32 : i32, i32, i32
  }
  func.func @transform_2(%arg0: i32, %arg1: i32, %arg2: i32) -> (i32, i32, i32) {
    %c0_i32 = arith.constant 0 : i32
    %c0_i32_0 = arith.constant 0 : i32
    return %arg0, %arg2, %c0_i32 : i32, i32, i32
  }
  func.func @transform_3(%arg0: i32, %arg1: i32, %arg2: i32) -> (i32, i32, i32) {
    %c0_i32 = arith.constant 0 : i32
    %c0_i32_0 = arith.constant 0 : i32
    return %arg0, %c0_i32, %arg2 : i32, i32, i32
  }
  func.func @transform_4(%arg0: i32, %arg1: i32, %arg2: i32) -> (i32, i32, i32) {
    %c0_i32 = arith.constant 0 : i32
    %c0_i32_0 = arith.constant 0 : i32
    return %arg0, %arg1, %c0_i32 : i32, i32, i32
  }
}

module attributes {stable_mosaic.version = 11 : i64} {
  func.func @kernel(%arg0: i32, %arg1: i32, %arg2: memref<16x32xbf16, #tpu.memory_space<vmem>>, %arg3: memref<64x32xbf16, #tpu.memory_space<vmem>>, %arg4: memref<16x1xi32, #tpu.memory_space<vmem>>, %arg5: memref<16x64xf32, #tpu.memory_space<vmem>>, %arg6: memref<16x1xf32, #tpu.memory_space<vmem>>, %arg7: memref<16x1xf32, #tpu.memory_space<vmem>>, %arg8: memref<16x1xf32, #tpu.memory_space<vmem>>, %arg9: memref<16x1xf32, #tpu.memory_space<vmem>>, %arg10: memref<16x1xf32, #tpu.memory_space<vmem>>) attributes {dimension_semantics = [#tpu.dimension_semantics<parallel>, #tpu.dimension_semantics<arbitrary>], iteration_bounds = array<i64: 1, 1>, scalar_prefetch = 0 : i64, scratch_operands = 3 : i64, tpu.core_type = #tpu.core_type<tc>, window_params = [{transform_indices = @transform_0, window_bounds = array<i64: 16, 32>}, {transform_indices = @transform_1, window_bounds = array<i64: 64, 32>}, {transform_indices = @transform_2, window_bounds = array<i64: 16, 1>}, {transform_indices = @transform_3, window_bounds = array<i64: 16, 64>}, {transform_indices = @transform_4, window_bounds = array<i64: 16, 1>}, {transform_indices = @transform_5, window_bounds = array<i64: 16, 1>}]} {
    %c0_i32 = arith.constant 0 : i32
    %0 = arith.cmpi eq, %arg1, %c0_i32 : i32
    %1 = arith.extui %0 : i1 to i32
    %c0_i32_0 = arith.constant 0 : i32
    %2 = arith.cmpi ne, %1, %c0_i32_0 : i32
    scf.if %2 {
      %cst_29 = arith.constant 0xFF800000 : f32
      %43 = vector.broadcast %cst_29 : f32 to vector<16x1xf32>
      %c0_30 = arith.constant 0 : index
      %c0_31 = arith.constant 0 : index
      %44 = vector.load %arg8[%c0_30, %c0_31] : memref<16x1xf32, #tpu.memory_space<vmem>>, vector<16x1xf32>
      tpu.vector_store %arg8[%c0_30, %c0_31], %43 {strides = array<i32>} : memref<16x1xf32, #tpu.memory_space<vmem>>, vector<16x1xf32>,
      %cst_32 = arith.constant 0.000000e+00 : f32
      %45 = vector.broadcast %cst_32 : f32 to vector<16x1xf32>
      %c0_33 = arith.constant 0 : index
      %c0_34 = arith.constant 0 : index
      %46 = vector.load %arg9[%c0_33, %c0_34] : memref<16x1xf32, #tpu.memory_space<vmem>>, vector<16x1xf32>
      tpu.vector_store %arg9[%c0_33, %c0_34], %45 {strides = array<i32>} : memref<16x1xf32, #tpu.memory_space<vmem>>, vector<16x1xf32>,
      %cst_35 = arith.constant 0.000000e+00 : f32
      %47 = vector.broadcast %cst_35 : f32 to vector<16x1xf32>
      %c0_36 = arith.constant 0 : index
      %c0_37 = arith.constant 0 : index
      %48 = vector.load %arg10[%c0_36, %c0_37] : memref<16x1xf32, #tpu.memory_space<vmem>>, vector<16x1xf32>
      tpu.vector_store %arg10[%c0_36, %c0_37], %47 {strides = array<i32>} : memref<16x1xf32, #tpu.memory_space<vmem>>, vector<16x1xf32>,
    } else {
    }
    %c0 = arith.constant 0 : index
    %c0_1 = arith.constant 0 : index
    %3 = vector.load %arg2[%c0, %c0_1] : memref<16x32xbf16, #tpu.memory_space<vmem>>, vector<16x32xbf16>
    %c0_2 = arith.constant 0 : index
    %c0_3 = arith.constant 0 : index
    %4 = vector.load %arg3[%c0_2, %c0_3] : memref<64x32xbf16, #tpu.memory_space<vmem>>, vector<64x32xbf16>
    %cst = arith.constant dense<0.000000e+00> : vector<16x64xf32>
    %5 = tpu.matmul %3, %4, %cst {dimension_numbers = #tpu.dot_dimension_numbers<[1], [1], [0], [0], [0, 0, 1, 0], [], []>} : vector<16x32xbf16>, vector<64x32xbf16>, vector<16x64xf32> -> vector<16x64xf32>
    %cst_4 = arith.constant 0.176776692 : f32
    %6 = vector.broadcast %cst_4 : f32 to vector<16x64xf32>
    %7 = arith.mulf %5, %6 : vector<16x64xf32>
    %c0_5 = arith.constant 0 : index
    %c0_6 = arith.constant 0 : index
    %8 = vector.load %arg5[%c0_5, %c0_6] : memref<16x64xf32, #tpu.memory_space<vmem>>, vector<16x64xf32>
    tpu.vector_store %arg5[%c0_5, %c0_6], %7 {strides = array<i32>} : memref<16x64xf32, #tpu.memory_space<vmem>>, vector<16x64xf32>,
    %c0_7 = arith.constant 0 : index
    %c0_8 = arith.constant 0 : index
    %9 = vector.load %arg4[%c0_7, %c0_8] : memref<16x1xi32, #tpu.memory_space<vmem>>, vector<16x1xi32>
    %10 = tpu.iota {dimensions = array<i32: 1>} : vector<16x64xi32>
    %c64_i32 = arith.constant 64 : i32
    %11 = arith.muli %arg1, %c64_i32 : i32
    %12 = vector.broadcast %11 : i32 to vector<16x64xi32>
    %13 = arith.addi %10, %12 : vector<16x64xi32>
    %c0_9 = arith.constant 0 : index
    %c0_10 = arith.constant 0 : index
    %14 = vector.load %arg10[%c0_9, %c0_10] : memref<16x1xf32, #tpu.memory_space<vmem>>, vector<16x1xf32>
    %15 = vector.broadcast %9 : vector<16x1xi32> to vector<16x64xi32>
    %16 = arith.cmpi eq, %13, %15 : vector<16x64xi32>
    %cst_11 = arith.constant 0.000000e+00 : f32
    %17 = vector.broadcast %cst_11 : f32 to vector<16x64xf32>
    %18 = arith.select %16, %7, %17 : vector<16x64xi1>, vector<16x64xf32>
    %cst_12 = arith.constant dense<0.000000e+00> : vector<16xf32>
    %19 = vector.multi_reduction <add>, %18, %cst_12 [1] : vector<16x64xf32> to vector<16xf32>
    %20 = vector.shape_cast %19 : vector<16xf32> to vector<16x1xf32>
    %21 = arith.addf %14, %20 : vector<16x1xf32>
    %c0_13 = arith.constant 0 : index
    %c0_14 = arith.constant 0 : index
    %22 = vector.load %arg10[%c0_13, %c0_14] : memref<16x1xf32, #tpu.memory_space<vmem>>, vector<16x1xf32>
    tpu.vector_store %arg10[%c0_13, %c0_14], %21 {strides = array<i32>} : memref<16x1xf32, #tpu.memory_space<vmem>>, vector<16x1xf32>,
    %c0_15 = arith.constant 0 : index
    %c0_16 = arith.constant 0 : index
    %23 = vector.load %arg8[%c0_15, %c0_16] : memref<16x1xf32, #tpu.memory_space<vmem>>, vector<16x1xf32>
    %cst_17 = arith.constant dense<0xFF800000> : vector<16xf32>
    %24 = vector.multi_reduction <maximumf>, %7, %cst_17 [1] : vector<16x64xf32> to vector<16xf32>
    %25 = vector.shape_cast %24 : vector<16xf32> to vector<16x1xf32>
    %26 = arith.maximumf %23, %25 : vector<16x1xf32>
    %c0_18 = arith.constant 0 : index
    %c0_19 = arith.constant 0 : index
    %27 = vector.load %arg9[%c0_18, %c0_19] : memref<16x1xf32, #tpu.memory_space<vmem>>, vector<16x1xf32>
    %c0_20 = arith.constant 0 : index
    %c0_21 = arith.constant 0 : index
    %28 = vector.load %arg8[%c0_20, %c0_21] : memref<16x1xf32, #tpu.memory_space<vmem>>, vector<16x1xf32>
    %29 = arith.subf %28, %26 : vector<16x1xf32>
    %30 = math.exp %29 : vector<16x1xf32>
    %31 = arith.mulf %27, %30 : vector<16x1xf32>
    %32 = vector.broadcast %26 : vector<16x1xf32> to vector<16x64xf32>
    %33 = arith.subf %7, %32 : vector<16x64xf32>
    %34 = math.exp %33 : vector<16x64xf32>
    %cst_22 = arith.constant dense<0.000000e+00> : vector<16xf32>
    %35 = vector.multi_reduction <add>, %34, %cst_22 [1] : vector<16x64xf32> to vector<16xf32>
    %36 = vector.shape_cast %35 : vector<16xf32> to vector<16x1xf32>
    %37 = arith.addf %31, %36 : vector<16x1xf32>
    %c0_23 = arith.constant 0 : index
    %c0_24 = arith.constant 0 : index
    %38 = vector.load %arg9[%c0_23, %c0_24] : memref<16x1xf32, #tpu.memory_space<vmem>>, vector<16x1xf32>
    tpu.vector_store %arg9[%c0_23, %c0_24], %37 {strides = array<i32>} : memref<16x1xf32, #tpu.memory_space<vmem>>, vector<16x1xf32>,
    %c0_25 = arith.constant 0 : index
    %c0_26 = arith.constant 0 : index
    %39 = vector.load %arg8[%c0_25, %c0_26] : memref<16x1xf32, #tpu.memory_space<vmem>>, vector<16x1xf32>
    tpu.vector_store %arg8[%c0_25, %c0_26], %26 {strides = array<i32>} : memref<16x1xf32, #tpu.memory_space<vmem>>, vector<16x1xf32>,
    %c0_i32_27 = arith.constant 0 : i32
    %40 = arith.cmpi eq, %arg1, %c0_i32_27 : i32
    %41 = arith.extui %40 : i1 to i32
    %c0_i32_28 = arith.constant 0 : i32
    %42 = arith.cmpi ne, %41, %c0_i32_28 : i32
    scf.if %42 {
      %c-100_i32 = arith.constant -100 : i32
      %43 = vector.broadcast %c-100_i32 : i32 to vector<16x1xi32>
      %44 = arith.cmpi ne, %9, %43 : vector<16x1xi32>
      %45 = arith.extui %44 : vector<16x1xi1> to vector<16x1xi32>
      %46 = arith.sitofp %45 : vector<16x1xi32> to vector<16x1xf32>
      %c0_29 = arith.constant 0 : index
      %c0_30 = arith.constant 0 : index
      %47 = vector.load %arg8[%c0_29, %c0_30] : memref<16x1xf32, #tpu.memory_space<vmem>>, vector<16x1xf32>
      %c0_31 = arith.constant 0 : index
      %c0_32 = arith.constant 0 : index
      %48 = vector.load %arg9[%c0_31, %c0_32] : memref<16x1xf32, #tpu.memory_space<vmem>>, vector<16x1xf32>
      %49 = math.log %48 : vector<16x1xf32>
      %50 = arith.addf %47, %49 : vector<16x1xf32>
      %c0_33 = arith.constant 0 : index
      %c0_34 = arith.constant 0 : index
      %51 = vector.load %arg10[%c0_33, %c0_34] : memref<16x1xf32, #tpu.memory_space<vmem>>, vector<16x1xf32>
      %52 = arith.subf %50, %51 : vector<16x1xf32>
      %53 = arith.mulf %52, %46 : vector<16x1xf32>
      %c0_35 = arith.constant 0 : index
      %c0_36 = arith.constant 0 : index
      %54 = vector.load %arg6[%c0_35, %c0_36] : memref<16x1xf32, #tpu.memory_space<vmem>>, vector<16x1xf32>
      tpu.vector_store %arg6[%c0_35, %c0_36], %53 {strides = array<i32>} : memref<16x1xf32, #tpu.memory_space<vmem>>, vector<16x1xf32>,
      %c0_37 = arith.constant 0 : index
      %c0_38 = arith.constant 0 : index
      %55 = vector.load %arg7[%c0_37, %c0_38] : memref<16x1xf32, #tpu.memory_space<vmem>>, vector<16x1xf32>
      tpu.vector_store %arg7[%c0_37, %c0_38], %46 {strides = array<i32>} : memref<16x1xf32, #tpu.memory_space<vmem>>, vector<16x1xf32>,
    } else {
    }
    return
  }
  func.func @transform_0(%arg0: i32, %arg1: i32) -> (i32, i32) {
    %c0_i32 = arith.constant 0 : i32
    %c0_i32_0 = arith.constant 0 : i32
    return %arg0, %c0_i32 : i32, i32
  }
  func.func @transform_1(%arg0: i32, %arg1: i32) -> (i32, i32) {
    %c0_i32 = arith.constant 0 : i32
    %c0_i32_0 = arith.constant 0 : i32
    return %arg1, %c0_i32 : i32, i32
  }
  func.func @transform_2(%arg0: i32, %arg1: i32) -> (i32, i32) {
    %c0_i32 = arith.constant 0 : i32
    %c0_i32_0 = arith.constant 0 : i32
    return %arg0, %c0_i32 : i32, i32
  }
  func.func @transform_3(%arg0: i32, %arg1: i32) -> (i32, i32) {
    %c0_i32 = arith.constant 0 : i32
    return %arg0, %arg1 : i32, i32
  }
  func.func @transform_4(%arg0: i32, %arg1: i32) -> (i32, i32) {
    %c0_i32 = arith.constant 0 : i32
    %c0_i32_0 = arith.constant 0 : i32
    return %arg0, %c0_i32 : i32, i32
  }
  func.func @transform_5(%arg0: i32, %arg1: i32) -> (i32, i32) {
    %c0_i32 = arith.constant 0 : i32
    %c0_i32_0 = arith.constant 0 : i32
    return %arg0, %c0_i32 : i32, i32
  }
}

</mosaic_0001>

<bundles_post_ra>
// kernel: _lambda_.37
= control target key start
LH: loop header
LB: loop body
LE: loop exit
PB: predicated region body
PF: predicated region fallthrough
CT: control target
= control target key end

     0   :  { %vm17_vm0 = vcmask 261120   ;;  %v82_v7 = vmov 32.0   ;;  %vm64_vm5 = vcmask 257024   ;;  %s110_s0 = inlined_call_operand.vmem [shape: bf16[16,32], index: 0, kind: input, shape index: {}]   ;;  %s111_s1 = inlined_call_operand.vmem [shape: bf16[1,32], index: 1, kind: input, shape index: {}]   ;;  %s112_s2 = inlined_call_operand.vmem [shape: bf16[16,32], index: 2, kind: output, shape index: {}]  }
   0x1   :  { %v72_v0 = vld [vmem:[%s110_s0] sm:$0xff]   ;;  %76 = vrcp.f32 %v82_v7 }
   0x2   :  { %v73_v1 = vunpack.c.l.bf16 %v72_v0  ;;  %v74_v3 = vunpack.c.h.bf16 %v72_v0  ;;  %v57_v22 = vld [vmem:[%s111_s1] sm:$0x1] }
   0x3   :  { %v58_v25 = vunpack.c.l.bf16 %v57_v22 }
   0x4   :  { %v15_v2 = vmul.f32 %v73_v1, %v73_v1  ;;  %v16_v5 = vmul.f32 %v74_v3, %v74_v3 }
   0x5   :  { %v59_v30 = vperm.slane %v58_v25, 0 }
   0x6   :  { %v18_v4 = vsel %vm17_vm0, %v15_v2, 0.0  ;;  %v21_v6 = vsel %vm17_vm0, %v16_v5, 0.0 }
   0x7   :  { %19 = vadd.xlane.f32.xlu0 %v18_v4  ;;  %v77_v8 = vpop.eup %76 }
   0x8   :  { %v25_v9 = vmul.f32 32.0, %v77_v8  ;;  %vm29_vm1 = vweird.f32 %v77_v8 }
   0xa   :  { %v26_v10 = vsub.f32 1.0, %v25_v9 }
   0xc   :  { %v27_v11 = vmul.f32 %v77_v8, %v26_v10 }
   0xe   :  { %v28_v12 = vadd.f32 %v77_v8, %v27_v11 }
   0xf   :  { %22 = vadd.xlane.f32.xlu0 %v21_v6 }
  0x10   :  { %v30_v13 = vsel %vm29_vm1, %v77_v8, %v28_v12 }
  0x7a   :  { %v20_v14 = vpop.xlane.xlu0 %19 }
  0x7b   :  { %v31_v15 = vmul.f32 %v30_v13, %v20_v14 }
  0x7d   :  { %v33_v16 = vadd.f32 1e-06, %v31_v15 }
  0x7f   :  { %78 = vrsqrt.f32 %v33_v16  ;;  %vm41_vm3 = vweird.f32 %v33_v16 }
  0x82   :  { %v23_v17 = vpop.xlane.xlu0 %22 }
  0x83   :  { %v32_v18 = vmul.f32 %v30_v13, %v23_v17 }
  0x85   :  { %v79_v19 = vpop.eup %78  ;;  %v34_v20 = vadd.f32 1e-06, %v32_v18 }
  0x86   :  { %v36_v21 = vmul.f32 %v79_v19, %v33_v16  ;;  %vm42_vm2 = vweird.f32 %v79_v19 }
  0x87   :  { %80 = vrsqrt.f32 %v34_v20  ;;  %vm43_vm4 = vmor %vm41_vm3, %vm42_vm2  ;;  %vm51_vm7 = vweird.f32 %v34_v20 }
  0x88   :  { %v37_v23 = vmul.f32 %v79_v19, %v36_v21 }
  0x8a   :  { %v38_v24 = vmul.f32 0.5, %v37_v23 }
  0x8c   :  { %v39_v26 = vsub.f32 1.5, %v38_v24 }
  0x8d   :  { %v81_v27 = vpop.eup %80 }
  0x8e   :  { %v40_v28 = vmul.f32 %v79_v19, %v39_v26  ;;  %v46_v29 = vmul.f32 %v81_v27, %v34_v20  ;;  %vm52_vm6 = vweird.f32 %v81_v27 }
  0x8f   :  { %vm53_vm8 = vmor %vm51_vm7, %vm52_vm6 }
  0x90   :  { %v44_v31 = vsel %vm43_vm4, %v79_v19, %v40_v28  ;;  %v47_v32 = vmul.f32 %v81_v27, %v46_v29 }
  0x91   :  { %v55_v33 = vmul.f32 %v73_v1, %v44_v31 }
  0x92   :  { %v48_v34 = vmul.f32 0.5, %v47_v32 }
  0x93   :  { %v60_v35 = vmul.f32 %v59_v30, %v55_v33 }
  0x94   :  { %v49_v36 = vsub.f32 1.5, %v48_v34 }
  0x95   :  { %v62_v37 = vpack.c.bf16 %v60_v35, %v60_v35 }
  0x96   :  { %v50_v38 = vmul.f32 %v81_v27, %v49_v36 }
  0x97   :  { %65 = vst.msk [vmem:[%s112_s2] sm:$0xf] %vm64_vm5, %v62_v37 }
  0x98   :  { %v54_v39 = vsel %vm53_vm8, %v81_v27, %v50_v38 }
  0x99   :  { %v56_v40 = vmul.f32 %v74_v3, %v54_v39 }
  0x9b   :  { %v61_v41 = vmul.f32 %v59_v30, %v56_v40 }
  0x9d   :  { %v63_v42 = vpack.c.bf16 %v61_v41, %v61_v41 }
  0x9f   :  { %66 = vst.msk [vmem:[%s112_s2 + $0x4] sm:$0xf] %vm64_vm5, %v63_v42 }

// kernel: _lambda_.38
= control target key start
LH: loop header
LB: loop body
LE: loop exit
PB: predicated region body
PF: predicated region fallthrough
CT: control target
= control target key end

     0   :  { %vm25_vm0 = vcmask 261120   ;;  %v224_v3 = vmov 0.0   ;;  %vm158_vm1 = vcmask 257024   ;;  %s320_s1 = inlined_call_operand.vmem [shape: bf16[32,32], index: 1, kind: input, shape index: {}]   ;;  %s321_s2 = inlined_call_operand.vmem [shape: bf16[32,32], index: 2, kind: input, shape index: {}]   ;;  %s322_s3 = inlined_call_operand.vmem [shape: bf16[32,32], index: 3, kind: input, shape index: {}]   ;;  %s323_s0 = inlined_call_operand.vmem [shape: bf16[16,32], index: 0, kind: input, shape index: {}]   ;;  %s324_s4 = inlined_call_operand.vmem [shape: bf16[16,32], index: 4, kind: output, shape index: {0}]   ;;  %s325_s5 = inlined_call_operand.vmem [shape: bf16[16,32], index: 5, kind: output, shape index: {1}]   ;;  %s326_s6 = inlined_call_operand.vmem [shape: bf16[16,32], index: 6, kind: output, shape index: {2}]  }
   0x1   :  { %v218_v0 = vld [vmem:[%s320_s1 + $0x8] sm:$0xff]  ;;  %26 = vst.msk [vmem:[#allocation2] sm:$0xff] %vm25_vm0, %v224_v3  ;;  %v217_v4 = vld [vmem:[%s320_s1] sm:$0xff] }
   0x2   :  { %v220_v1 = vld [vmem:[%s321_s2 + $0x8] sm:$0xff]  ;;  %27 = vst.msk [vmem:[#allocation2 + $0x8] sm:$0xff] %vm25_vm0, %v224_v3  ;;  %67 = vmatpush.bf16.msra.mxu0 %v218_v0  ;;  %v219_v5 = vld [vmem:[%s321_s2] sm:$0xff] }
   0x3   :  { %v222_v2 = vld [vmem:[%s322_s3 + $0x8] sm:$0xff]  ;;  %103 = vmatpush.bf16.msra.mxu1 %v220_v1  ;;  %28 = vst.msk [vmem:[#allocation3] sm:$0xff] %vm25_vm0, %v224_v3  ;;  %v221_v6 = vld [vmem:[%s322_s3] sm:$0xff] }
   0x4   :  { %139 = vmatpush.bf16.msra.mxu2 %v222_v2  ;;  %29 = vst.msk [vmem:[#allocation3 + $0x8] sm:$0xff] %vm25_vm0, %v224_v3  ;;  %v216_v7 = vld [vmem:[%s323_s0] sm:$0xff] }
   0x5   :  { %30 = vst.msk [vmem:[#allocation4] sm:$0xff] %vm25_vm0, %v224_v3 }
   0x6   :  { %31 = vst.msk [vmem:[#allocation4 + $0x8] sm:$0xff] %vm25_vm0, %v224_v3  ;;  %68 = vmatpush.bf16.msra.mxu0 %v217_v4 }
   0x7   :  { %104 = vmatpush.bf16.msra.mxu1 %v219_v5 }
   0x8   :  { %140 = vmatpush.bf16.msra.mxu2 %v221_v6  ;;  %v34_v8 = vld [vmem:[#allocation2] sm:$0xff] }
   0x9   :  { %197 = vmatmul.msk.bf16.vlgmr.msra.gmra.mxu0 %vm25_vm0, %v216_v7  ;;  %v35_v15 = vld [vmem:[#allocation2 + $0x8] sm:$0xff] }
   0xa   :  { %206 = vmatmul.msk.bf16.vlgmr.msra.gmra.mxu1 %vm25_vm0, %v216_v7  ;;  %v79_v9 = vld [vmem:[#allocation3] sm:$0xff] }
   0xb   :  { %215 = vmatmul.msk.bf16.vlgmr.msra.gmra.mxu2 %vm25_vm0, %v216_v7  ;;  %v80_v16 = vld [vmem:[#allocation3 + $0x8] sm:$0xff] }
   0xc   :  { %v115_v14 = vld [vmem:[#allocation4] sm:$0xff] }
   0xd   :  { %v116_v27 = vld [vmem:[#allocation4 + $0x8] sm:$0xff] }
  0x86   :  { %v70_v10 = vpop.f32.mrf.mxu0 }
  0x87   :  { %v106_v11 = vpop.f32.mrf.mxu1  ;;  %v75_v12 = vadd.f32 %v70_v10, %v34_v8 }
  0x88   :  { %v111_v13 = vadd.f32 %v106_v11, %v79_v9 }
  0x89   :  { %77 = vst.msk [vmem:[#allocation2] sm:$0xff] %vm25_vm0, %v75_v12 }
  0x8a   :  { %113 = vst.msk [vmem:[#allocation3] sm:$0xff] %vm25_vm0, %v111_v13 }
  0x8e   :  { %v142_v17 = vpop.f32.mrf.mxu2  ;;  %v72_v19 = vpop.f32.mrf.mxu0 }
  0x8f   :  { %v147_v18 = vadd.f32 %v142_v17, %v115_v14  ;;  %v108_v20 = vpop.f32.mrf.mxu1  ;;  %v76_v21 = vadd.f32 %v72_v19, %v35_v15 }
  0x90   :  { %v112_v22 = vadd.f32 %v108_v20, %v80_v16  ;;  %v154_v23 = vld [vmem:[#allocation2] sm:$0xff] }
  0x91   :  { %149 = vst.msk [vmem:[#allocation4] sm:$0xff] %vm25_vm0, %v147_v18  ;;  %v156_v24 = vpack.c.bf16 %v154_v23, %v154_v23  ;;  %v161_v25 = vld [vmem:[#allocation3] sm:$0xff] }
  0x92   :  { %78 = vst.msk [vmem:[#allocation2 + $0x8] sm:$0xff] %vm25_vm0, %v76_v21  ;;  %v163_v26 = vpack.c.bf16 %v161_v25, %v161_v25 }
  0x93   :  { %114 = vst.msk [vmem:[#allocation3 + $0x8] sm:$0xff] %vm25_vm0, %v112_v22 }
  0x94   :  { %159 = vst.msk [vmem:[%s324_s4] sm:$0xf] %vm158_vm1, %v156_v24 }
  0x95   :  { %165 = vst.msk [vmem:[%s325_s5] sm:$0xf] %vm158_vm1, %v163_v26 }
  0x96   :  { %v144_v28 = vpop.f32.mrf.mxu2 }
  0x97   :  { %v148_v29 = vadd.f32 %v144_v28, %v116_v27 }
  0x98   :  { %v167_v30 = vld [vmem:[#allocation4] sm:$0xff] }
  0x99   :  { %v169_v31 = vpack.c.bf16 %v167_v30, %v167_v30  ;;  %v155_v32 = vld [vmem:[#allocation2 + $0x8] sm:$0xff]  ;;  %150 = vst.msk [vmem:[#allocation4 + $0x8] sm:$0xff] %vm25_vm0, %v148_v29 }
  0x9a   :  { %v157_v33 = vpack.c.bf16 %v155_v32, %v155_v32  ;;  %v162_v34 = vld [vmem:[#allocation3 + $0x8] sm:$0xff] }
  0x9b   :  { %171 = vst.msk [vmem:[%s326_s6] sm:$0xf] %vm158_vm1, %v169_v31  ;;  %v164_v35 = vpack.c.bf16 %v162_v34, %v162_v34 }
  0x9c   :  { %160 = vst.msk [vmem:[%s324_s4 + $0x4] sm:$0xf] %vm158_vm1, %v157_v33 }
  0x9d   :  { %166 = vst.msk [vmem:[%s325_s5 + $0x4] sm:$0xf] %vm158_vm1, %v164_v35 }
  0xa0   :  { %v168_v36 = vld [vmem:[#allocation4 + $0x8] sm:$0xff] }
  0xa1   :  { %v170_v37 = vpack.c.bf16 %v168_v36, %v168_v36 }
  0xa3   :  { %172 = vst.msk [vmem:[%s326_s6 + $0x4] sm:$0xf] %vm158_vm1, %v170_v37 }

// kernel: _lambda_.40
= control target key start
LH: loop header
LB: loop body
LE: loop exit
PB: predicated region body
PF: predicated region fallthrough
CT: control target
= control target key end

     0   :  { %vm19_vm0 = vcmask 261120   ;;  %v110_v1 = vmov 0.0   ;;  %vm82_vm1 = vcmask 257024   ;;  %s154_s1 = inlined_call_operand.vmem [shape: bf16[32,32], index: 1, kind: input, shape index: {}]   ;;  %s155_s0 = inlined_call_operand.vmem [shape: bf16[16,32], index: 0, kind: input, shape index: {}]   ;;  %s156_s2 = inlined_call_operand.vmem [shape: bf16[16,32], index: 2, kind: input, shape index: {}]   ;;  %s157_s3 = inlined_call_operand.vmem [shape: bf16[16,32], index: 3, kind: output, shape index: {}]  }
   0x1   :  { %v104_v0 = vld [vmem:[%s154_s1 + $0x8] sm:$0xff]  ;;  %20 = vst.msk [vmem:[#allocation2] sm:$0xff] %vm19_vm0, %v110_v1  ;;  %v103_v2 = vld [vmem:[%s154_s1] sm:$0xff] }
   0x2   :  { %21 = vst.msk [vmem:[#allocation2 + $0x8] sm:$0xff] %vm19_vm0, %v110_v1  ;;  %57 = vmatpush.bf16.msra.mxu0 %v104_v0  ;;  %v102_v3 = vld [vmem:[%s155_s0] sm:$0xff] }
   0x3   :  { %v106_v7 = vld [vmem:[%s156_s2] sm:$0xff]  }
   0x4   :  { %v107_v9 = vunpack.c.l.bf16 %v106_v7  ;;  %v108_v15 = vunpack.c.h.bf16 %v106_v7 }
   0x6   :  { %58 = vmatpush.bf16.msra.mxu0 %v103_v2 }
   0x8   :  { %v22_v4 = vld [vmem:[#allocation2] sm:$0xff] }
   0x9   :  { %101 = vmatmul.msk.bf16.vlgmr.msra.gmra.mxu0 %vm19_vm0, %v102_v3  ;;  %v23_v8 = vld [vmem:[#allocation2 + $0x8] sm:$0xff] }
  0x86   :  { %v60_v5 = vpop.f32.mrf.mxu0 }
  0x87   :  { %v65_v6 = vadd.f32 %v60_v5, %v22_v4 }
  0x89   :  { %67 = vst.msk [vmem:[#allocation2] sm:$0xff] %vm19_vm0, %v65_v6 }
  0x8e   :  { %v62_v10 = vpop.f32.mrf.mxu0 }
  0x8f   :  { %v66_v11 = vadd.f32 %v62_v10, %v23_v8 }
  0x90   :  { %v72_v12 = vld [vmem:[#allocation2] sm:$0xff] }
  0x91   :  { %v78_v13 = vadd.f32 %v107_v9, %v72_v12  ;;  %68 = vst.msk [vmem:[#allocation2 + $0x8] sm:$0xff] %vm19_vm0, %v66_v11 }
  0x93   :  { %v80_v14 = vpack.c.bf16 %v78_v13, %v78_v13 }
  0x95   :  { %83 = vst.msk [vmem:[%s157_s3] sm:$0xf] %vm82_vm1, %v80_v14 }
  0x98   :  { %v73_v16 = vld [vmem:[#allocation2 + $0x8] sm:$0xff] }
  0x99   :  { %v79_v17 = vadd.f32 %v108_v15, %v73_v16 }
  0x9b   :  { %v81_v18 = vpack.c.bf16 %v79_v17, %v79_v17 }
  0x9d   :  { %84 = vst.msk [vmem:[%s157_s3 + $0x4] sm:$0xf] %vm82_vm1, %v81_v18 }

// kernel: _lambda_.42
= control target key start
LH: loop header
LB: loop body
LE: loop exit
PB: predicated region body
PF: predicated region fallthrough
CT: control target
= control target key end

     0   :  { %vm22_vm0 = vcmask 261120   ;;  %v187_v7 = vmov 0.0   ;;  %vm103_vm1 = vcmask 523264   ;;  %vm138_vm2 = vcmask 257024   ;;  %s248_s1 = inlined_call_operand.vmem [shape: bf16[32,64], index: 1, kind: input, shape index: {}]   ;;  %s249_s2 = inlined_call_operand.vmem [shape: bf16[64,32], index: 2, kind: input, shape index: {}]   ;;  %s250_s0 = inlined_call_operand.vmem [shape: bf16[16,32], index: 0, kind: input, shape index: {}]   ;;  %s251_s3 = inlined_call_operand.vmem [shape: bf16[16,32], index: 3, kind: input, shape index: {}]   ;;  %s252_s4 = inlined_call_operand.vmem [shape: bf16[16,32], index: 4, kind: output, shape index: {}]  }
   0x1   :  { %v177_v0 = vld [vmem:[%s248_s1 + $0x8] sm:$0xff]  ;;  %v181_v1 = vld [vmem:[%s249_s2 + $0x18] sm:$0xff]  ;;  %v176_v2 = vld [vmem:[%s248_s1] sm:$0xff]  ;;  %23 = vst.msk [vmem:[#allocation2] sm:$0xff] %vm22_vm0, %v187_v7 }
   0x2   :  { %58 = vmatpush.bf16.msra.mxu0 %v177_v0  ;;  %111 = vmatpush.bf16.msra.mxu1 %v181_v1  ;;  %v175_v3 = vld [vmem:[%s250_s0] sm:$0xff]  ;;  %v180_v4 = vld [vmem:[%s249_s2 + $0x10] sm:$0xff]  ;;  %v179_v5 = vld [vmem:[%s249_s2 + $0x8] sm:$0xff]  ;;  %24 = vst.msk [vmem:[#allocation2 + $0x8] sm:$0xff] %vm22_vm0, %v187_v7 }
   0x3   :  { %v178_v6 = vld [vmem:[%s249_s2] sm:$0xff] }
   0x4   :  { %v183_v16 = vld [vmem:[%s251_s3] sm:$0xff]  }
   0x5   :  { %v184_v18 = vunpack.c.l.bf16 %v183_v16  ;;  %v185_v24 = vunpack.c.h.bf16 %v183_v16 }
   0x6   :  { %59 = vmatpush.bf16.msra.mxu0 %v176_v2  ;;  %112 = vmatpush.bf16.msra.mxu1 %v180_v4 }
   0x8   :  { %v69_v13 = vld [vmem:[#allocation2] sm:$0xff] }
   0x9   :  { %157 = vmatmul.msk.bf16.vlgmr.msra.gmra.mxu0 %vm22_vm0, %v175_v3  ;;  %v70_v17 = vld [vmem:[#allocation2 + $0x8] sm:$0xff] }
   0xa   :  { %113 = vmatpush.bf16.msra.mxu1 %v179_v5 }
   0xe   :  { %114 = vmatpush.bf16.msra.mxu1 %v178_v6 }
  0x86   :  { %v61_v8 = vpop.f32.mrf.mxu0 }
  0x87   :  { %v66_v10 = vmax.f32 %v61_v8, 0.0 }
  0x8e   :  { %v63_v9 = vpop.f32.mrf.mxu0 }
  0x8f   :  { %v67_v11 = vmax.f32 %v63_v9, 0.0 }
  0x91   :  { %v68_v12 = vpack.c.bf16 %v67_v11, %v66_v10 }
  0x93   :  { %174 = vmatmul.msk.bf16.vlgmr.msra.gmra.mxu1 %vm103_vm1, %v68_v12 }
 0x110   :  { %v116_v14 = vpop.f32.mrf.mxu1 }
 0x111   :  { %v121_v15 = vadd.f32 %v116_v14, %v69_v13 }
 0x113   :  { %123 = vst.msk [vmem:[#allocation2] sm:$0xff] %vm22_vm0, %v121_v15 }
 0x118   :  { %v118_v19 = vpop.f32.mrf.mxu1 }
 0x119   :  { %v122_v20 = vadd.f32 %v118_v19, %v70_v17 }
 0x11a   :  { %v128_v21 = vld [vmem:[#allocation2] sm:$0xff] }
 0x11b   :  { %v134_v22 = vadd.f32 %v184_v18, %v128_v21  ;;  %124 = vst.msk [vmem:[#allocation2 + $0x8] sm:$0xff] %vm22_vm0, %v122_v20 }
 0x11d   :  { %v136_v23 = vpack.c.bf16 %v134_v22, %v134_v22 }
 0x11f   :  { %139 = vst.msk [vmem:[%s252_s4] sm:$0xf] %vm138_vm2, %v136_v23 }
 0x122   :  { %v129_v25 = vld [vmem:[#allocation2 + $0x8] sm:$0xff] }
 0x123   :  { %v135_v26 = vadd.f32 %v185_v24, %v129_v25 }
 0x125   :  { %v137_v27 = vpack.c.bf16 %v135_v26, %v135_v26 }
 0x127   :  { %140 = vst.msk [vmem:[%s252_s4 + $0x4] sm:$0xf] %vm138_vm2, %v137_v27 }

// kernel: _lambda_.56
= control target key start
LH: loop header
LB: loop body
LE: loop exit
PB: predicated region body
PF: predicated region fallthrough
CT: control target
= control target key end

     0   :  { %vm21_vm0 = vcmask 261120   ;;  %v161_v2 = vmov 0.0   ;;  %vm116_vm1 = vcmask 257024   ;;  %s224_s1 = inlined_call_operand.vmem [shape: bf16[32,32], index: 1, kind: input, shape index: {}]   ;;  %s225_s2 = inlined_call_operand.vmem [shape: bf16[32,32], index: 2, kind: input, shape index: {}]   ;;  %s226_s0 = inlined_call_operand.vmem [shape: bf16[16,32], index: 0, kind: input, shape index: {}]   ;;  %s227_s3 = inlined_call_operand.vmem [shape: bf16[16,32], index: 3, kind: output, shape index: {0}]   ;;  %s228_s4 = inlined_call_operand.vmem [shape: bf16[16,32], index: 4, kind: output, shape index: {1}]  }
   0x1   :  { %v157_v0 = vld [vmem:[%s224_s1 + $0x8] sm:$0xff]  ;;  %22 = vst.msk [vmem:[#allocation2] sm:$0xff] %vm21_vm0, %v161_v2  ;;  %v156_v3 = vld [vmem:[%s224_s1] sm:$0xff] }
   0x2   :  { %v159_v1 = vld [vmem:[%s225_s2 + $0x8] sm:$0xff]  ;;  %23 = vst.msk [vmem:[#allocation2 + $0x8] sm:$0xff] %vm21_vm0, %v161_v2  ;;  %61 = vmatpush.bf16.msra.mxu0 %v157_v0  ;;  %v158_v4 = vld [vmem:[%s225_s2] sm:$0xff] }
   0x3   :  { %97 = vmatpush.bf16.msra.mxu1 %v159_v1  ;;  %24 = vst.msk [vmem:[#allocation3] sm:$0xff] %vm21_vm0, %v161_v2  ;;  %v155_v5 = vld [vmem:[%s226_s0] sm:$0xff] }
   0x4   :  { %25 = vst.msk [vmem:[#allocation3 + $0x8] sm:$0xff] %vm21_vm0, %v161_v2 }
   0x6   :  { %62 = vmatpush.bf16.msra.mxu0 %v156_v3 }
   0x7   :  { %98 = vmatpush.bf16.msra.mxu1 %v158_v4 }
   0x8   :  { %v28_v6 = vld [vmem:[#allocation2] sm:$0xff] }
   0x9   :  { %145 = vmatmul.msk.bf16.vlgmr.msra.gmra.mxu0 %vm21_vm0, %v155_v5  ;;  %v29_v12 = vld [vmem:[#allocation2 + $0x8] sm:$0xff] }
   0xa   :  { %154 = vmatmul.msk.bf16.vlgmr.msra.gmra.mxu1 %vm21_vm0, %v155_v5  ;;  %v73_v7 = vld [vmem:[#allocation3] sm:$0xff] }
   0xb   :  { %v74_v13 = vld [vmem:[#allocation3 + $0x8] sm:$0xff] }
  0x86   :  { %v64_v8 = vpop.f32.mrf.mxu0 }
  0x87   :  { %v100_v9 = vpop.f32.mrf.mxu1  ;;  %v69_v10 = vadd.f32 %v64_v8, %v28_v6 }
  0x88   :  { %v105_v11 = vadd.f32 %v100_v9, %v73_v7 }
  0x89   :  { %71 = vst.msk [vmem:[#allocation2] sm:$0xff] %vm21_vm0, %v69_v10 }
  0x8a   :  { %107 = vst.msk [vmem:[#allocation3] sm:$0xff] %vm21_vm0, %v105_v11 }
  0x8e   :  { %v66_v14 = vpop.f32.mrf.mxu0 }
  0x8f   :  { %v102_v15 = vpop.f32.mrf.mxu1  ;;  %v70_v16 = vadd.f32 %v66_v14, %v29_v12 }
  0x90   :  { %v106_v17 = vadd.f32 %v102_v15, %v74_v13  ;;  %v112_v18 = vld [vmem:[#allocation2] sm:$0xff] }
  0x91   :  { %v114_v19 = vpack.c.bf16 %v112_v18, %v112_v18  ;;  %v119_v20 = vld [vmem:[#allocation3] sm:$0xff]  ;;  %72 = vst.msk [vmem:[#allocation2 + $0x8] sm:$0xff] %vm21_vm0, %v70_v16 }
  0x92   :  { %v121_v21 = vpack.c.bf16 %v119_v20, %v119_v20  ;;  %108 = vst.msk [vmem:[#allocation3 + $0x8] sm:$0xff] %vm21_vm0, %v106_v17 }
  0x93   :  { %117 = vst.msk [vmem:[%s227_s3] sm:$0xf] %vm116_vm1, %v114_v19 }
  0x94   :  { %123 = vst.msk [vmem:[%s228_s4] sm:$0xf] %vm116_vm1, %v121_v21 }
  0x98   :  { %v113_v22 = vld [vmem:[#allocation2 + $0x8] sm:$0xff] }
  0x99   :  { %v115_v23 = vpack.c.bf16 %v113_v22, %v113_v22  ;;  %v120_v24 = vld [vmem:[#allocation3 + $0x8] sm:$0xff] }
  0x9a   :  { %v122_v25 = vpack.c.bf16 %v120_v24, %v120_v24 }
  0x9b   :  { %118 = vst.msk [vmem:[%s227_s3 + $0x4] sm:$0xf] %vm116_vm1, %v115_v23 }
  0x9c   :  { %124 = vst.msk [vmem:[%s228_s4 + $0x4] sm:$0xf] %vm116_vm1, %v122_v25 }

// kernel: _lambda_.39
= control target key start
LH: loop header
LB: loop body
LE: loop exit
PB: predicated region body
PF: predicated region fallthrough
CT: control target
= control target key end

     0   :  { %s1525_s18 = smov 0   ;;  %s1527_s19 = smov 0   ;;  %s1815_s0 = inlined_call_operand.vmem [shape: bf16[2,8,32], index: 0, kind: input, shape index: {}]   ;;  %s1816_s1 = inlined_call_operand.vmem [shape: bf16[2,8,32], index: 1, kind: input, shape index: {}]   ;;  %s1817_s2 = inlined_call_operand.vmem [shape: bf16[2,8,32], index: 2, kind: input, shape index: {}]   ;;  %s1818_s3 = inlined_call_operand.vmem [shape: bf16[1,4,8,8], index: 3, kind: input, shape index: {}]   ;;  %s1819_s4 = inlined_call_operand.vmem [shape: f32[2,1,8], index: 4, kind: input, shape index: {}]   ;;  %s1820_s5 = inlined_call_operand.vmem [shape: bf16[2,8,32], index: 5, kind: output, shape index: {}]  }
   0x1   :  { %s1529_s20 = smov 0  }
   0x2 LB: > { %s34_s21 = sadd.s32 1, %s1478_s19  ;;  %p1373_p0 = scmp.ge.s32.totalorder %s1482_s20, 1  ;;  %s1482_s20 = sphi %s1529_s20, %s15_s20   ;;  %s1478_s19 = sphi %s1527_s19, %s1822_s19   ;;  %s1474_s18 = sphi %s1525_s18, %s1821_s18  }
   0x3   : > { %p36_p1 = scmp.ge.s32.totalorder %s34_s21, 2  ;;  %p267_p2 = scmp.lt.s32.totalorder %s1482_s20, 3 }
   0x5   : > { %s1824_s21 = smov (%p36_p1, %s34_s21), 0  ;;  %p268_p3 = pnand %p1373_p0, %p267_p2 }
   0x6   : > { %p326_p4 = scmp.lt.s32.totalorder (!%p268_p3), %s1474_s18, 1  ;;  %s1484_s29 = smov (!%p268_p3), 104  }
   0x7   : > { %271 = sbr.rel (%p268_p3) target bundleno = 959 (0x3bf), region = 40  ;;  %s1485_s30 = smov (!%p268_p3), 120  }
   0x8   : > { %s1486_s6 = smov (!%p268_p3), 112   ;;  %s1492_s23 = smov (!%p268_p3), 24  }
   0x9   : > { %s1493_s24 = smov (!%p268_p3), 16  }
   0xc   : > { %s1826_s18 = smov (!%p326_p4, %s1474_s18), 1  ;;  %v1487_v4 = vmov 1983009808   ;;  %v1488_v19 = vmov 1934713408   ;;  %vm417_vm0 = vcmask 1047556  }
   0xd   : > { %s1546_s22 = sshll.u32 %s1826_s18, 2  ;;  %v408_v5 = vunpack.c.l.s4 %v1487_v4  ;;  %v422_v20 = vunpack.c.l.s4 %v1488_v19  ;;  %vm381_vm1 = vcmask 64512   ;;  %s359_s12 = scalar_lea.vmem %s1819_s4, %s1826_s18  ;;  %vm372_vm2 = vcmask 7168  }
   0xe   : > { %s339_s25 = scalar_lea.vmem %s1816_s1, %s1546_s22  ;;  %s332_s28 = scalar_lea.vmem %s1815_s0, %s1546_s22  ;;  %vm974_vm3 = vcmask 1043456   ;;  %vm1223_vm4 = vcmask 130048   ;;  %vm1225_vm5 = vcmask 195584   ;;  %vm1228_vm6 = vcmask 257024  }
   0xf   : > { %v509_v0 = vld [vmem:[%s339_s25] sm:$0xf]  ;;  %v1562_v13 = vunpack.c.0.s8 %v408_v5  ;;  %v1568_v33 = vunpack.c.0.s8 %v422_v20  ;;  %s346_s9 = scalar_lea.vmem %s1817_s2, %s1546_s22  ;;  %s1494_s25 = smov 8  }
  0x10   : > { %515 = vrot.lane.b32.xlu1 %v509_v0, %s1484_s29  ;;  %511 = vrot.lane.b32.xlu0 %v509_v0, %s1485_s30  ;;  %v386_v1 = vld [vmem:[%s332_s28] sm:$0xf]  ;;  %v520_v8 = vshrl.u32 %v509_v0, 16  ;;  %s366_s28 = scalar_lea.vmem %s1820_s5, %s1546_s22 }
  0x11   : > { %390 = vrot.lane.b32.xlu2 %v386_v1, %s1486_s6  ;;  %v397_v21 = vshrl.u32 %v386_v1, 16  ;;  %v1584_v51 = vld [vmem:[%s346_s9] sm:$0xf] }
  0x18   : > { %513 = vrot.lane.b32.xlu0 %v509_v0, %s1486_s6  ;;  %388 = vrot.lane.b32.xlu1 %v386_v1, %s1485_s30 }
  0x19   : > { %392 = vrot.lane.b32.xlu2 %v386_v1, %s1484_s29 }
  0x20   : > { %633 = vrot.lane.b32.xlu0 %v1584_v51, %s1485_s30  ;;  %635 = vrot.lane.b32.xlu1 %v1584_v51, %s1486_s6 }
  0x21   : > { %637 = vrot.lane.b32.xlu2 %v1584_v51, %s1484_s29 }
  0x6b   : > { %v391_v2 = vpop.permute.xlu2 %390 }
  0x6c   : > { %v403_v9 = vshrl.u32 %v391_v2, 16 }
  0x73   : > { %v393_v3 = vpop.permute.xlu2 %392 }
  0x74   : > { %v402_v10 = vpack.i.b16 %v393_v3, %v391_v2  ;;  %v404_v11 = vshrl.u32 %v393_v3, 16 }
  0x76   : > { %v405_v16 = vpack.i.b16 %v404_v11, %v403_v9  ;;  %v415_v17 = vperm.slane %v402_v10, %v1562_v13 }
  0x78   : > { %v416_v25 = vrot.slane %v415_v17, 4  ;;  %v442_v26 = vperm.slane %v405_v16, %v1562_v13 }
  0x7a   : > { %v443_v39 = vrot.slane %v442_v26, 4 }
  0x82   : > { %v516_v6 = vpop.permute.xlu1 %515  ;;  %v512_v7 = vpop.permute.xlu0 %511 }
  0x83   : > { %v521_v12 = vshrl.u32 %v512_v7, 16  ;;  %v519_v14 = vpack.i.b16 %v512_v7, %v509_v0  ;;  %v527_v22 = vshrl.u32 %v516_v6, 16 }
  0x85   : > { %v522_v15 = vpack.i.b16 %v521_v12, %v520_v8  ;;  %v533_v18 = vperm.slane %v519_v14, %v1562_v13 }
  0x87   : > { %v559_v23 = vperm.slane %v522_v15, %v1562_v13  ;;  %v541_v32 = vrot.slane %v533_v18, 4 }
  0x89   : > { %v567_v38 = vrot.slane %v559_v23, 4 }
  0x8a   : > { %v514_v24 = vpop.permute.xlu0 %513  ;;  %v389_v27 = vpop.permute.xlu1 %388 }
  0x8b   : > { %v525_v28 = vpack.i.b16 %v516_v6, %v514_v24  ;;  %v526_v29 = vshrl.u32 %v514_v24, 16  ;;  %v396_v30 = vpack.i.b16 %v389_v27, %v386_v1  ;;  %v398_v31 = vshrl.u32 %v389_v27, 16 }
  0x8d   : > { %v528_v34 = vpack.i.b16 %v527_v22, %v526_v29  ;;  %v538_v35 = vperm.slane %v525_v28, %v1562_v13  ;;  %v399_v36 = vpack.i.b16 %v398_v31, %v397_v21  ;;  %v410_v37 = vperm.slane %v396_v30, %v1562_v13 }
  0x8f   : > { %v539_v40 = vrot.slane %v538_v35, 4  ;;  %v542_v41 = vsel %vm417_vm0, %v538_v35, %v541_v32  ;;  %v564_v42 = vperm.slane %v528_v34, %v1562_v13  ;;  %v418_v43 = vsel %vm417_vm0, %v416_v25, %v410_v37 }
  0x90   : > { %v550_v44 = vperm.slane %v542_v41, %v1568_v33  ;;  %v419_v45 = vrot.slane %v410_v37, 4  ;;  %v424_v46 = vperm.slane %v418_v43, %v1568_v33  ;;  %v437_v50 = vperm.slane %v399_v36, %v1562_v13 }
  0x91   : > { %v540_v47 = vsel %vm417_vm0, %v539_v40, %v533_v18  ;;  %v565_v48 = vrot.slane %v564_v42, 4  ;;  %v568_v49 = vsel %vm417_vm0, %v564_v42, %v567_v38 }
  0x92   : > { %v546_v52 = vperm.slane %v540_v47, %v1568_v33  ;;  %v553_v53 = vrot.slane %v550_v44, 4  ;;  %v576_v54 = vperm.slane %v568_v49, %v1568_v33  ;;  %v420_v55 = vsel %vm417_vm0, %v415_v17, %v419_v45 }
  0x93   : > { %v566_v56 = vsel %vm417_vm0, %v565_v48, %v559_v23  ;;  %v428_v57 = vperm.slane %v420_v55, %v1568_v33  ;;  %v444_v58 = vsel %vm417_vm0, %v443_v39, %v437_v50  ;;  %v429_v0 = vrot.slane %v424_v46, 4 }
  0x94   : > { %v551_v59 = vrot.slane %v546_v52, 4  ;;  %v554_v60 = vsel %vm417_vm0, 0, %v553_v53  ;;  %v572_v61 = vperm.slane %v566_v56, %v1568_v33  ;;  %v579_v62 = vrot.slane %v576_v54, 4 }
  0x95   : > { %v586_v63 = vrot.slane %v554_v60, 4  ;;  %v431_v1 = vrot.slane %v428_v57, 4  ;;  %v445_v2 = vrot.slane %v437_v50, 4  ;;  %v450_v6 = vperm.slane %v444_v58, %v1568_v33 }
  0x96   : > { %v552_v3 = vsel %vm417_vm0, 0, %v551_v59  ;;  %v577_v4 = vrot.slane %v572_v61, 4  ;;  %v580_v5 = vsel %vm417_vm0, 0, %v579_v62  ;;  %v430_v14 = vsel %vm417_vm0, 0, %v429_v0 }
  0x97   : > { %v605_v7 = vrot.slane %v580_v5, 4  ;;  %v432_v8 = vsel %vm417_vm0, 0, %v431_v1  ;;  %v446_v9 = vsel %vm417_vm0, %v442_v26, %v445_v2  ;;  %v581_v15 = vsel %vm417_vm0, %v553_v53, %v546_v52 }
  0x98   : > { %v454_v10 = vperm.slane %v446_v9, %v1568_v33  ;;  %v464_v11 = vrot.slane %v432_v8, 4  ;;  %v578_v12 = vsel %vm417_vm0, 0, %v577_v4  ;;  %v587_v16 = vsel %vm417_vm0, %v586_v63, %v552_v3 }
  0x99   : > { %v606_v17 = vsel %vm417_vm0, %v605_v7, %v578_v12  ;;  %v455_v18 = vrot.slane %v450_v6, 4  ;;  %v591_v20 = vperm.slane %v587_v16, %v1562_v13  ;;  %v600_v21 = vsel %vm417_vm0, %v579_v62, %v572_v61  ;;  %v634_v16 = vpop.permute.xlu0 %633 }
  0x9a   : > { %v457_v19 = vrot.slane %v454_v10, 4  ;;  %v459_v22 = vsel %vm417_vm0, %v431_v1, %v424_v46  ;;  %v610_v23 = vperm.slane %v606_v17, %v1562_v13  ;;  %v465_v24 = vsel %vm417_vm0, %v464_v11, %v430_v14  ;;  %v638_v17 = vpop.permute.xlu2 %637 }
  0x9b   : > { %v585_v26 = vperm.slane %v581_v15, %v1562_v13  ;;  %v592_v27 = vrot.slane %v591_v20, 4  ;;  %v469_v28 = vperm.slane %v465_v24, %v1562_v13  ;;  %v604_v30 = vperm.slane %v600_v21, %v1562_v13  ;;  %v636_v21 = vpop.permute.xlu1 %635 }
  0x9c   : > { %v458_v25 = vsel %vm417_vm0, 0, %v457_v19  ;;  %v611_v31 = vrot.slane %v610_v23, 4  ;;  %v456_v32 = vsel %vm417_vm0, 0, %v455_v18  ;;  %v463_v35 = vperm.slane %v459_v22, %v1562_v13 }
  0x9d   : > { %v483_v29 = vrot.slane %v458_v25, 4  ;;  %v593_v34 = vsel %vm417_vm0, %v592_v27, %v585_v26  ;;  %v470_v36 = vrot.slane %v469_v28, 4  ;;  %v478_v42 = vsel %vm417_vm0, %v457_v19, %v450_v6 }
  0x9e   : > { %v597_v37 = vperm.slane %v593_v34, %v1568_v33  ;;  %v612_v38 = vsel %vm417_vm0, %v611_v31, %v604_v30  ;;  %v482_v53 = vperm.slane %v478_v42, %v1562_v13  ;;  %v642_v15 = vshrl.u32 %v1584_v51, 16 }
  0x9f   : > { %v484_v39 = vsel %vm417_vm0, %v483_v29, %v456_v32  ;;  %v616_v40 = vperm.slane %v612_v38, %v1568_v33  ;;  %v471_v41 = vsel %vm417_vm0, %v470_v36, %v463_v35  ;;  %v641_v18 = vpack.i.b16 %v634_v16, %v1584_v51  ;;  %v1389_v32 = vld [vmem:[%s1818_s3] sm:$0xff]  }
  0xa0   : > { %v488_v43 = vperm.slane %v484_v39, %v1562_v13  ;;  %v622_v44 = vshrl.u32 %v597_v37, 16  ;;  %v598_v45 = vrot.slane %v597_v37, 4  ;;  %v475_v46 = vperm.slane %v471_v41, %v1568_v33 }
  0xa1   : > { %v621_v47 = vpack.i.b16 %v616_v40, %v597_v37  ;;  %v623_v48 = vshrl.u32 %v616_v40, 16  ;;  %v617_v49 = vrot.slane %v616_v40, 4  ;;  %v643_v19 = vshrl.u32 %v634_v16, 16 }
  0xa2   : > { %v489_v50 = vrot.slane %v488_v43, 4  ;;  %v599_v52 = vsel %vm417_vm0, 0, %v598_v45  ;;  %v476_v63 = vrot.slane %v475_v46, 4  ;;  %v500_v6 = vshrl.u32 %v475_v46, 16 }
  0xa3   : > { %v766_v54 = vsel %vm381_vm1, %v621_v47, 0  ;;  %v624_v55 = vpack.i.b16 %v623_v48, %v622_v44  ;;  %v618_v56 = vsel %vm417_vm0, 0, %v617_v49  ;;  %v628_v58 = vshrl.u32 %v599_v52, 16  ;;  %v1435_v47 = vld [vmem:[%s359_s12] ss:$0 sm:$0xff] }
  0xa4   : > { %775 = vmatpush.bf16.xpose.msra.mxu0 %v766_v54  ;;  %v627_v57 = vpack.i.b16 %v618_v56, %v599_v52  ;;  %v629_v59 = vshrl.u32 %v618_v56, 16  ;;  %v490_v60 = vsel %vm417_vm0, %v489_v50, %v482_v53  ;;  %v477_v7 = vsel %vm417_vm0, 0, %v476_v63 }
  0xa5   : > { %v785_v61 = vsel %vm381_vm1, %v624_v55, 0  ;;  %v494_v62 = vperm.slane %v490_v60, %v1568_v33  ;;  %v506_v12 = vshrl.u32 %v477_v7, 16  ;;  %v649_v20 = vshrl.u32 %v638_v17, 16 }
  0xa6   : > { %794 = vmatpush.bf16.xpose.msra.mxu1 %v785_v61  ;;  %v804_v0 = vsel %vm381_vm1, %v627_v57, 0  ;;  %v630_v1 = vpack.i.b16 %v629_v59, %v628_v58  ;;  %v647_v22 = vpack.i.b16 %v638_v17, %v636_v21  ;;  %v648_v23 = vshrl.u32 %v636_v21, 16 }
  0xa7   : > { %813 = vmatpush.bf16.xpose.msra.mxu2 %v804_v0  ;;  %v501_v2 = vshrl.u32 %v494_v62, 16  ;;  %v495_v3 = vrot.slane %v494_v62, 4  ;;  %v499_v5 = vpack.i.b16 %v494_v62, %v475_v46  ;;  %v644_v24 = vpack.i.b16 %v643_v19, %v642_v15 }
  0xa8   : > { %v823_v4 = vsel %vm381_vm1, %v630_v1, 0  ;;  %v655_v25 = vperm.slane %v641_v18, %v1562_v13  ;;  %v1489_v26 = vmov -inf   ;;  %v650_v27 = vpack.i.b16 %v649_v20, %v648_v23  ;;  %v1396_v1 = vld [vmem:[%s1818_s3 + $0x8] sm:$0xff]  }
  0xa9   : > { %832 = vmatpush.bf16.xpose.msra.mxu3 %v823_v4  ;;  %v496_v8 = vsel %vm417_vm0, 0, %v495_v3  ;;  %v502_v10 = vpack.i.b16 %v501_v2, %v500_v6  ;;  %373 = vst.msk [vmem:[#allocation2] sm:$0xff] %vm372_vm2, %v1489_v26  ;;  %v660_v28 = vperm.slane %v647_v22, %v1562_v13  ;;  %v681_v51 = vperm.slane %v644_v24, %v1562_v13 }
  0xaa   : > { %v507_v9 = vshrl.u32 %v496_v8, 16  ;;  %v505_v11 = vpack.i.b16 %v496_v8, %v477_v7  ;;  %374 = vst.msk [vmem:[#allocation2 + $0x8] sm:$0xff] %vm372_vm2, %v1489_v26  ;;  %v663_v29 = vrot.slane %v655_v25, 4  ;;  %v686_v31 = vperm.slane %v650_v27, %v1562_v13 }
  0xab   : > { %1378 = vmatmul.msk.bf16.vlgmr.msra.gmra.mxu0 %vm381_vm1, %v499_v5  ;;  %375 = vst.msk [vmem:[#allocation2 + $0x10] sm:$0xff] %vm372_vm2, %v1489_v26  ;;  %v661_v30 = vrot.slane %v660_v28, 4  ;;  %v689_v34 = vrot.slane %v681_v51, 4  ;;  %v1390_v41 = vunpack.c.l.bf16 %v1389_v32  ;;  %v1391_v57 = vunpack.c.h.bf16 %v1389_v32 }
  0xac   : > { %v508_v14 = vpack.i.b16 %v507_v9, %v506_v12  ;;  %376 = vst.msk [vmem:[#allocation2 + $0x18] sm:$0xff] %vm372_vm2, %v1489_v26  ;;  %v664_v35 = vsel %vm417_vm0, %v660_v28, %v663_v29  ;;  %v687_v38 = vrot.slane %v686_v31, 4  ;;  %v1395_v15 = vunpack.c.h.bf16 %v1396_v1 }
  0xad   : > { %1379 = vmatmul.msk.bf16.vlgmr.msra.gmra.mxu1 %vm381_vm1, %v502_v10  ;;  %v662_v36 = vsel %vm417_vm0, %v661_v30, %v655_v25  ;;  %v672_v37 = vperm.slane %v664_v35, %v1568_v33  ;;  %v690_v40 = vsel %vm417_vm0, %v686_v31, %v689_v34  ;;  %v1394_v10 = vunpack.c.l.bf16 %v1396_v1 }
  0xae   : > { %1380 = vmatmul.msk.bf16.vlgmr.msra.gmra.mxu2 %vm381_vm1, %v505_v11  ;;  %v668_v39 = vperm.slane %v662_v36, %v1568_v33  ;;  %v688_v43 = vsel %vm417_vm0, %v687_v38, %v681_v51  ;;  %v698_v44 = vperm.slane %v690_v40, %v1568_v33 }
  0xaf   : > { %v675_v42 = vrot.slane %v672_v37, 4  ;;  %v694_v46 = vperm.slane %v688_v43, %v1568_v33 }
  0xb0   : > { %1381 = vmatmul.msk.bf16.vlgmr.msra.gmra.mxu3 %vm381_vm1, %v508_v14  ;;  %v673_v45 = vrot.slane %v668_v39, 4  ;;  %v701_v49 = vrot.slane %v698_v44, 4 }
  0xb1   : > { %v676_v48 = vsel %vm417_vm0, 0, %v675_v42  ;;  %v699_v53 = vrot.slane %v694_v46, 4  ;;  %v703_v55 = vsel %vm417_vm0, %v675_v42, %v668_v39 }
  0xb2   : > { %v674_v52 = vsel %vm417_vm0, 0, %v673_v45  ;;  %v708_v54 = vrot.slane %v676_v48, 4  ;;  %v702_v58 = vsel %vm417_vm0, 0, %v701_v49  ;;  %v722_v59 = vsel %vm417_vm0, %v701_v49, %v694_v46 }
  0xb3   : > { %v727_v61 = vrot.slane %v702_v58, 4  ;;  %v700_v62 = vsel %vm417_vm0, 0, %v699_v53  ;;  %v707_v2 = vperm.slane %v703_v55, %v1562_v13  ;;  %v726_v4 = vperm.slane %v722_v59, %v1562_v13  ;;  %v847_v55 = vld [vmem:[#allocation2 + $0x8] sm:$0xff] }
  0xb4   : > { %v709_v63 = vsel %vm417_vm0, %v708_v54, %v674_v52  ;;  %v1490_v48 = vmov 0   ;;  %v1491_v49 = vmov 0.0  }
  0xb5   : > { %v713_v3 = vperm.slane %v709_v63, %v1562_v13  ;;  %v728_v5 = vsel %vm417_vm0, %v727_v61, %v700_v62  ;;  %1433 = vset.pattern.permute.xlu2 %v1490_v48  ;;  %1432 = vset.pattern.permute.xlu0 %v1490_v48  ;;  %377 = vst.msk [vmem:[#allocation3] sm:$0xff] %vm372_vm2, %v1491_v49 }
  0xb6   : > { %v732_v9 = vperm.slane %v728_v5, %v1562_v13  ;;  %1434 = vset.pattern.permute.xlu1 %v1490_v48  ;;  %378 = vst.msk [vmem:[#allocation3 + $0x8] sm:$0xff] %vm372_vm2, %v1491_v49 }
  0xb7   : > { %v714_v8 = vrot.slane %v713_v3, 4  ;;  %379 = vst.msk [vmem:[#allocation3 + $0x10] sm:$0xff] %vm372_vm2, %v1491_v49 }
  0xb8   : > { %v733_v12 = vrot.slane %v732_v9, 4  ;;  %380 = vst.msk [vmem:[#allocation3 + $0x18] sm:$0xff] %vm372_vm2, %v1491_v49 }
  0xb9   : > { %v715_v11 = vsel %vm417_vm0, %v714_v8, %v707_v2  ;;  %382 = vst.msk [vmem:[#allocation4] sm:$0xff] %vm381_vm1, %v1491_v49 }
  0xba   : > { %v719_v16 = vperm.slane %v715_v11, %v1568_v33  ;;  %v734_v19 = vsel %vm417_vm0, %v733_v12, %v726_v4  ;;  %383 = vst.msk [vmem:[#allocation4 + $0x8] sm:$0xff] %vm381_vm1, %v1491_v49 }
  0xbb   : > { %v738_v22 = vperm.slane %v734_v19, %v1568_v33  ;;  %384 = vst.msk [vmem:[#allocation4 + $0x10] sm:$0xff] %vm381_vm1, %v1491_v49 }
  0xbc   : > { %v744_v23 = vshrl.u32 %v719_v16, 16  ;;  %v720_v24 = vrot.slane %v719_v16, 4  ;;  %385 = vst.msk [vmem:[#allocation4 + $0x18] sm:$0xff] %vm381_vm1, %v1491_v49 }
  0xbd   : > { %v743_v28 = vpack.i.b16 %v738_v22, %v719_v16  ;;  %v745_v29 = vshrl.u32 %v738_v22, 16  ;;  %v739_v31 = vrot.slane %v738_v22, 4 }
  0xbe   : > { %v721_v30 = vsel %vm417_vm0, 0, %v720_v24 }
  0xbf   : > { %v976_v35 = vsel %vm974_vm3, %v743_v28, 0  ;;  %v746_v36 = vpack.i.b16 %v745_v29, %v744_v23  ;;  %v740_v37 = vsel %vm417_vm0, 0, %v739_v31  ;;  %v750_v38 = vshrl.u32 %v721_v30, 16 }
  0xc0   : > { %985 = vmatpush.bf16.msrb.mxu0 %v976_v35  ;;  %v751_v42 = vshrl.u32 %v740_v37, 16 }
  0xc1   : > { %v995_v40 = vsel %vm974_vm3, %v746_v36, 0  ;;  %v910_v36 = vld [vmem:[#allocation3] sm:$0xff] }
  0xc2   : > { %1004 = vmatpush.bf16.msrb.mxu1 %v995_v40  ;;  %v752_v45 = vpack.i.b16 %v751_v42, %v750_v38 }
 0x128   : > { %v777_v50 = vpop.f32.mrf.mxu0 }
 0x129   : > { %v778_v56 = vadd.f32 %v1390_v41, %v777_v50  ;;  %v749_v41 = vpack.i.b16 %v740_v37, %v721_v30  ;;  %v1725_v50 = vld [vmem:[#allocation2] sm:$0xff] }
 0x12a   : > { %v796_v60 = vpop.f32.mrf.mxu1 }
 0x12b   : > { %v1683_v0 = vadd.f32 %v1435_v47, %v778_v56  ;;  %v797_v6 = vadd.f32 %v1391_v57, %v796_v60  ;;  %v1014_v44 = vsel %vm974_vm3, %v749_v41, 0  ;;  %v848_v56 = vld [vmem:[#allocation2 + $0x10] sm:$0xff]  ;;  %v849_v60 = vld [vmem:[#allocation2 + $0x18] sm:$0xff] }
 0x12c   : > { %1023 = vmatpush.bf16.msrb.mxu2 %v1014_v44  ;;  %v912_v44 = vld [vmem:[#allocation3 + $0x10] sm:$0xff] }
 0x12d   : > { %v850_v7 = vsel %vm381_vm1, %v1683_v0, -inf  ;;  %v1697_v18 = vadd.f32 %v1435_v47, %v797_v6 }
 0x12e   : > { %851 = vmax.xlane.f32.xlu2 %v850_v7 }
 0x12f   : > { %v853_v51 = vsel %vm381_vm1, %v1697_v18, -inf }
 0x130   : > { %v779_v14 = vpop.f32.mrf.mxu0 }
 0x131   : > { %v815_v17 = vpop.f32.mrf.mxu2 }
 0x132   : > { %v816_v20 = vadd.f32 %v1394_v10, %v815_v17  ;;  %v798_v21 = vpop.f32.mrf.mxu1 }
 0x133   : > { %v834_v25 = vpop.f32.mrf.mxu3 }
 0x134   : > { %v835_v26 = vadd.f32 %v1395_v15, %v834_v25  ;;  %v1701_v27 = vadd.f32 %v1435_v47, %v816_v20 }
 0x136   : > { %854 = vmax.xlane.f32.xlu2 %v853_v51  ;;  %v856_v32 = vsel %vm381_vm1, %v1701_v27, -inf  ;;  %v1708_v34 = vadd.f32 %v1435_v47, %v835_v26  ;;  %v1033_v47 = vsel %vm974_vm3, %v752_v45, 0  ;;  %v913_v45 = vld [vmem:[#allocation3 + $0x18] sm:$0xff] }
 0x137   : > { %857 = vmax.xlane.f32.xlu0 %v856_v32  ;;  %1042 = vmatpush.bf16.msrb.mxu3 %v1033_v47 }
 0x138   : > { %v859_v39 = vsel %vm381_vm1, %v1708_v34, -inf }
 0x139   : > { %860 = vmax.xlane.f32.xlu1 %v859_v39  ;;  %v817_v43 = vpop.f32.mrf.mxu2 }
 0x13b   : > { %v836_v46 = vpop.f32.mrf.mxu3 }
 0x1a1   : > { %v852_v52 = vpop.xlane.xlu2 %851 }
 0x1a2   : > { %v1728_v53 = vmax.f32 %v1725_v50, %v852_v52 }
 0x1a4   : > { %v866_v54 = vsub.f32 %v1725_v50, %v1728_v53  ;;  %1056 = vst.msk [vmem:[#allocation2] sm:$0xff] %vm372_vm2, %v1728_v53  ;;  %880 = vperm.xlu2 %1433, %v1728_v53   ;;  %v911_v53 = vld [vmem:[#allocation3 + $0x8] sm:$0xff] }
 0x1a6   : > { %v870_v31 = vmul.f32 1.442695, %v866_v54 }
 0x1a9   : > { %v855_v57 = vpop.xlane.xlu2 %854 }
 0x1aa   : > { %v863_v58 = vmax.f32 %v847_v55, %v855_v57  ;;  %v858_v59 = vpop.xlane.xlu0 %857 }
 0x1ab   : > { %v864_v61 = vmax.f32 %v848_v56, %v858_v59 }
 0x1ac   : > { %v867_v62 = vsub.f32 %v847_v55, %v863_v58  ;;  %1057 = vst.msk [vmem:[#allocation2 + $0x8] sm:$0xff] %vm372_vm2, %v863_v58  ;;  %v861_v63 = vpop.xlane.xlu1 %860 }
 0x1ad   : > { %v868_v1 = vsub.f32 %v848_v56, %v864_v61  ;;  %1058 = vst.msk [vmem:[#allocation2 + $0x10] sm:$0xff] %vm372_vm2, %v864_v61  ;;  %v865_v2 = vmax.f32 %v849_v60, %v861_v63  ;;  %890 = vperm.xlu0 %1432, %v864_v61   ;;  %v940_v63 = vld [vmem:[#allocation4 + $0x8] sm:$0xff] }
 0x1ae   : > { %v872_v11 = vmul.f32 1.442695, %v867_v62 }
 0x1af   : > { %v869_v3 = vsub.f32 %v849_v60, %v865_v2  ;;  %1059 = vst.msk [vmem:[#allocation2 + $0x18] sm:$0xff] %vm372_vm2, %v865_v2  ;;  %895 = vperm.xlu1 %1434, %v865_v2   ;;  %v874_v10 = vmul.f32 1.442695, %v868_v1  ;;  %v941_v60 = vld [vmem:[#allocation4 + $0x10] sm:$0xff] }
 0x1b1   : > { %v876_v32 = vmul.f32 1.442695, %v869_v3 }
 0x1b7   : > { %885 = vperm.xlu1 %1434, %v863_v58  }
 0x1fe   : > { %v881_v4 = vpop.permute.xlu2 %880 }
 0x1ff   : > { %v898_v5 = vsub.f32 %v1683_v0, %v881_v4 }
 0x201   : > { %v902_v6 = vmul.f32 1.442695, %v898_v5 }
 0x203   : > { %1436 = vpow2.f32 %v902_v6 }
 0x204   : > { %1438 = vpow2.f32 %v874_v10  ;;  %v939_v10 = vld [vmem:[#allocation4] sm:$0xff] }
 0x205   : > { %1440 = vpow2.f32 %v872_v11 }
 0x209   : > { %v1437_v7 = vpop.eup %1436 }
 0x20a   : > { %v918_v8 = vsel %vm381_vm1, %v1437_v7, 0.0  ;;  %v967_v9 = vpack.c.bf16 %v1437_v7, %v1437_v7  ;;  %v1439_v16 = vpop.eup %1438 }
 0x20b   : > { %919 = vadd.xlane.f32.xlu2 %v918_v8  ;;  %v1441_v20 = vpop.eup %1440  ;;  %v916_v46 = vmul.f32 %v1439_v16, %v912_v44 }
 0x20c   : > { %1382 = vmatmul.msk.bf16.vlgmr.msrb.gmra.mxu0 %vm381_vm1, %v967_v9  ;;  %v915_v55 = vmul.f32 %v1441_v20, %v911_v53 }
 0x21f   : > { %v891_v12 = vpop.permute.xlu0 %890 }
 0x220   : > { %v900_v14 = vsub.f32 %v1701_v27, %v891_v12 }
 0x221   : > { %v896_v15 = vpop.permute.xlu1 %895 }
 0x222   : > { %v906_v17 = vmul.f32 1.442695, %v900_v14  ;;  %v901_v0 = vsub.f32 %v1708_v34, %v896_v15 }
 0x223   : > { %955 = vperm.xlu2 %1433, %v1439_v16  }
 0x224   : > { %1442 = vpow2.f32 %v906_v17  ;;  %v908_v19 = vmul.f32 1.442695, %v901_v0  ;;  %v942_v17 = vld [vmem:[#allocation4 + $0x18] sm:$0xff] }
 0x226   : > { %1444 = vpow2.f32 %v908_v19 }
 0x229   : > { %v886_v21 = vpop.permute.xlu1 %885 }
 0x22a   : > { %v1443_v22 = vpop.eup %1442  ;;  %v899_v23 = vsub.f32 %v1697_v18, %v886_v21 }
 0x22b   : > { %950 = vperm.xlu2 %1433, %v1441_v20   ;;  %v924_v24 = vsel %vm381_vm1, %v1443_v22, 0.0  ;;  %v969_v25 = vpack.c.bf16 %v1443_v22, %v1443_v22 }
 0x22c   : > { %v1445_v26 = vpop.eup %1444  ;;  %v904_v27 = vmul.f32 1.442695, %v899_v23  ;;  %925 = vadd.xlane.f32.xlu0 %v924_v24 }
 0x22d   : > { %1384 = vmatmul.msk.bf16.vlgmr.msrb.gmra.mxu2 %vm381_vm1, %v969_v25  ;;  %v927_v28 = vsel %vm381_vm1, %v1445_v26, 0.0  ;;  %v970_v29 = vpack.c.bf16 %v1445_v26, %v1445_v26 }
 0x22e   : > { %1446 = vpow2.f32 %v904_v27  ;;  %928 = vadd.xlane.f32.xlu1 %v927_v28 }
 0x22f   : > { %1385 = vmatmul.msk.bf16.vlgmr.msrb.gmra.mxu3 %vm381_vm1, %v970_v29  ;;  %1448 = vpow2.f32 %v870_v31 }
 0x230   : > { %1450 = vpow2.f32 %v876_v32 }
 0x234   : > { %v1447_v51 = vpop.eup %1446 }
 0x235   : > { %v921_v30 = vsel %vm381_vm1, %v1447_v51, 0.0  ;;  %v968_v18 = vpack.c.bf16 %v1447_v51, %v1447_v51  ;;  %v1449_v34 = vpop.eup %1448 }
 0x236   : > { %922 = vadd.xlane.f32.xlu0 %v921_v30  ;;  %v1451_v35 = vpop.eup %1450  ;;  %v914_v37 = vmul.f32 %v1449_v34, %v910_v36 }
 0x237   : > { %1383 = vmatmul.msk.bf16.vlgmr.msrb.gmra.mxu1 %vm381_vm1, %v968_v18  ;;  %v917_v49 = vmul.f32 %v1451_v35, %v913_v45 }
 0x247   : > { %945 = vperm.xlu1 %1434, %v1449_v34  }
 0x24a   : > { %960 = vperm.xlu0 %1432, %v1451_v35  }
 0x27e   : > { %v920_v38 = vpop.xlane.xlu2 %919 }
 0x27f   : > { %v930_v39 = vadd.f32 %v920_v38, %v914_v37 }
 0x281   : > { %935 = vst.msk [vmem:[#allocation3] sm:$0xff] %vm372_vm2, %v930_v39 }
 0x286   : > { %v956_v54 = vpop.permute.xlu2 %955 }
 0x287   : > { %v965_v61 = vmul.f32 %v956_v54, %v941_v60 }
 0x288   : > { %v1067_v40 = vld [vmem:[#allocation3] sm:$0xff] }
 0x289   : > { %v987_v41 = vpop.f32.mrf.mxu0  ;;  %1452 = vrcp.f32 %v1067_v40 }
 0x28e   : > { %v951_v1 = vpop.permute.xlu2 %950 }
 0x28f   : > { %v1453_v42 = vpop.eup %1452  ;;  %v964_v6 = vmul.f32 %v951_v1, %v940_v63 }
 0x290   : > { %1077 = vperm.xlu1 %1434, %v1453_v42  }
 0x291   : > { %v989_v43 = vpop.f32.mrf.mxu0 }
 0x29f   : > { %v926_v47 = vpop.xlane.xlu0 %925 }
 0x2a0   : > { %v932_v48 = vadd.f32 %v926_v47, %v916_v46 }
 0x2a1   : > { %v929_v50 = vpop.xlane.xlu1 %928 }
 0x2a2   : > { %937 = vst.msk [vmem:[#allocation3 + $0x10] sm:$0xff] %vm372_vm2, %v932_v48  ;;  %v933_v52 = vadd.f32 %v929_v50, %v917_v49 }
 0x2a4   : > { %938 = vst.msk [vmem:[#allocation3 + $0x18] sm:$0xff] %vm372_vm2, %v933_v52 }
 0x2a9   : > { %v923_v56 = vpop.xlane.xlu0 %922  ;;  %v1069_v57 = vld [vmem:[#allocation3 + $0x10] sm:$0xff] }
 0x2aa   : > { %v931_v58 = vadd.f32 %v923_v56, %v915_v55  ;;  %1454 = vrcp.f32 %v1069_v57 }
 0x2ab   : > { %v1070_v59 = vld [vmem:[#allocation3 + $0x18] sm:$0xff] }
 0x2ac   : > { %936 = vst.msk [vmem:[#allocation3 + $0x8] sm:$0xff] %vm372_vm2, %v931_v58  ;;  %1456 = vrcp.f32 %v1070_v59 }
 0x2b0   : > { %v1455_v62 = vpop.eup %1454  ;;  %v1025_v2 = vpop.f32.mrf.mxu2 }
 0x2b1   : > { %v1050_v3 = vadd.f32 %v1025_v2, %v965_v61  ;;  %1087 = vperm.xlu0 %1432, %v1455_v62  }
 0x2b2   : > { %v1457_v4 = vpop.eup %1456  ;;  %v1044_v5 = vpop.f32.mrf.mxu3 }
 0x2b3   : > { %1054 = vst.msk [vmem:[#allocation4 + $0x10] sm:$0xff] %vm381_vm1, %v1050_v3  ;;  %1092 = vperm.xlu2 %1433, %v1457_v4   ;;  %v1068_v7 = vld [vmem:[#allocation3 + $0x8] sm:$0xff] }
 0x2b4   : > { %v1006_v8 = vpop.f32.mrf.mxu1  ;;  %1458 = vrcp.f32 %v1068_v7 }
 0x2b5   : > { %v1049_v9 = vadd.f32 %v1006_v8, %v964_v6 }
 0x2b7   : > { %1053 = vst.msk [vmem:[#allocation4 + $0x8] sm:$0xff] %vm381_vm1, %v1049_v9 }
 0x2b8   : > { %v1027_v11 = vpop.f32.mrf.mxu2 }
 0x2b9   : > { %v946_v12 = vpop.permute.xlu1 %945 }
 0x2ba   : > { %v1459_v14 = vpop.eup %1458  ;;  %v963_v15 = vmul.f32 %v946_v12, %v939_v10  ;;  %v1046_v16 = vpop.f32.mrf.mxu3  ;;  %v1065_v24 = vld [vmem:[#allocation4 + $0x10] sm:$0xff] }
 0x2bb   : > { %1082 = vperm.xlu0 %1432, %v1459_v14  }
 0x2bc   : > { %v1048_v0 = vadd.f32 %v987_v41, %v963_v15  ;;  %v1008_v19 = vpop.f32.mrf.mxu1  ;;  %v961_v20 = vpop.permute.xlu0 %960 }
 0x2bd   : > { %v966_v21 = vmul.f32 %v961_v20, %v942_v17 }
 0x2be   : > { %1052 = vst.msk [vmem:[#allocation4] sm:$0xff] %vm381_vm1, %v1048_v0  ;;  %v1064_v36 = vld [vmem:[#allocation4 + $0x8] sm:$0xff] }
 0x2bf   : > { %v1051_v22 = vadd.f32 %v1044_v5, %v966_v21 }
 0x2c1   : > { %1055 = vst.msk [vmem:[#allocation4 + $0x18] sm:$0xff] %vm381_vm1, %v1051_v22 }
 0x2c5   : > { %v1063_v27 = vld [vmem:[#allocation4] sm:$0xff] }
 0x2c8   : > { %v1066_v30 = vld [vmem:[#allocation4 + $0x18] sm:$0xff] }
 0x302   : > { %v1078_v23 = vpop.permute.xlu1 %1077 }
 0x303   : > { %v1095_v28 = vmul.f32 %v1078_v23, %v1063_v27 }
 0x305   : > { %v1102_v18 = vrot.slane %v1095_v28, 4 }
 0x30d   : > { %v1093_v51 = vpop.permute.xlu2 %1092 }
 0x30e   : > { %v1098_v31 = vmul.f32 %v1093_v51, %v1066_v30 }
 0x310   : > { %v1112_v38 = vrot.slane %v1098_v31, 4 }
 0x323   : > { %v1088_v25 = vpop.permute.xlu0 %1087 }
 0x324   : > { %v1097_v26 = vmul.f32 %v1088_v25, %v1065_v24 }
 0x326   : > { %v1099_v29 = vrot.slane %v1097_v26, 4  ;;  %v1103_v34 = vsel %vm417_vm0, %v1097_v26, %v1102_v18 }
 0x327   : > { %v1111_v40 = vperm.slane %v1103_v34, %v1562_v13 }
 0x328   : > { %v1101_v32 = vsel %vm417_vm0, %v1099_v29, %v1095_v28 }
 0x329   : > { %v1107_v35 = vperm.slane %v1101_v32, %v1562_v13  ;;  %v1138_v46 = vrot.slane %v1111_v40, 4 }
 0x32b   : > { %v1126_v43 = vrot.slane %v1107_v35, 4 }
 0x32d   : > { %v1083_v37 = vpop.permute.xlu0 %1082 }
 0x32e   : > { %v1096_v39 = vmul.f32 %v1083_v37, %v1064_v36 }
 0x330   : > { %v1113_v41 = vsel %vm417_vm0, %v1112_v38, %v1096_v39  ;;  %v1114_v42 = vrot.slane %v1096_v39, 4 }
 0x331   : > { %v1119_v44 = vperm.slane %v1113_v41, %v1562_v13 }
 0x332   : > { %v1115_v45 = vsel %vm417_vm0, %v1098_v31, %v1114_v42 }
 0x333   : > { %v1123_v47 = vperm.slane %v1115_v45, %v1562_v13  ;;  %v1124_v48 = vrot.slane %v1119_v44, 4  ;;  %v1127_v49 = vsel %vm417_vm0, %v1119_v44, %v1126_v43 }
 0x334   : > { %v1135_v50 = vperm.slane %v1127_v49, %v1568_v33 }
 0x335   : > { %v1125_v52 = vsel %vm417_vm0, %v1124_v48, %v1107_v35  ;;  %v1136_v53 = vrot.slane %v1123_v47, 4  ;;  %v1139_v54 = vsel %vm417_vm0, %v1123_v47, %v1138_v46 }
 0x336   : > { %v1131_v55 = vperm.slane %v1125_v52, %v1568_v33  ;;  %v1147_v56 = vperm.slane %v1139_v54, %v1568_v33  ;;  %v1150_v57 = vrot.slane %v1135_v50, 4 }
 0x337   : > { %v1137_v58 = vsel %vm417_vm0, %v1136_v53, %v1111_v40 }
 0x338   : > { %v1143_v59 = vperm.slane %v1137_v58, %v1568_v33  ;;  %v1148_v60 = vrot.slane %v1131_v55, 4  ;;  %v1151_v61 = vsel %vm417_vm0, 0.0, %v1150_v57  ;;  %v1154_v62 = vrot.slane %v1147_v56, 4 }
 0x339   : > { %v1156_v63 = vsel %vm417_vm0, %v1150_v57, %v1131_v55  ;;  %v1161_v1 = vrot.slane %v1151_v61, 4 }
 0x33a   : > { %v1155_v2 = vsel %vm417_vm0, 0.0, %v1154_v62  ;;  %v1149_v3 = vsel %vm417_vm0, 0.0, %v1148_v60  ;;  %v1152_v4 = vrot.slane %v1143_v59, 4  ;;  %v1160_v5 = vperm.slane %v1156_v63, %v1562_v13 }
 0x33b   : > { %v1172_v6 = vrot.slane %v1155_v2, 4  ;;  %v1162_v7 = vsel %vm417_vm0, %v1161_v1, %v1149_v3  ;;  %v1167_v8 = vsel %vm417_vm0, %v1154_v62, %v1143_v59 }
 0x33c   : > { %v1153_v9 = vsel %vm417_vm0, 0.0, %v1152_v4  ;;  %v1166_v10 = vperm.slane %v1162_v7, %v1562_v13  ;;  %v1171_v11 = vperm.slane %v1167_v8, %v1562_v13  ;;  %v1180_v12 = vrot.slane %v1160_v5, 4 }
 0x33d   : > { %v1173_v14 = vsel %vm417_vm0, %v1172_v6, %v1153_v9 }
 0x33e   : > { %v1177_v15 = vperm.slane %v1173_v14, %v1562_v13  ;;  %v1181_v16 = vsel %vm417_vm0, %v1166_v10, %v1180_v12  ;;  %v1192_v17 = vrot.slane %v1171_v11, 4  ;;  %v1178_v0 = vrot.slane %v1166_v10, 4 }
 0x33f   : > { %v1189_v19 = vperm.slane %v1181_v16, %v1568_v33 }
 0x340   : > { %v1193_v20 = vsel %vm417_vm0, %v1177_v15, %v1192_v17  ;;  %v1179_v21 = vsel %vm417_vm0, %v1178_v0, %v1160_v5  ;;  %v1190_v22 = vrot.slane %v1177_v15, 4 }
 0x341   : > { %v1201_v23 = vperm.slane %v1193_v20, %v1568_v33  ;;  %v1208_v24 = vrot.slane %v1189_v19, 4  ;;  %v1185_v25 = vperm.slane %v1179_v21, %v1568_v33 }
 0x342   : > { %v1191_v26 = vsel %vm417_vm0, %v1190_v22, %v1171_v11 }
 0x343   : > { %v1209_v13 = vsel %vm417_vm0, %v1201_v23, %v1208_v24  ;;  %v1206_v27 = vrot.slane %v1201_v23, 4  ;;  %v1197_v28 = vperm.slane %v1191_v26, %v1568_v33  ;;  %v1204_v29 = vrot.slane %v1185_v25, 4 }
 0x344   : > { %1219 = vrot.lane.b32.xlu0 %v1209_v13, %s1492_s23 }
 0x345   : > { %v1207_v51 = vsel %vm417_vm0, %v1206_v27, %v1189_v19  ;;  %v1202_v30 = vrot.slane %v1197_v28, 4  ;;  %v1205_v18 = vsel %vm417_vm0, %v1197_v28, %v1204_v29 }
 0x346   : > { %1215 = vrot.lane.b32.xlu2 %v1207_v51, %s1493_s24  ;;  %1211 = vrot.lane.b32.xlu1 %v1205_v18, %s1494_s25 }
 0x347   : > { %v1203_v31 = vsel %vm417_vm0, %v1202_v30, %v1185_v25 }
 0x3a0   : > { %v1216_v34 = vpop.permute.xlu2 %1215 }
 0x3b6   : > { %v1220_v35 = vpop.permute.xlu0 %1219 }
 0x3b8   : > { %v1212_v32 = vpop.permute.xlu1 %1211 }
 0x3b9   : > { %v1222_v33 = vsel %vm381_vm1, %v1203_v31, %v1212_v32 }
 0x3ba   : > { %v1224_v36 = vsel %vm1223_vm4, %v1222_v33, %v1216_v34 }
 0x3bb   : > { %v1226_v37 = vsel %vm1225_vm5, %v1224_v36, %v1220_v35 }
 0x3bc   : > { %v1227_v38 = vpack.c.bf16 %v1226_v37, %v1226_v37 }
 0x3be   : > { %1229 = vst.msk [vmem:[%s366_s28] sm:$0xf] %vm1228_vm6, %v1227_v38 }
 0x3bf PF: > { %s15_s20 = sadd.s32 1, %s1482_s20   ;;  %s1821_s18 = smov %s1478_s19 }
 0x3c0   : > { %p12_p5 = scmp.ge.s32.totalorder %s15_s20, 4   ;;  %s1822_s19 = smov %s1824_s21 }
 0x3c2   :  { %14 = sbr.rel (!%p12_p5) target bundleno = 2 (0x2), region = 90 }

// kernel: _lambda_.55
= control target key start
LH: loop header
LB: loop body
LE: loop exit
PB: predicated region body
PF: predicated region fallthrough
CT: control target
= control target key end

     0   :  { %vm16_vm0 = vcmask 261120   ;;  %v97_v1 = vmov 0.0   ;;  %vm73_vm1 = vcmask 257024   ;;  %s133_s1 = inlined_call_operand.vmem [shape: bf16[32,32], index: 1, kind: input, shape index: {}]   ;;  %s134_s0 = inlined_call_operand.vmem [shape: bf16[16,32], index: 0, kind: input, shape index: {}]   ;;  %s135_s2 = inlined_call_operand.vmem [shape: bf16[16,32], index: 2, kind: output, shape index: {}]  }
   0x1   :  { %v95_v0 = vld [vmem:[%s133_s1 + $0x8] sm:$0xff]  ;;  %17 = vst.msk [vmem:[#allocation2] sm:$0xff] %vm16_vm0, %v97_v1  ;;  %v94_v2 = vld [vmem:[%s133_s1] sm:$0xff] }
   0x2   :  { %18 = vst.msk [vmem:[#allocation2 + $0x8] sm:$0xff] %vm16_vm0, %v97_v1  ;;  %54 = vmatpush.bf16.msra.mxu0 %v95_v0  ;;  %v93_v3 = vld [vmem:[%s134_s0] sm:$0xff] }
   0x6   :  { %55 = vmatpush.bf16.msra.mxu0 %v94_v2 }
   0x8   :  { %v19_v4 = vld [vmem:[#allocation2] sm:$0xff] }
   0x9   :  { %92 = vmatmul.msk.bf16.vlgmr.msra.gmra.mxu0 %vm16_vm0, %v93_v3  ;;  %v20_v7 = vld [vmem:[#allocation2 + $0x8] sm:$0xff] }
  0x86   :  { %v57_v5 = vpop.f32.mrf.mxu0 }
  0x87   :  { %v62_v6 = vadd.f32 %v57_v5, %v19_v4 }
  0x89   :  { %64 = vst.msk [vmem:[#allocation2] sm:$0xff] %vm16_vm0, %v62_v6 }
  0x8e   :  { %v59_v8 = vpop.f32.mrf.mxu0 }
  0x8f   :  { %v63_v9 = vadd.f32 %v59_v8, %v20_v7 }
  0x90   :  { %v69_v10 = vld [vmem:[#allocation2] sm:$0xff] }
  0x91   :  { %v71_v11 = vpack.c.bf16 %v69_v10, %v69_v10  ;;  %65 = vst.msk [vmem:[#allocation2 + $0x8] sm:$0xff] %vm16_vm0, %v63_v9 }
  0x93   :  { %74 = vst.msk [vmem:[%s135_s2] sm:$0xf] %vm73_vm1, %v71_v11 }
  0x98   :  { %v70_v12 = vld [vmem:[#allocation2 + $0x8] sm:$0xff] }
  0x99   :  { %v72_v13 = vpack.c.bf16 %v70_v12, %v70_v12 }
  0x9b   :  { %75 = vst.msk [vmem:[%s135_s2 + $0x4] sm:$0xf] %vm73_vm1, %v72_v13 }

// kernel: _lambda_.52
= control target key start
LH: loop header
LB: loop body
LE: loop exit
PB: predicated region body
PF: predicated region fallthrough
CT: control target
= control target key end

     0   :  { %s1447_s15 = smov 0   ;;  %s1449_s16 = smov 0   ;;  %s1725_s0 = inlined_call_operand.vmem [shape: bf16[2,8,32], index: 0, kind: input, shape index: {}]   ;;  %s1726_s1 = inlined_call_operand.vmem [shape: bf16[2,8,32], index: 1, kind: input, shape index: {}]   ;;  %s1727_s2 = inlined_call_operand.vmem [shape: bf16[2,8,32], index: 2, kind: input, shape index: {}]   ;;  %s1728_s3 = inlined_call_operand.vmem [shape: bf16[1,4,8,8], index: 3, kind: input, shape index: {}]   ;;  %s1729_s4 = inlined_call_operand.vmem [shape: bf16[2,8,32], index: 4, kind: output, shape index: {}]  }
   0x1   :  { %s1451_s17 = smov 0  }
   0x2 LB: > { %s33_s18 = sadd.s32 1, %s1405_s16  ;;  %p1301_p0 = scmp.ge.s32.totalorder %s1409_s17, 1  ;;  %s1409_s17 = sphi %s1451_s17, %s14_s17   ;;  %s1405_s16 = sphi %s1449_s16, %s1731_s16   ;;  %s1401_s15 = sphi %s1447_s15, %s1730_s15  }
   0x3   : > { %p35_p1 = scmp.ge.s32.totalorder %s33_s18, 2  ;;  %p229_p2 = scmp.lt.s32.totalorder %s1409_s17, 3 }
   0x5   : > { %s1733_s18 = smov (%p35_p1, %s33_s18), 0  ;;  %p230_p3 = pnand %p1301_p0, %p229_p2 }
   0x6   : > { %p280_p4 = scmp.lt.s32.totalorder (!%p230_p3), %s1401_s15, 1  ;;  %s1411_s26 = smov (!%p230_p3), 104  }
   0x7   : > { %233 = sbr.rel (%p230_p3) target bundleno = 957 (0x3bd), region = 36  ;;  %s1412_s27 = smov (!%p230_p3), 120  }
   0x8   : > { %s1413_s28 = smov (!%p230_p3), 112   ;;  %s1419_s10 = smov (!%p230_p3), 24  }
   0x9   : > { %s1420_s11 = smov (!%p230_p3), 16   ;;  %s1421_s12 = smov (!%p230_p3), 8  }
   0xc   : > { %s1735_s15 = smov (!%p280_p4, %s1401_s15), 1  ;;  %v1414_v4 = vmov 1983009808   ;;  %v1415_v19 = vmov 1934713408   ;;  %vm365_vm0 = vcmask 1047556  }
   0xd   : > { %s1465_s19 = sshll.u32 %s1735_s15, 2  ;;  %v356_v5 = vunpack.c.l.s4 %v1414_v4  ;;  %v370_v20 = vunpack.c.l.s4 %v1415_v19  ;;  %vm329_vm1 = vcmask 64512   ;;  %vm320_vm2 = vcmask 7168  }
   0xe   : > { %s293_s22 = scalar_lea.vmem %s1726_s1, %s1465_s19  ;;  %s286_s25 = scalar_lea.vmem %s1725_s0, %s1465_s19  ;;  %vm914_vm3 = vcmask 1043456   ;;  %vm1163_vm4 = vcmask 130048   ;;  %vm1165_vm5 = vcmask 195584   ;;  %vm1168_vm6 = vcmask 257024  }
   0xf   : > { %v457_v0 = vld [vmem:[%s293_s22] sm:$0xf]  ;;  %v1481_v13 = vunpack.c.0.s8 %v356_v5  ;;  %v1487_v33 = vunpack.c.0.s8 %v370_v20  ;;  %s300_s5 = scalar_lea.vmem %s1727_s2, %s1465_s19  ;;  %s314_s15 = scalar_lea.vmem %s1729_s4, %s1465_s19 }
  0x10   : > { %463 = vrot.lane.b32.xlu1 %v457_v0, %s1411_s26  ;;  %459 = vrot.lane.b32.xlu0 %v457_v0, %s1412_s27  ;;  %v334_v1 = vld [vmem:[%s286_s25] sm:$0xf]  ;;  %v468_v8 = vshrl.u32 %v457_v0, 16 }
  0x11   : > { %338 = vrot.lane.b32.xlu2 %v334_v1, %s1413_s28  ;;  %v345_v21 = vshrl.u32 %v334_v1, 16  ;;  %v1503_v51 = vld [vmem:[%s300_s5] sm:$0xf] }
  0x18   : > { %461 = vrot.lane.b32.xlu0 %v457_v0, %s1413_s28  ;;  %336 = vrot.lane.b32.xlu1 %v334_v1, %s1412_s27 }
  0x19   : > { %340 = vrot.lane.b32.xlu2 %v334_v1, %s1411_s26 }
  0x20   : > { %581 = vrot.lane.b32.xlu0 %v1503_v51, %s1412_s27  ;;  %583 = vrot.lane.b32.xlu1 %v1503_v51, %s1413_s28 }
  0x21   : > { %585 = vrot.lane.b32.xlu2 %v1503_v51, %s1411_s26 }
  0x6b   : > { %v339_v2 = vpop.permute.xlu2 %338 }
  0x6c   : > { %v351_v9 = vshrl.u32 %v339_v2, 16 }
  0x73   : > { %v341_v3 = vpop.permute.xlu2 %340 }
  0x74   : > { %v350_v10 = vpack.i.b16 %v341_v3, %v339_v2  ;;  %v352_v11 = vshrl.u32 %v341_v3, 16 }
  0x76   : > { %v353_v16 = vpack.i.b16 %v352_v11, %v351_v9  ;;  %v363_v17 = vperm.slane %v350_v10, %v1481_v13 }
  0x78   : > { %v364_v25 = vrot.slane %v363_v17, 4  ;;  %v390_v26 = vperm.slane %v353_v16, %v1481_v13 }
  0x7a   : > { %v391_v39 = vrot.slane %v390_v26, 4 }
  0x82   : > { %v464_v6 = vpop.permute.xlu1 %463  ;;  %v460_v7 = vpop.permute.xlu0 %459 }
  0x83   : > { %v469_v12 = vshrl.u32 %v460_v7, 16  ;;  %v467_v14 = vpack.i.b16 %v460_v7, %v457_v0  ;;  %v475_v22 = vshrl.u32 %v464_v6, 16 }
  0x85   : > { %v470_v15 = vpack.i.b16 %v469_v12, %v468_v8  ;;  %v481_v18 = vperm.slane %v467_v14, %v1481_v13 }
  0x87   : > { %v507_v23 = vperm.slane %v470_v15, %v1481_v13  ;;  %v489_v32 = vrot.slane %v481_v18, 4 }
  0x89   : > { %v515_v38 = vrot.slane %v507_v23, 4 }
  0x8a   : > { %v462_v24 = vpop.permute.xlu0 %461  ;;  %v337_v27 = vpop.permute.xlu1 %336 }
  0x8b   : > { %v473_v28 = vpack.i.b16 %v464_v6, %v462_v24  ;;  %v474_v29 = vshrl.u32 %v462_v24, 16  ;;  %v344_v30 = vpack.i.b16 %v337_v27, %v334_v1  ;;  %v346_v31 = vshrl.u32 %v337_v27, 16 }
  0x8d   : > { %v476_v34 = vpack.i.b16 %v475_v22, %v474_v29  ;;  %v486_v35 = vperm.slane %v473_v28, %v1481_v13  ;;  %v347_v36 = vpack.i.b16 %v346_v31, %v345_v21  ;;  %v358_v37 = vperm.slane %v344_v30, %v1481_v13 }
  0x8f   : > { %v487_v40 = vrot.slane %v486_v35, 4  ;;  %v490_v41 = vsel %vm365_vm0, %v486_v35, %v489_v32  ;;  %v512_v42 = vperm.slane %v476_v34, %v1481_v13  ;;  %v366_v43 = vsel %vm365_vm0, %v364_v25, %v358_v37 }
  0x90   : > { %v498_v44 = vperm.slane %v490_v41, %v1487_v33  ;;  %v367_v45 = vrot.slane %v358_v37, 4  ;;  %v372_v46 = vperm.slane %v366_v43, %v1487_v33  ;;  %v385_v50 = vperm.slane %v347_v36, %v1481_v13 }
  0x91   : > { %v488_v47 = vsel %vm365_vm0, %v487_v40, %v481_v18  ;;  %v513_v48 = vrot.slane %v512_v42, 4  ;;  %v516_v49 = vsel %vm365_vm0, %v512_v42, %v515_v38 }
  0x92   : > { %v494_v52 = vperm.slane %v488_v47, %v1487_v33  ;;  %v501_v53 = vrot.slane %v498_v44, 4  ;;  %v524_v54 = vperm.slane %v516_v49, %v1487_v33  ;;  %v368_v55 = vsel %vm365_vm0, %v363_v17, %v367_v45 }
  0x93   : > { %v514_v56 = vsel %vm365_vm0, %v513_v48, %v507_v23  ;;  %v376_v57 = vperm.slane %v368_v55, %v1487_v33  ;;  %v392_v58 = vsel %vm365_vm0, %v391_v39, %v385_v50  ;;  %v377_v0 = vrot.slane %v372_v46, 4 }
  0x94   : > { %v499_v59 = vrot.slane %v494_v52, 4  ;;  %v502_v60 = vsel %vm365_vm0, 0, %v501_v53  ;;  %v520_v61 = vperm.slane %v514_v56, %v1487_v33  ;;  %v527_v62 = vrot.slane %v524_v54, 4 }
  0x95   : > { %v534_v63 = vrot.slane %v502_v60, 4  ;;  %v379_v1 = vrot.slane %v376_v57, 4  ;;  %v393_v2 = vrot.slane %v385_v50, 4  ;;  %v398_v6 = vperm.slane %v392_v58, %v1487_v33 }
  0x96   : > { %v500_v3 = vsel %vm365_vm0, 0, %v499_v59  ;;  %v525_v4 = vrot.slane %v520_v61, 4  ;;  %v528_v5 = vsel %vm365_vm0, 0, %v527_v62  ;;  %v378_v14 = vsel %vm365_vm0, 0, %v377_v0 }
  0x97   : > { %v553_v7 = vrot.slane %v528_v5, 4  ;;  %v380_v8 = vsel %vm365_vm0, 0, %v379_v1  ;;  %v394_v9 = vsel %vm365_vm0, %v390_v26, %v393_v2  ;;  %v529_v15 = vsel %vm365_vm0, %v501_v53, %v494_v52 }
  0x98   : > { %v402_v10 = vperm.slane %v394_v9, %v1487_v33  ;;  %v412_v11 = vrot.slane %v380_v8, 4  ;;  %v526_v12 = vsel %vm365_vm0, 0, %v525_v4  ;;  %v535_v16 = vsel %vm365_vm0, %v534_v63, %v500_v3 }
  0x99   : > { %v554_v17 = vsel %vm365_vm0, %v553_v7, %v526_v12  ;;  %v403_v18 = vrot.slane %v398_v6, 4  ;;  %v539_v20 = vperm.slane %v535_v16, %v1481_v13  ;;  %v548_v21 = vsel %vm365_vm0, %v527_v62, %v520_v61  ;;  %v582_v16 = vpop.permute.xlu0 %581 }
  0x9a   : > { %v405_v19 = vrot.slane %v402_v10, 4  ;;  %v407_v22 = vsel %vm365_vm0, %v379_v1, %v372_v46  ;;  %v558_v23 = vperm.slane %v554_v17, %v1481_v13  ;;  %v413_v24 = vsel %vm365_vm0, %v412_v11, %v378_v14  ;;  %v586_v17 = vpop.permute.xlu2 %585 }
  0x9b   : > { %v533_v26 = vperm.slane %v529_v15, %v1481_v13  ;;  %v540_v27 = vrot.slane %v539_v20, 4  ;;  %v417_v28 = vperm.slane %v413_v24, %v1481_v13  ;;  %v552_v30 = vperm.slane %v548_v21, %v1481_v13  ;;  %v584_v21 = vpop.permute.xlu1 %583 }
  0x9c   : > { %v406_v25 = vsel %vm365_vm0, 0, %v405_v19  ;;  %v559_v31 = vrot.slane %v558_v23, 4  ;;  %v404_v32 = vsel %vm365_vm0, 0, %v403_v18  ;;  %v411_v35 = vperm.slane %v407_v22, %v1481_v13 }
  0x9d   : > { %v431_v29 = vrot.slane %v406_v25, 4  ;;  %v541_v34 = vsel %vm365_vm0, %v540_v27, %v533_v26  ;;  %v418_v36 = vrot.slane %v417_v28, 4  ;;  %v426_v42 = vsel %vm365_vm0, %v405_v19, %v398_v6 }
  0x9e   : > { %v545_v37 = vperm.slane %v541_v34, %v1487_v33  ;;  %v560_v38 = vsel %vm365_vm0, %v559_v31, %v552_v30  ;;  %v430_v53 = vperm.slane %v426_v42, %v1481_v13  ;;  %v590_v15 = vshrl.u32 %v1503_v51, 16 }
  0x9f   : > { %v432_v39 = vsel %vm365_vm0, %v431_v29, %v404_v32  ;;  %v564_v40 = vperm.slane %v560_v38, %v1487_v33  ;;  %v419_v41 = vsel %vm365_vm0, %v418_v36, %v411_v35  ;;  %v589_v18 = vpack.i.b16 %v582_v16, %v1503_v51  ;;  %v1317_v32 = vld [vmem:[%s1728_s3] sm:$0xff]  }
  0xa0   : > { %v436_v43 = vperm.slane %v432_v39, %v1481_v13  ;;  %v570_v44 = vshrl.u32 %v545_v37, 16  ;;  %v546_v45 = vrot.slane %v545_v37, 4  ;;  %v423_v46 = vperm.slane %v419_v41, %v1487_v33 }
  0xa1   : > { %v569_v47 = vpack.i.b16 %v564_v40, %v545_v37  ;;  %v571_v48 = vshrl.u32 %v564_v40, 16  ;;  %v565_v49 = vrot.slane %v564_v40, 4  ;;  %v591_v19 = vshrl.u32 %v582_v16, 16 }
  0xa2   : > { %v437_v50 = vrot.slane %v436_v43, 4  ;;  %v547_v52 = vsel %vm365_vm0, 0, %v546_v45  ;;  %v424_v63 = vrot.slane %v423_v46, 4  ;;  %v448_v6 = vshrl.u32 %v423_v46, 16 }
  0xa3   : > { %v714_v54 = vsel %vm329_vm1, %v569_v47, 0  ;;  %v572_v55 = vpack.i.b16 %v571_v48, %v570_v44  ;;  %v566_v56 = vsel %vm365_vm0, 0, %v565_v49  ;;  %v576_v58 = vshrl.u32 %v547_v52, 16 }
  0xa4   : > { %723 = vmatpush.bf16.xpose.msra.mxu0 %v714_v54  ;;  %v575_v57 = vpack.i.b16 %v566_v56, %v547_v52  ;;  %v577_v59 = vshrl.u32 %v566_v56, 16  ;;  %v438_v60 = vsel %vm365_vm0, %v437_v50, %v430_v53  ;;  %v425_v7 = vsel %vm365_vm0, 0, %v424_v63 }
  0xa5   : > { %v733_v61 = vsel %vm329_vm1, %v572_v55, 0  ;;  %v442_v62 = vperm.slane %v438_v60, %v1487_v33  ;;  %v454_v12 = vshrl.u32 %v425_v7, 16  ;;  %v597_v20 = vshrl.u32 %v586_v17, 16 }
  0xa6   : > { %742 = vmatpush.bf16.xpose.msra.mxu1 %v733_v61  ;;  %v752_v0 = vsel %vm329_vm1, %v575_v57, 0  ;;  %v578_v1 = vpack.i.b16 %v577_v59, %v576_v58  ;;  %v595_v22 = vpack.i.b16 %v586_v17, %v584_v21  ;;  %v596_v23 = vshrl.u32 %v584_v21, 16 }
  0xa7   : > { %761 = vmatpush.bf16.xpose.msra.mxu2 %v752_v0  ;;  %v449_v2 = vshrl.u32 %v442_v62, 16  ;;  %v443_v3 = vrot.slane %v442_v62, 4  ;;  %v447_v5 = vpack.i.b16 %v442_v62, %v423_v46  ;;  %v592_v24 = vpack.i.b16 %v591_v19, %v590_v15  ;;  %v1324_v0 = vld [vmem:[%s1728_s3 + $0x8] sm:$0xff]  }
  0xa8   : > { %v771_v4 = vsel %vm329_vm1, %v578_v1, 0  ;;  %v603_v25 = vperm.slane %v589_v18, %v1481_v13  ;;  %v1416_v26 = vmov -inf   ;;  %v598_v27 = vpack.i.b16 %v597_v20, %v596_v23 }
  0xa9   : > { %780 = vmatpush.bf16.xpose.msra.mxu3 %v771_v4  ;;  %v444_v8 = vsel %vm365_vm0, 0, %v443_v3  ;;  %v450_v10 = vpack.i.b16 %v449_v2, %v448_v6  ;;  %321 = vst.msk [vmem:[#allocation2] sm:$0xff] %vm320_vm2, %v1416_v26  ;;  %v608_v28 = vperm.slane %v595_v22, %v1481_v13  ;;  %v629_v51 = vperm.slane %v592_v24, %v1481_v13 }
  0xaa   : > { %v455_v9 = vshrl.u32 %v444_v8, 16  ;;  %v453_v11 = vpack.i.b16 %v444_v8, %v425_v7  ;;  %322 = vst.msk [vmem:[#allocation2 + $0x8] sm:$0xff] %vm320_vm2, %v1416_v26  ;;  %v611_v29 = vrot.slane %v603_v25, 4  ;;  %v634_v31 = vperm.slane %v598_v27, %v1481_v13 }
  0xab   : > { %1306 = vmatmul.msk.bf16.vlgmr.msra.gmra.mxu0 %vm329_vm1, %v447_v5  ;;  %323 = vst.msk [vmem:[#allocation2 + $0x10] sm:$0xff] %vm320_vm2, %v1416_v26  ;;  %v609_v30 = vrot.slane %v608_v28, 4  ;;  %v637_v34 = vrot.slane %v629_v51, 4  ;;  %v1318_v41 = vunpack.c.l.bf16 %v1317_v32  ;;  %v1319_v62 = vunpack.c.h.bf16 %v1317_v32 }
  0xac   : > { %v456_v14 = vpack.i.b16 %v455_v9, %v454_v12  ;;  %324 = vst.msk [vmem:[#allocation2 + $0x18] sm:$0xff] %vm320_vm2, %v1416_v26  ;;  %v612_v35 = vsel %vm365_vm0, %v608_v28, %v611_v29  ;;  %v635_v38 = vrot.slane %v634_v31, 4  ;;  %v1322_v7 = vunpack.c.l.bf16 %v1324_v0 }
  0xad   : > { %1307 = vmatmul.msk.bf16.vlgmr.msra.gmra.mxu1 %vm329_vm1, %v450_v10  ;;  %v610_v36 = vsel %vm365_vm0, %v609_v30, %v603_v25  ;;  %v620_v37 = vperm.slane %v612_v35, %v1487_v33  ;;  %v638_v40 = vsel %vm365_vm0, %v634_v31, %v637_v34  ;;  %v1323_v12 = vunpack.c.h.bf16 %v1324_v0 }
  0xae   : > { %1308 = vmatmul.msk.bf16.vlgmr.msra.gmra.mxu2 %vm329_vm1, %v453_v11  ;;  %v616_v39 = vperm.slane %v610_v36, %v1487_v33  ;;  %v636_v43 = vsel %vm365_vm0, %v635_v38, %v629_v51  ;;  %v646_v44 = vperm.slane %v638_v40, %v1487_v33 }
  0xaf   : > { %v623_v42 = vrot.slane %v620_v37, 4  ;;  %v642_v46 = vperm.slane %v636_v43, %v1487_v33  ;;  %v1417_v43 = vmov 0  }
  0xb0   : > { %1309 = vmatmul.msk.bf16.vlgmr.msra.gmra.mxu3 %vm329_vm1, %v456_v14  ;;  %v621_v45 = vrot.slane %v616_v39, 4  ;;  %v649_v48 = vrot.slane %v646_v44, 4  ;;  %1361 = vset.pattern.permute.xlu2 %v1417_v43  ;;  %v1418_v44 = vmov 0.0  }
  0xb1   : > { %v624_v47 = vsel %vm365_vm0, 0, %v623_v42  ;;  %v647_v52 = vrot.slane %v642_v46, 4  ;;  %v651_v54 = vsel %vm365_vm0, %v623_v42, %v616_v39  ;;  %1360 = vset.pattern.permute.xlu0 %v1417_v43  ;;  %1362 = vset.pattern.permute.xlu1 %v1417_v43  ;;  %325 = vst.msk [vmem:[#allocation3] sm:$0xff] %vm320_vm2, %v1418_v44 }
  0xb2   : > { %v622_v50 = vsel %vm365_vm0, 0, %v621_v45  ;;  %v656_v53 = vrot.slane %v624_v47, 4  ;;  %v650_v56 = vsel %vm365_vm0, 0, %v649_v48  ;;  %v670_v61 = vsel %vm365_vm0, %v649_v48, %v642_v46  ;;  %326 = vst.msk [vmem:[#allocation3 + $0x8] sm:$0xff] %vm320_vm2, %v1418_v44  ;;  %v1635_v45 = vld [vmem:[#allocation2] sm:$0xff] }
  0xb3   : > { %v675_v58 = vrot.slane %v650_v56, 4  ;;  %v648_v59 = vsel %vm365_vm0, 0, %v647_v52  ;;  %v655_v1 = vperm.slane %v651_v54, %v1481_v13  ;;  %v674_v5 = vperm.slane %v670_v61, %v1481_v13  ;;  %327 = vst.msk [vmem:[#allocation3 + $0x10] sm:$0xff] %vm320_vm2, %v1418_v44  ;;  %v789_v56 = vld [vmem:[#allocation2 + $0x18] sm:$0xff] }
  0xb4   : > { %v657_v60 = vsel %vm365_vm0, %v656_v53, %v622_v50  ;;  %328 = vst.msk [vmem:[#allocation3 + $0x18] sm:$0xff] %vm320_vm2, %v1418_v44  ;;  %v788_v50 = vld [vmem:[#allocation2 + $0x10] sm:$0xff] }
  0xb5   : > { %v661_v2 = vperm.slane %v657_v60, %v1481_v13  ;;  %v676_v3 = vsel %vm365_vm0, %v675_v58, %v648_v59  ;;  %330 = vst.msk [vmem:[#allocation4] sm:$0xff] %vm329_vm1, %v1418_v44 }
  0xb6   : > { %v680_v6 = vperm.slane %v676_v3, %v1481_v13  ;;  %331 = vst.msk [vmem:[#allocation4 + $0x8] sm:$0xff] %vm329_vm1, %v1418_v44 }
  0xb7   : > { %v662_v4 = vrot.slane %v661_v2, 4  ;;  %332 = vst.msk [vmem:[#allocation4 + $0x10] sm:$0xff] %vm329_vm1, %v1418_v44 }
  0xb8   : > { %v681_v10 = vrot.slane %v680_v6, 4  ;;  %333 = vst.msk [vmem:[#allocation4 + $0x18] sm:$0xff] %vm329_vm1, %v1418_v44 }
  0xb9   : > { %v663_v9 = vsel %vm365_vm0, %v662_v4, %v655_v1 }
  0xba   : > { %v667_v14 = vperm.slane %v663_v9, %v1487_v33  ;;  %v682_v16 = vsel %vm365_vm0, %v681_v10, %v674_v5 }
  0xbb   : > { %v686_v19 = vperm.slane %v682_v16, %v1487_v33 }
  0xbc   : > { %v692_v20 = vshrl.u32 %v667_v14, 16  ;;  %v668_v21 = vrot.slane %v667_v14, 4 }
  0xbd   : > { %v691_v26 = vpack.i.b16 %v686_v19, %v667_v14  ;;  %v693_v27 = vshrl.u32 %v686_v19, 16  ;;  %v687_v29 = vrot.slane %v686_v19, 4 }
  0xbe   : > { %v669_v28 = vsel %vm365_vm0, 0, %v668_v21 }
  0xbf   : > { %v916_v30 = vsel %vm914_vm3, %v691_v26, 0  ;;  %v694_v31 = vpack.i.b16 %v693_v27, %v692_v20  ;;  %v698_v32 = vshrl.u32 %v669_v28, 16  ;;  %v688_v34 = vsel %vm365_vm0, 0, %v687_v29 }
  0xc0   : > { %925 = vmatpush.bf16.msrb.mxu0 %v916_v30  ;;  %v697_v36 = vpack.i.b16 %v688_v34, %v669_v28  ;;  %v699_v37 = vshrl.u32 %v688_v34, 16  ;;  %v850_v30 = vld [vmem:[#allocation3] sm:$0xff] }
  0xc1   : > { %v935_v35 = vsel %vm914_vm3, %v694_v31, 0 }
  0xc2   : > { %944 = vmatpush.bf16.msrb.mxu1 %v935_v35  ;;  %v954_v39 = vsel %vm914_vm3, %v697_v36, 0  ;;  %v700_v40 = vpack.i.b16 %v699_v37, %v698_v32 }
  0xc3   : > { %963 = vmatpush.bf16.msrb.mxu2 %v954_v39  ;;  %v852_v39 = vld [vmem:[#allocation3 + $0x10] sm:$0xff] }
  0xc4   : > { %v973_v42 = vsel %vm914_vm3, %v700_v40, 0  ;;  %v853_v40 = vld [vmem:[#allocation3 + $0x18] sm:$0xff] }
  0xc5   : > { %982 = vmatpush.bf16.msrb.mxu3 %v973_v42 }
 0x128   : > { %v725_v49 = vpop.f32.mrf.mxu0 }
 0x129   : > { %v1589_v55 = vadd.f32 %v1318_v41, %v725_v49  ;;  %v787_v49 = vld [vmem:[#allocation2 + $0x8] sm:$0xff] }
 0x12a   : > { %v744_v57 = vpop.f32.mrf.mxu1 }
 0x12b   : > { %v790_v63 = vsel %vm329_vm1, %v1589_v55, -inf  ;;  %v1605_v8 = vadd.f32 %v1319_v62, %v744_v57 }
 0x12c   : > { %791 = vmax.xlane.f32.xlu2 %v790_v63 }
 0x12d   : > { %v793_v23 = vsel %vm329_vm1, %v1605_v8, -inf }
 0x130   : > { %v727_v11 = vpop.f32.mrf.mxu0 }
 0x131   : > { %v763_v15 = vpop.f32.mrf.mxu2 }
 0x132   : > { %v1610_v17 = vadd.f32 %v1322_v7, %v763_v15  ;;  %v746_v18 = vpop.f32.mrf.mxu1 }
 0x133   : > { %v782_v22 = vpop.f32.mrf.mxu3 }
 0x134   : > { %v1615_v24 = vadd.f32 %v1323_v12, %v782_v22  ;;  %794 = vmax.xlane.f32.xlu2 %v793_v23  ;;  %v796_v25 = vsel %vm329_vm1, %v1610_v17, -inf }
 0x135   : > { %797 = vmax.xlane.f32.xlu0 %v796_v25 }
 0x136   : > { %v799_v51 = vsel %vm329_vm1, %v1615_v24, -inf }
 0x137   : > { %800 = vmax.xlane.f32.xlu1 %v799_v51 }
 0x139   : > { %v765_v38 = vpop.f32.mrf.mxu2 }
 0x13b   : > { %v784_v41 = vpop.f32.mrf.mxu3 }
 0x19f   : > { %v792_v46 = vpop.xlane.xlu2 %791 }
 0x1a0   : > { %v1638_v47 = vmax.f32 %v1635_v45, %v792_v46 }
 0x1a2   : > { %v806_v48 = vsub.f32 %v1635_v45, %v1638_v47  ;;  %996 = vst.msk [vmem:[#allocation2] sm:$0xff] %vm320_vm2, %v1638_v47  ;;  %820 = vperm.xlu2 %1361, %v1638_v47   ;;  %v851_v47 = vld [vmem:[#allocation3 + $0x8] sm:$0xff] }
 0x1a4   : > { %v810_v27 = vmul.f32 1.442695, %v806_v48 }
 0x1a7   : > { %v795_v52 = vpop.xlane.xlu2 %794 }
 0x1a8   : > { %v803_v53 = vmax.f32 %v787_v49, %v795_v52  ;;  %v798_v54 = vpop.xlane.xlu0 %797 }
 0x1a9   : > { %v804_v57 = vmax.f32 %v788_v50, %v798_v54 }
 0x1aa   : > { %v807_v58 = vsub.f32 %v787_v49, %v803_v53  ;;  %997 = vst.msk [vmem:[#allocation2 + $0x8] sm:$0xff] %vm320_vm2, %v803_v53  ;;  %v801_v59 = vpop.xlane.xlu1 %800 }
 0x1ab   : > { %v808_v60 = vsub.f32 %v788_v50, %v804_v57  ;;  %998 = vst.msk [vmem:[#allocation2 + $0x10] sm:$0xff] %vm320_vm2, %v804_v57  ;;  %v805_v61 = vmax.f32 %v789_v56, %v801_v59  ;;  %830 = vperm.xlu0 %1360, %v804_v57   ;;  %v880_v59 = vld [vmem:[#allocation4 + $0x8] sm:$0xff] }
 0x1ac   : > { %v812_v6 = vmul.f32 1.442695, %v807_v58 }
 0x1ad   : > { %v809_v62 = vsub.f32 %v789_v56, %v805_v61  ;;  %999 = vst.msk [vmem:[#allocation2 + $0x18] sm:$0xff] %vm320_vm2, %v805_v61  ;;  %835 = vperm.xlu1 %1362, %v805_v61   ;;  %v814_v5 = vmul.f32 1.442695, %v808_v60  ;;  %v881_v56 = vld [vmem:[#allocation4 + $0x10] sm:$0xff] }
 0x1af   : > { %v816_v28 = vmul.f32 1.442695, %v809_v62 }
 0x1b5   : > { %825 = vperm.xlu1 %1362, %v803_v53  }
 0x1fc   : > { %v821_v63 = vpop.permute.xlu2 %820 }
 0x1fd   : > { %v838_v0 = vsub.f32 %v1589_v55, %v821_v63 }
 0x1ff   : > { %v842_v1 = vmul.f32 1.442695, %v838_v0 }
 0x201   : > { %1363 = vpow2.f32 %v842_v1 }
 0x202   : > { %1365 = vpow2.f32 %v814_v5  ;;  %v879_v5 = vld [vmem:[#allocation4] sm:$0xff] }
 0x203   : > { %1367 = vpow2.f32 %v812_v6 }
 0x207   : > { %v1364_v2 = vpop.eup %1363 }
 0x208   : > { %v858_v3 = vsel %vm329_vm1, %v1364_v2, 0.0  ;;  %v907_v4 = vpack.c.bf16 %v1364_v2, %v1364_v2  ;;  %v1366_v11 = vpop.eup %1365 }
 0x209   : > { %859 = vadd.xlane.f32.xlu2 %v858_v3  ;;  %v1368_v15 = vpop.eup %1367  ;;  %v856_v41 = vmul.f32 %v1366_v11, %v852_v39 }
 0x20a   : > { %1310 = vmatmul.msk.bf16.vlgmr.msrb.gmra.mxu0 %vm329_vm1, %v907_v4  ;;  %v855_v49 = vmul.f32 %v1368_v15, %v851_v47 }
 0x21d   : > { %v831_v7 = vpop.permute.xlu0 %830 }
 0x21e   : > { %v840_v9 = vsub.f32 %v1610_v17, %v831_v7 }
 0x21f   : > { %v836_v10 = vpop.permute.xlu1 %835 }
 0x220   : > { %v846_v12 = vmul.f32 1.442695, %v840_v9  ;;  %v841_v55 = vsub.f32 %v1615_v24, %v836_v10 }
 0x221   : > { %895 = vperm.xlu2 %1361, %v1366_v11  }
 0x222   : > { %1369 = vpow2.f32 %v846_v12  ;;  %v848_v14 = vmul.f32 1.442695, %v841_v55  ;;  %v882_v12 = vld [vmem:[#allocation4 + $0x18] sm:$0xff] }
 0x224   : > { %1371 = vpow2.f32 %v848_v14 }
 0x227   : > { %v826_v16 = vpop.permute.xlu1 %825 }
 0x228   : > { %v1370_v18 = vpop.eup %1369  ;;  %v839_v19 = vsub.f32 %v1605_v8, %v826_v16 }
 0x229   : > { %890 = vperm.xlu2 %1361, %v1368_v15   ;;  %v864_v20 = vsel %vm329_vm1, %v1370_v18, 0.0  ;;  %v909_v21 = vpack.c.bf16 %v1370_v18, %v1370_v18 }
 0x22a   : > { %v1372_v17 = vpop.eup %1371  ;;  %v844_v22 = vmul.f32 1.442695, %v839_v19  ;;  %865 = vadd.xlane.f32.xlu0 %v864_v20 }
 0x22b   : > { %1312 = vmatmul.msk.bf16.vlgmr.msrb.gmra.mxu2 %vm329_vm1, %v909_v21  ;;  %v867_v23 = vsel %vm329_vm1, %v1372_v17, 0.0  ;;  %v910_v24 = vpack.c.bf16 %v1372_v17, %v1372_v17 }
 0x22c   : > { %1373 = vpow2.f32 %v844_v22  ;;  %868 = vadd.xlane.f32.xlu1 %v867_v23 }
 0x22d   : > { %1313 = vmatmul.msk.bf16.vlgmr.msrb.gmra.mxu3 %vm329_vm1, %v910_v24  ;;  %1375 = vpow2.f32 %v810_v27 }
 0x22e   : > { %1377 = vpow2.f32 %v816_v28 }
 0x232   : > { %v1374_v25 = vpop.eup %1373 }
 0x233   : > { %v861_v26 = vsel %vm329_vm1, %v1374_v25, 0.0  ;;  %v908_v8 = vpack.c.bf16 %v1374_v25, %v1374_v25  ;;  %v1376_v29 = vpop.eup %1375 }
 0x234   : > { %862 = vadd.xlane.f32.xlu0 %v861_v26  ;;  %v1378_v51 = vpop.eup %1377  ;;  %v854_v31 = vmul.f32 %v1376_v29, %v850_v30 }
 0x235   : > { %1311 = vmatmul.msk.bf16.vlgmr.msrb.gmra.mxu1 %vm329_vm1, %v908_v8  ;;  %v857_v44 = vmul.f32 %v1378_v51, %v853_v40 }
 0x245   : > { %885 = vperm.xlu1 %1362, %v1376_v29  }
 0x248   : > { %900 = vperm.xlu0 %1360, %v1378_v51  }
 0x27c   : > { %v860_v32 = vpop.xlane.xlu2 %859 }
 0x27d   : > { %v870_v34 = vadd.f32 %v860_v32, %v854_v31 }
 0x27f   : > { %875 = vst.msk [vmem:[#allocation3] sm:$0xff] %vm320_vm2, %v870_v34 }
 0x284   : > { %v896_v48 = vpop.permute.xlu2 %895 }
 0x285   : > { %v905_v57 = vmul.f32 %v896_v48, %v881_v56 }
 0x286   : > { %v1007_v35 = vld [vmem:[#allocation3] sm:$0xff] }
 0x287   : > { %v927_v36 = vpop.f32.mrf.mxu0  ;;  %1379 = vrcp.f32 %v1007_v35 }
 0x28c   : > { %v891_v60 = vpop.permute.xlu2 %890 }
 0x28d   : > { %v1380_v37 = vpop.eup %1379  ;;  %v904_v1 = vmul.f32 %v891_v60, %v880_v59 }
 0x28e   : > { %1017 = vperm.xlu1 %1362, %v1380_v37  }
 0x28f   : > { %v929_v38 = vpop.f32.mrf.mxu0 }
 0x29d   : > { %v866_v42 = vpop.xlane.xlu0 %865 }
 0x29e   : > { %v872_v43 = vadd.f32 %v866_v42, %v856_v41 }
 0x29f   : > { %v869_v45 = vpop.xlane.xlu1 %868 }
 0x2a0   : > { %877 = vst.msk [vmem:[#allocation3 + $0x10] sm:$0xff] %vm320_vm2, %v872_v43  ;;  %v873_v46 = vadd.f32 %v869_v45, %v857_v44 }
 0x2a2   : > { %878 = vst.msk [vmem:[#allocation3 + $0x18] sm:$0xff] %vm320_vm2, %v873_v46 }
 0x2a7   : > { %v863_v50 = vpop.xlane.xlu0 %862  ;;  %v1009_v52 = vld [vmem:[#allocation3 + $0x10] sm:$0xff] }
 0x2a8   : > { %v871_v53 = vadd.f32 %v863_v50, %v855_v49  ;;  %1381 = vrcp.f32 %v1009_v52 }
 0x2a9   : > { %v1010_v54 = vld [vmem:[#allocation3 + $0x18] sm:$0xff] }
 0x2aa   : > { %876 = vst.msk [vmem:[#allocation3 + $0x8] sm:$0xff] %vm320_vm2, %v871_v53  ;;  %1383 = vrcp.f32 %v1010_v54 }
 0x2ae   : > { %v1382_v58 = vpop.eup %1381  ;;  %v965_v61 = vpop.f32.mrf.mxu2 }
 0x2af   : > { %v990_v62 = vadd.f32 %v965_v61, %v905_v57  ;;  %1027 = vperm.xlu0 %1360, %v1382_v58  }
 0x2b0   : > { %v1384_v63 = vpop.eup %1383  ;;  %v984_v0 = vpop.f32.mrf.mxu3 }
 0x2b1   : > { %994 = vst.msk [vmem:[#allocation4 + $0x10] sm:$0xff] %vm329_vm1, %v990_v62  ;;  %1032 = vperm.xlu2 %1361, %v1384_v63   ;;  %v1008_v2 = vld [vmem:[#allocation3 + $0x8] sm:$0xff] }
 0x2b2   : > { %v946_v3 = vpop.f32.mrf.mxu1  ;;  %1385 = vrcp.f32 %v1008_v2 }
 0x2b3   : > { %v989_v4 = vadd.f32 %v946_v3, %v904_v1 }
 0x2b5   : > { %993 = vst.msk [vmem:[#allocation4 + $0x8] sm:$0xff] %vm329_vm1, %v989_v4 }
 0x2b6   : > { %v967_v6 = vpop.f32.mrf.mxu2 }
 0x2b7   : > { %v886_v7 = vpop.permute.xlu1 %885 }
 0x2b8   : > { %v1386_v9 = vpop.eup %1385  ;;  %v903_v10 = vmul.f32 %v886_v7, %v879_v5  ;;  %v986_v11 = vpop.f32.mrf.mxu3  ;;  %v1005_v20 = vld [vmem:[#allocation4 + $0x10] sm:$0xff] }
 0x2b9   : > { %1022 = vperm.xlu0 %1360, %v1386_v9  }
 0x2ba   : > { %v988_v55 = vadd.f32 %v927_v36, %v903_v10  ;;  %v948_v14 = vpop.f32.mrf.mxu1  ;;  %v901_v15 = vpop.permute.xlu0 %900 }
 0x2bb   : > { %v906_v16 = vmul.f32 %v901_v15, %v882_v12 }
 0x2bc   : > { %992 = vst.msk [vmem:[#allocation4] sm:$0xff] %vm329_vm1, %v988_v55  ;;  %v1004_v30 = vld [vmem:[#allocation4 + $0x8] sm:$0xff] }
 0x2bd   : > { %v991_v18 = vadd.f32 %v984_v0, %v906_v16 }
 0x2bf   : > { %995 = vst.msk [vmem:[#allocation4 + $0x18] sm:$0xff] %vm329_vm1, %v991_v18 }
 0x2c3   : > { %v1003_v22 = vld [vmem:[#allocation4] sm:$0xff] }
 0x2c6   : > { %v1006_v26 = vld [vmem:[#allocation4 + $0x18] sm:$0xff] }
 0x300   : > { %v1018_v19 = vpop.permute.xlu1 %1017 }
 0x301   : > { %v1035_v23 = vmul.f32 %v1018_v19, %v1003_v22 }
 0x303   : > { %v1042_v8 = vrot.slane %v1035_v23, 4 }
 0x30b   : > { %v1033_v25 = vpop.permute.xlu2 %1032 }
 0x30c   : > { %v1038_v27 = vmul.f32 %v1033_v25, %v1006_v26 }
 0x30e   : > { %v1052_v32 = vrot.slane %v1038_v27, 4 }
 0x321   : > { %v1028_v21 = vpop.permute.xlu0 %1027 }
 0x322   : > { %v1037_v17 = vmul.f32 %v1028_v21, %v1005_v20 }
 0x324   : > { %v1039_v24 = vrot.slane %v1037_v17, 4  ;;  %v1043_v29 = vsel %vm365_vm0, %v1037_v17, %v1042_v8 }
 0x325   : > { %v1051_v35 = vperm.slane %v1043_v29, %v1481_v13 }
 0x326   : > { %v1041_v28 = vsel %vm365_vm0, %v1039_v24, %v1035_v23 }
 0x327   : > { %v1047_v51 = vperm.slane %v1041_v28, %v1481_v13  ;;  %v1078_v41 = vrot.slane %v1051_v35, 4 }
 0x329   : > { %v1066_v38 = vrot.slane %v1047_v51, 4 }
 0x32b   : > { %v1023_v31 = vpop.permute.xlu0 %1022 }
 0x32c   : > { %v1036_v34 = vmul.f32 %v1023_v31, %v1004_v30 }
 0x32e   : > { %v1053_v36 = vsel %vm365_vm0, %v1052_v32, %v1036_v34  ;;  %v1054_v37 = vrot.slane %v1036_v34, 4 }
 0x32f   : > { %v1059_v39 = vperm.slane %v1053_v36, %v1481_v13 }
 0x330   : > { %v1055_v40 = vsel %vm365_vm0, %v1038_v27, %v1054_v37 }
 0x331   : > { %v1063_v42 = vperm.slane %v1055_v40, %v1481_v13  ;;  %v1064_v43 = vrot.slane %v1059_v39, 4  ;;  %v1067_v44 = vsel %vm365_vm0, %v1059_v39, %v1066_v38 }
 0x332   : > { %v1075_v45 = vperm.slane %v1067_v44, %v1487_v33 }
 0x333   : > { %v1065_v46 = vsel %vm365_vm0, %v1064_v43, %v1047_v51  ;;  %v1076_v47 = vrot.slane %v1063_v42, 4  ;;  %v1079_v48 = vsel %vm365_vm0, %v1063_v42, %v1078_v41 }
 0x334   : > { %v1071_v49 = vperm.slane %v1065_v46, %v1487_v33  ;;  %v1087_v50 = vperm.slane %v1079_v48, %v1487_v33  ;;  %v1090_v52 = vrot.slane %v1075_v45, 4 }
 0x335   : > { %v1077_v53 = vsel %vm365_vm0, %v1076_v47, %v1051_v35 }
 0x336   : > { %v1083_v54 = vperm.slane %v1077_v53, %v1487_v33  ;;  %v1088_v56 = vrot.slane %v1071_v49, 4  ;;  %v1091_v57 = vsel %vm365_vm0, 0.0, %v1090_v52  ;;  %v1094_v58 = vrot.slane %v1087_v50, 4 }
 0x337   : > { %v1096_v59 = vsel %vm365_vm0, %v1090_v52, %v1071_v49  ;;  %v1101_v60 = vrot.slane %v1091_v57, 4 }
 0x338   : > { %v1095_v61 = vsel %vm365_vm0, 0.0, %v1094_v58  ;;  %v1089_v62 = vsel %vm365_vm0, 0.0, %v1088_v56  ;;  %v1092_v63 = vrot.slane %v1083_v54, 4  ;;  %v1100_v0 = vperm.slane %v1096_v59, %v1481_v13 }
 0x339   : > { %v1112_v1 = vrot.slane %v1095_v61, 4  ;;  %v1102_v2 = vsel %vm365_vm0, %v1101_v60, %v1089_v62  ;;  %v1107_v3 = vsel %vm365_vm0, %v1094_v58, %v1083_v54 }
 0x33a   : > { %v1093_v4 = vsel %vm365_vm0, 0.0, %v1092_v63  ;;  %v1106_v5 = vperm.slane %v1102_v2, %v1481_v13  ;;  %v1111_v6 = vperm.slane %v1107_v3, %v1481_v13  ;;  %v1120_v7 = vrot.slane %v1100_v0, 4 }
 0x33b   : > { %v1113_v9 = vsel %vm365_vm0, %v1112_v1, %v1093_v4 }
 0x33c   : > { %v1117_v10 = vperm.slane %v1113_v9, %v1481_v13  ;;  %v1121_v11 = vsel %vm365_vm0, %v1106_v5, %v1120_v7  ;;  %v1132_v12 = vrot.slane %v1111_v6, 4  ;;  %v1118_v55 = vrot.slane %v1106_v5, 4 }
 0x33d   : > { %v1129_v14 = vperm.slane %v1121_v11, %v1487_v33 }
 0x33e   : > { %v1133_v15 = vsel %vm365_vm0, %v1117_v10, %v1132_v12  ;;  %v1119_v16 = vsel %vm365_vm0, %v1118_v55, %v1100_v0  ;;  %v1130_v18 = vrot.slane %v1117_v10, 4 }
 0x33f   : > { %v1141_v19 = vperm.slane %v1133_v15, %v1487_v33  ;;  %v1148_v20 = vrot.slane %v1129_v14, 4  ;;  %v1125_v21 = vperm.slane %v1119_v16, %v1487_v33 }
 0x340   : > { %v1131_v17 = vsel %vm365_vm0, %v1130_v18, %v1111_v6 }
 0x341   : > { %v1149_v13 = vsel %vm365_vm0, %v1141_v19, %v1148_v20  ;;  %v1146_v22 = vrot.slane %v1141_v19, 4  ;;  %v1137_v23 = vperm.slane %v1131_v17, %v1487_v33  ;;  %v1144_v24 = vrot.slane %v1125_v21, 4 }
 0x342   : > { %1159 = vrot.lane.b32.xlu0 %v1149_v13, %s1419_s10 }
 0x343   : > { %v1147_v25 = vsel %vm365_vm0, %v1146_v22, %v1129_v14  ;;  %v1142_v26 = vrot.slane %v1137_v23, 4  ;;  %v1145_v8 = vsel %vm365_vm0, %v1137_v23, %v1144_v24 }
 0x344   : > { %1155 = vrot.lane.b32.xlu2 %v1147_v25, %s1420_s11  ;;  %1151 = vrot.lane.b32.xlu1 %v1145_v8, %s1421_s12 }
 0x345   : > { %v1143_v27 = vsel %vm365_vm0, %v1142_v26, %v1125_v21 }
 0x39e   : > { %v1156_v29 = vpop.permute.xlu2 %1155 }
 0x3b4   : > { %v1160_v51 = vpop.permute.xlu0 %1159 }
 0x3b6   : > { %v1152_v28 = vpop.permute.xlu1 %1151 }
 0x3b7   : > { %v1162_v33 = vsel %vm329_vm1, %v1143_v27, %v1152_v28 }
 0x3b8   : > { %v1164_v30 = vsel %vm1163_vm4, %v1162_v33, %v1156_v29 }
 0x3b9   : > { %v1166_v31 = vsel %vm1165_vm5, %v1164_v30, %v1160_v51 }
 0x3ba   : > { %v1167_v32 = vpack.c.bf16 %v1166_v31, %v1166_v31 }
 0x3bc   : > { %1169 = vst.msk [vmem:[%s314_s15] sm:$0xf] %vm1168_vm6, %v1167_v32 }
 0x3bd PF: > { %s14_s17 = sadd.s32 1, %s1409_s17   ;;  %s1730_s15 = smov %s1405_s16 }
 0x3be   : > { %p11_p5 = scmp.ge.s32.totalorder %s14_s17, 4   ;;  %s1731_s16 = smov %s1733_s18 }
 0x3c0   :  { %13 = sbr.rel (!%p11_p5) target bundleno = 2 (0x2), region = 83 }

// kernel: _lambda_.57
= control target key start
LH: loop header
LB: loop body
LE: loop exit
PB: predicated region body
PF: predicated region fallthrough
CT: control target
= control target key end

     0   :  { %s1424_s15 = smov 0   ;;  %s1426_s16 = smov 0   ;;  %s1708_s0 = inlined_call_operand.vmem [shape: bf16[2,8,32], index: 0, kind: input, shape index: {}]   ;;  %s1709_s1 = inlined_call_operand.vmem [shape: bf16[2,8,32], index: 1, kind: input, shape index: {}]   ;;  %s1710_s2 = inlined_call_operand.vmem [shape: bf16[2,8,32], index: 2, kind: input, shape index: {}]   ;;  %s1711_s3 = inlined_call_operand.vmem [shape: f32[2,1,8], index: 3, kind: input, shape index: {}]   ;;  %s1712_s4 = inlined_call_operand.vmem [shape: bf16[2,8,32], index: 4, kind: output, shape index: {}]  }
   0x1   :  { %s1428_s17 = smov 0  }
   0x2 LB: > { %s33_s18 = sadd.s32 1, %s1382_s16  ;;  %p1286_p0 = scmp.ge.s32.totalorder %s1386_s17, 1  ;;  %s1386_s17 = sphi %s1428_s17, %s14_s17   ;;  %s1382_s16 = sphi %s1426_s16, %s1714_s16   ;;  %s1378_s15 = sphi %s1424_s15, %s1713_s15  }
   0x3   : > { %p35_p1 = scmp.ge.s32.totalorder %s33_s18, 2  ;;  %p228_p2 = scmp.lt.s32.totalorder %s1386_s17, 3 }
   0x5   : > { %s1716_s18 = smov (%p35_p1, %s33_s18), 0  ;;  %p229_p3 = pnand %p1286_p0, %p228_p2 }
   0x6   : > { %p278_p4 = scmp.lt.s32.totalorder (!%p229_p3), %s1378_s15, 1  ;;  %s1388_s26 = smov (!%p229_p3), 104  }
   0x7   : > { %232 = sbr.rel (%p229_p3) target bundleno = 957 (0x3bd), region = 36  ;;  %s1389_s27 = smov (!%p229_p3), 120  }
   0x8   : > { %s1390_s28 = smov (!%p229_p3), 112   ;;  %s1396_s11 = smov (!%p229_p3), 24  }
   0x9   : > { %s1397_s12 = smov (!%p229_p3), 16   ;;  %s1398_s13 = smov (!%p229_p3), 8  }
   0xc   : > { %s1718_s15 = smov (!%p278_p4, %s1378_s15), 1  ;;  %v1391_v4 = vmov 1983009808   ;;  %v1392_v19 = vmov 1934713408   ;;  %vm362_vm0 = vcmask 1047556  }
   0xd   : > { %s1445_s19 = sshll.u32 %s1718_s15, 2  ;;  %s304_s5 = scalar_lea.vmem %s1711_s3, %s1718_s15  ;;  %v353_v5 = vunpack.c.l.s4 %v1391_v4  ;;  %v367_v20 = vunpack.c.l.s4 %v1392_v19  ;;  %vm326_vm1 = vcmask 64512   ;;  %vm317_vm2 = vcmask 7168  }
   0xe   : > { %s291_s22 = scalar_lea.vmem %s1709_s1, %s1445_s19  ;;  %s284_s25 = scalar_lea.vmem %s1708_s0, %s1445_s19  ;;  %vm907_vm3 = vcmask 1043456   ;;  %vm1156_vm4 = vcmask 130048   ;;  %vm1158_vm5 = vcmask 195584   ;;  %vm1161_vm6 = vcmask 257024  }
   0xf   : > { %v454_v0 = vld [vmem:[%s291_s22] sm:$0xf]  ;;  %v1465_v13 = vunpack.c.0.s8 %v353_v5  ;;  %v1471_v33 = vunpack.c.0.s8 %v367_v20  ;;  %s298_s8 = scalar_lea.vmem %s1710_s2, %s1445_s19  ;;  %s311_s20 = scalar_lea.vmem %s1712_s4, %s1445_s19 }
  0x10   : > { %460 = vrot.lane.b32.xlu1 %v454_v0, %s1388_s26  ;;  %456 = vrot.lane.b32.xlu0 %v454_v0, %s1389_s27  ;;  %v331_v1 = vld [vmem:[%s284_s25] sm:$0xf]  ;;  %v465_v8 = vshrl.u32 %v454_v0, 16 }
  0x11   : > { %335 = vrot.lane.b32.xlu2 %v331_v1, %s1390_s28  ;;  %v342_v21 = vshrl.u32 %v331_v1, 16  ;;  %v1487_v51 = vld [vmem:[%s298_s8] sm:$0xf] }
  0x18   : > { %458 = vrot.lane.b32.xlu0 %v454_v0, %s1390_s28  ;;  %333 = vrot.lane.b32.xlu1 %v331_v1, %s1389_s27 }
  0x19   : > { %337 = vrot.lane.b32.xlu2 %v331_v1, %s1388_s26 }
  0x20   : > { %578 = vrot.lane.b32.xlu0 %v1487_v51, %s1389_s27  ;;  %580 = vrot.lane.b32.xlu1 %v1487_v51, %s1390_s28 }
  0x21   : > { %582 = vrot.lane.b32.xlu2 %v1487_v51, %s1388_s26 }
  0x6b   : > { %v336_v2 = vpop.permute.xlu2 %335 }
  0x6c   : > { %v348_v9 = vshrl.u32 %v336_v2, 16 }
  0x73   : > { %v338_v3 = vpop.permute.xlu2 %337 }
  0x74   : > { %v347_v10 = vpack.i.b16 %v338_v3, %v336_v2  ;;  %v349_v11 = vshrl.u32 %v338_v3, 16 }
  0x76   : > { %v350_v16 = vpack.i.b16 %v349_v11, %v348_v9  ;;  %v360_v17 = vperm.slane %v347_v10, %v1465_v13 }
  0x78   : > { %v361_v25 = vrot.slane %v360_v17, 4  ;;  %v387_v26 = vperm.slane %v350_v16, %v1465_v13 }
  0x7a   : > { %v388_v39 = vrot.slane %v387_v26, 4 }
  0x82   : > { %v461_v6 = vpop.permute.xlu1 %460  ;;  %v457_v7 = vpop.permute.xlu0 %456 }
  0x83   : > { %v466_v12 = vshrl.u32 %v457_v7, 16  ;;  %v464_v14 = vpack.i.b16 %v457_v7, %v454_v0  ;;  %v472_v22 = vshrl.u32 %v461_v6, 16 }
  0x85   : > { %v467_v15 = vpack.i.b16 %v466_v12, %v465_v8  ;;  %v478_v18 = vperm.slane %v464_v14, %v1465_v13 }
  0x87   : > { %v504_v23 = vperm.slane %v467_v15, %v1465_v13  ;;  %v486_v32 = vrot.slane %v478_v18, 4 }
  0x89   : > { %v512_v38 = vrot.slane %v504_v23, 4 }
  0x8a   : > { %v459_v24 = vpop.permute.xlu0 %458  ;;  %v334_v27 = vpop.permute.xlu1 %333 }
  0x8b   : > { %v470_v28 = vpack.i.b16 %v461_v6, %v459_v24  ;;  %v471_v29 = vshrl.u32 %v459_v24, 16  ;;  %v341_v30 = vpack.i.b16 %v334_v27, %v331_v1  ;;  %v343_v31 = vshrl.u32 %v334_v27, 16 }
  0x8d   : > { %v473_v34 = vpack.i.b16 %v472_v22, %v471_v29  ;;  %v483_v35 = vperm.slane %v470_v28, %v1465_v13  ;;  %v344_v36 = vpack.i.b16 %v343_v31, %v342_v21  ;;  %v355_v37 = vperm.slane %v341_v30, %v1465_v13 }
  0x8f   : > { %v484_v40 = vrot.slane %v483_v35, 4  ;;  %v487_v41 = vsel %vm362_vm0, %v483_v35, %v486_v32  ;;  %v509_v42 = vperm.slane %v473_v34, %v1465_v13  ;;  %v363_v43 = vsel %vm362_vm0, %v361_v25, %v355_v37 }
  0x90   : > { %v495_v44 = vperm.slane %v487_v41, %v1471_v33  ;;  %v364_v45 = vrot.slane %v355_v37, 4  ;;  %v369_v46 = vperm.slane %v363_v43, %v1471_v33  ;;  %v382_v50 = vperm.slane %v344_v36, %v1465_v13 }
  0x91   : > { %v485_v47 = vsel %vm362_vm0, %v484_v40, %v478_v18  ;;  %v510_v48 = vrot.slane %v509_v42, 4  ;;  %v513_v49 = vsel %vm362_vm0, %v509_v42, %v512_v38 }
  0x92   : > { %v491_v52 = vperm.slane %v485_v47, %v1471_v33  ;;  %v498_v53 = vrot.slane %v495_v44, 4  ;;  %v521_v54 = vperm.slane %v513_v49, %v1471_v33  ;;  %v365_v55 = vsel %vm362_vm0, %v360_v17, %v364_v45 }
  0x93   : > { %v511_v56 = vsel %vm362_vm0, %v510_v48, %v504_v23  ;;  %v373_v57 = vperm.slane %v365_v55, %v1471_v33  ;;  %v389_v58 = vsel %vm362_vm0, %v388_v39, %v382_v50  ;;  %v374_v0 = vrot.slane %v369_v46, 4 }
  0x94   : > { %v496_v59 = vrot.slane %v491_v52, 4  ;;  %v499_v60 = vsel %vm362_vm0, 0, %v498_v53  ;;  %v517_v61 = vperm.slane %v511_v56, %v1471_v33  ;;  %v524_v62 = vrot.slane %v521_v54, 4 }
  0x95   : > { %v531_v63 = vrot.slane %v499_v60, 4  ;;  %v376_v1 = vrot.slane %v373_v57, 4  ;;  %v390_v2 = vrot.slane %v382_v50, 4  ;;  %v395_v6 = vperm.slane %v389_v58, %v1471_v33 }
  0x96   : > { %v497_v3 = vsel %vm362_vm0, 0, %v496_v59  ;;  %v522_v4 = vrot.slane %v517_v61, 4  ;;  %v525_v5 = vsel %vm362_vm0, 0, %v524_v62  ;;  %v375_v14 = vsel %vm362_vm0, 0, %v374_v0 }
  0x97   : > { %v550_v7 = vrot.slane %v525_v5, 4  ;;  %v377_v8 = vsel %vm362_vm0, 0, %v376_v1  ;;  %v391_v9 = vsel %vm362_vm0, %v387_v26, %v390_v2  ;;  %v526_v15 = vsel %vm362_vm0, %v498_v53, %v491_v52 }
  0x98   : > { %v399_v10 = vperm.slane %v391_v9, %v1471_v33  ;;  %v409_v11 = vrot.slane %v377_v8, 4  ;;  %v523_v12 = vsel %vm362_vm0, 0, %v522_v4  ;;  %v532_v16 = vsel %vm362_vm0, %v531_v63, %v497_v3 }
  0x99   : > { %v551_v17 = vsel %vm362_vm0, %v550_v7, %v523_v12  ;;  %v400_v18 = vrot.slane %v395_v6, 4  ;;  %v536_v20 = vperm.slane %v532_v16, %v1465_v13  ;;  %v545_v21 = vsel %vm362_vm0, %v524_v62, %v517_v61  ;;  %v579_v16 = vpop.permute.xlu0 %578 }
  0x9a   : > { %v402_v19 = vrot.slane %v399_v10, 4  ;;  %v404_v22 = vsel %vm362_vm0, %v376_v1, %v369_v46  ;;  %v555_v23 = vperm.slane %v551_v17, %v1465_v13  ;;  %v410_v24 = vsel %vm362_vm0, %v409_v11, %v375_v14  ;;  %v583_v17 = vpop.permute.xlu2 %582 }
  0x9b   : > { %v530_v26 = vperm.slane %v526_v15, %v1465_v13  ;;  %v537_v27 = vrot.slane %v536_v20, 4  ;;  %v414_v28 = vperm.slane %v410_v24, %v1465_v13  ;;  %v549_v30 = vperm.slane %v545_v21, %v1465_v13  ;;  %v581_v21 = vpop.permute.xlu1 %580 }
  0x9c   : > { %v403_v25 = vsel %vm362_vm0, 0, %v402_v19  ;;  %v556_v31 = vrot.slane %v555_v23, 4  ;;  %v401_v32 = vsel %vm362_vm0, 0, %v400_v18  ;;  %v408_v35 = vperm.slane %v404_v22, %v1465_v13 }
  0x9d   : > { %v428_v29 = vrot.slane %v403_v25, 4  ;;  %v538_v34 = vsel %vm362_vm0, %v537_v27, %v530_v26  ;;  %v415_v36 = vrot.slane %v414_v28, 4  ;;  %v423_v42 = vsel %vm362_vm0, %v402_v19, %v395_v6 }
  0x9e   : > { %v542_v37 = vperm.slane %v538_v34, %v1471_v33  ;;  %v557_v38 = vsel %vm362_vm0, %v556_v31, %v549_v30  ;;  %v427_v53 = vperm.slane %v423_v42, %v1465_v13  ;;  %v587_v15 = vshrl.u32 %v1487_v51, 16 }
  0x9f   : > { %v429_v39 = vsel %vm362_vm0, %v428_v29, %v401_v32  ;;  %v561_v40 = vperm.slane %v557_v38, %v1471_v33  ;;  %v416_v41 = vsel %vm362_vm0, %v415_v36, %v408_v35  ;;  %v586_v18 = vpack.i.b16 %v579_v16, %v1487_v51 }
  0xa0   : > { %v433_v43 = vperm.slane %v429_v39, %v1465_v13  ;;  %v567_v44 = vshrl.u32 %v542_v37, 16  ;;  %v543_v45 = vrot.slane %v542_v37, 4  ;;  %v420_v46 = vperm.slane %v416_v41, %v1471_v33 }
  0xa1   : > { %v566_v47 = vpack.i.b16 %v561_v40, %v542_v37  ;;  %v568_v48 = vshrl.u32 %v561_v40, 16  ;;  %v562_v49 = vrot.slane %v561_v40, 4  ;;  %v588_v19 = vshrl.u32 %v579_v16, 16  ;;  %v1339_v40 = vld [vmem:[%s304_s5] ss:$0 sm:$0xff] }
  0xa2   : > { %v434_v50 = vrot.slane %v433_v43, 4  ;;  %v544_v52 = vsel %vm362_vm0, 0, %v543_v45  ;;  %v421_v63 = vrot.slane %v420_v46, 4  ;;  %v445_v6 = vshrl.u32 %v420_v46, 16 }
  0xa3   : > { %v707_v54 = vsel %vm326_vm1, %v566_v47, 0  ;;  %v569_v55 = vpack.i.b16 %v568_v48, %v567_v44  ;;  %v563_v56 = vsel %vm362_vm0, 0, %v562_v49  ;;  %v573_v58 = vshrl.u32 %v544_v52, 16 }
  0xa4   : > { %716 = vmatpush.bf16.xpose.msra.mxu0 %v707_v54  ;;  %v572_v57 = vpack.i.b16 %v563_v56, %v544_v52  ;;  %v574_v59 = vshrl.u32 %v563_v56, 16  ;;  %v435_v60 = vsel %vm362_vm0, %v434_v50, %v427_v53  ;;  %v422_v7 = vsel %vm362_vm0, 0, %v421_v63 }
  0xa5   : > { %v726_v61 = vsel %vm326_vm1, %v569_v55, 0  ;;  %v439_v62 = vperm.slane %v435_v60, %v1471_v33  ;;  %v451_v12 = vshrl.u32 %v422_v7, 16  ;;  %v594_v20 = vshrl.u32 %v583_v17, 16 }
  0xa6   : > { %735 = vmatpush.bf16.xpose.msra.mxu1 %v726_v61  ;;  %v745_v0 = vsel %vm326_vm1, %v572_v57, 0  ;;  %v575_v1 = vpack.i.b16 %v574_v59, %v573_v58  ;;  %v592_v22 = vpack.i.b16 %v583_v17, %v581_v21  ;;  %v593_v23 = vshrl.u32 %v581_v21, 16 }
  0xa7   : > { %754 = vmatpush.bf16.xpose.msra.mxu2 %v745_v0  ;;  %v446_v2 = vshrl.u32 %v439_v62, 16  ;;  %v440_v3 = vrot.slane %v439_v62, 4  ;;  %v444_v5 = vpack.i.b16 %v439_v62, %v420_v46  ;;  %v589_v24 = vpack.i.b16 %v588_v19, %v587_v15 }
  0xa8   : > { %v764_v4 = vsel %vm326_vm1, %v575_v1, 0  ;;  %v600_v25 = vperm.slane %v586_v18, %v1465_v13  ;;  %v1393_v26 = vmov -inf   ;;  %v595_v27 = vpack.i.b16 %v594_v20, %v593_v23 }
  0xa9   : > { %773 = vmatpush.bf16.xpose.msra.mxu3 %v764_v4  ;;  %v441_v8 = vsel %vm362_vm0, 0, %v440_v3  ;;  %v447_v10 = vpack.i.b16 %v446_v2, %v445_v6  ;;  %318 = vst.msk [vmem:[#allocation2] sm:$0xff] %vm317_vm2, %v1393_v26  ;;  %v605_v28 = vperm.slane %v592_v22, %v1465_v13  ;;  %v626_v51 = vperm.slane %v589_v24, %v1465_v13 }
  0xaa   : > { %v452_v9 = vshrl.u32 %v441_v8, 16  ;;  %v450_v11 = vpack.i.b16 %v441_v8, %v422_v7  ;;  %319 = vst.msk [vmem:[#allocation2 + $0x8] sm:$0xff] %vm317_vm2, %v1393_v26  ;;  %v608_v29 = vrot.slane %v600_v25, 4  ;;  %v631_v31 = vperm.slane %v595_v27, %v1465_v13 }
  0xab   : > { %1291 = vmatmul.msk.bf16.vlgmr.msra.gmra.mxu0 %vm326_vm1, %v444_v5  ;;  %320 = vst.msk [vmem:[#allocation2 + $0x10] sm:$0xff] %vm317_vm2, %v1393_v26  ;;  %v606_v30 = vrot.slane %v605_v28, 4  ;;  %v634_v32 = vrot.slane %v626_v51, 4 }
  0xac   : > { %v453_v14 = vpack.i.b16 %v452_v9, %v451_v12  ;;  %321 = vst.msk [vmem:[#allocation2 + $0x18] sm:$0xff] %vm317_vm2, %v1393_v26  ;;  %v609_v34 = vsel %vm362_vm0, %v605_v28, %v608_v29  ;;  %v632_v37 = vrot.slane %v631_v31, 4 }
  0xad   : > { %1292 = vmatmul.msk.bf16.vlgmr.msra.gmra.mxu1 %vm326_vm1, %v447_v10  ;;  %v607_v35 = vsel %vm362_vm0, %v606_v30, %v600_v25  ;;  %v617_v36 = vperm.slane %v609_v34, %v1471_v33  ;;  %v635_v39 = vsel %vm362_vm0, %v631_v31, %v634_v32 }
  0xae   : > { %1293 = vmatmul.msk.bf16.vlgmr.msra.gmra.mxu2 %vm326_vm1, %v450_v11  ;;  %v613_v38 = vperm.slane %v607_v35, %v1471_v33  ;;  %v633_v42 = vsel %vm362_vm0, %v632_v37, %v626_v51  ;;  %v643_v43 = vperm.slane %v635_v39, %v1471_v33  ;;  %v1395_v39 = vmov 0.0  }
  0xaf   : > { %v620_v41 = vrot.slane %v617_v36, 4  ;;  %v639_v45 = vperm.slane %v633_v42, %v1471_v33  ;;  %322 = vst.msk [vmem:[#allocation3] sm:$0xff] %vm317_vm2, %v1395_v39 }
  0xb0   : > { %1294 = vmatmul.msk.bf16.vlgmr.msra.gmra.mxu3 %vm326_vm1, %v453_v14  ;;  %v618_v44 = vrot.slane %v613_v38, 4  ;;  %v646_v47 = vrot.slane %v643_v43, 4  ;;  %323 = vst.msk [vmem:[#allocation3 + $0x8] sm:$0xff] %vm317_vm2, %v1395_v39 }
  0xb1   : > { %v621_v46 = vsel %vm362_vm0, 0, %v620_v41  ;;  %v644_v50 = vrot.slane %v639_v45, 4  ;;  %v648_v53 = vsel %vm362_vm0, %v620_v41, %v613_v38  ;;  %v1394_v38 = vmov 0   ;;  %324 = vst.msk [vmem:[#allocation3 + $0x10] sm:$0xff] %vm317_vm2, %v1395_v39 }
  0xb2   : > { %v619_v49 = vsel %vm362_vm0, 0, %v618_v44  ;;  %v653_v52 = vrot.slane %v621_v46, 4  ;;  %v647_v55 = vsel %vm362_vm0, 0, %v646_v47  ;;  %v667_v60 = vsel %vm362_vm0, %v646_v47, %v639_v45  ;;  %1337 = vset.pattern.permute.xlu2 %v1394_v38  ;;  %1336 = vset.pattern.permute.xlu0 %v1394_v38  ;;  %325 = vst.msk [vmem:[#allocation3 + $0x18] sm:$0xff] %vm317_vm2, %v1395_v39  ;;  %v780_v44 = vld [vmem:[#allocation2 + $0x8] sm:$0xff]  ;;  %v781_v45 = vld [vmem:[#allocation2 + $0x10] sm:$0xff] }
  0xb3   : > { %v672_v57 = vrot.slane %v647_v55, 4  ;;  %v645_v58 = vsel %vm362_vm0, 0, %v644_v50  ;;  %v652_v62 = vperm.slane %v648_v53, %v1465_v13  ;;  %v671_v2 = vperm.slane %v667_v60, %v1465_v13  ;;  %1338 = vset.pattern.permute.xlu1 %v1394_v38  ;;  %327 = vst.msk [vmem:[#allocation4] sm:$0xff] %vm326_vm1, %v1395_v39 }
  0xb4   : > { %v654_v59 = vsel %vm362_vm0, %v653_v52, %v619_v49  ;;  %328 = vst.msk [vmem:[#allocation4 + $0x8] sm:$0xff] %vm326_vm1, %v1395_v39  ;;  %v782_v49 = vld [vmem:[#allocation2 + $0x18] sm:$0xff] }
  0xb5   : > { %v658_v63 = vperm.slane %v654_v59, %v1465_v13  ;;  %v673_v0 = vsel %vm362_vm0, %v672_v57, %v645_v58  ;;  %329 = vst.msk [vmem:[#allocation4 + $0x10] sm:$0xff] %vm326_vm1, %v1395_v39 }
  0xb6   : > { %v677_v3 = vperm.slane %v673_v0, %v1465_v13  ;;  %330 = vst.msk [vmem:[#allocation4 + $0x18] sm:$0xff] %vm326_vm1, %v1395_v39 }
  0xb7   : > { %v659_v1 = vrot.slane %v658_v63, 4 }
  0xb8   : > { %v678_v6 = vrot.slane %v677_v3, 4 }
  0xb9   : > { %v660_v5 = vsel %vm362_vm0, %v659_v1, %v652_v62 }
  0xba   : > { %v664_v8 = vperm.slane %v660_v5, %v1471_v33  ;;  %v679_v10 = vsel %vm362_vm0, %v678_v6, %v671_v2 }
  0xbb   : > { %v683_v14 = vperm.slane %v679_v10, %v1471_v33 }
  0xbc   : > { %v689_v15 = vshrl.u32 %v664_v8, 16  ;;  %v665_v16 = vrot.slane %v664_v8, 4 }
  0xbd   : > { %v688_v21 = vpack.i.b16 %v683_v14, %v664_v8  ;;  %v690_v22 = vshrl.u32 %v683_v14, 16  ;;  %v684_v24 = vrot.slane %v683_v14, 4 }
  0xbe   : > { %v666_v23 = vsel %vm362_vm0, 0, %v665_v16 }
  0xbf   : > { %v909_v26 = vsel %vm907_vm3, %v688_v21, 0  ;;  %v691_v27 = vpack.i.b16 %v690_v22, %v689_v15  ;;  %v695_v28 = vshrl.u32 %v666_v23, 16  ;;  %v685_v29 = vsel %vm362_vm0, 0, %v684_v24 }
  0xc0   : > { %918 = vmatpush.bf16.msrb.mxu0 %v909_v26  ;;  %v694_v30 = vpack.i.b16 %v685_v29, %v666_v23  ;;  %v696_v31 = vshrl.u32 %v685_v29, 16  ;;  %v843_v26 = vld [vmem:[#allocation3] sm:$0xff] }
  0xc1   : > { %v928_v51 = vsel %vm907_vm3, %v691_v27, 0 }
  0xc2   : > { %937 = vmatpush.bf16.msrb.mxu1 %v928_v51  ;;  %v947_v34 = vsel %vm907_vm3, %v694_v30, 0  ;;  %v697_v35 = vpack.i.b16 %v696_v31, %v695_v28 }
  0xc3   : > { %956 = vmatpush.bf16.msrb.mxu2 %v947_v34  ;;  %v845_v34 = vld [vmem:[#allocation3 + $0x10] sm:$0xff] }
  0xc4   : > { %v966_v37 = vsel %vm907_vm3, %v697_v35, 0  ;;  %v846_v35 = vld [vmem:[#allocation3 + $0x18] sm:$0xff] }
  0xc5   : > { %975 = vmatpush.bf16.msrb.mxu3 %v966_v37 }
 0x128   : > { %v718_v48 = vpop.f32.mrf.mxu0 }
 0x129   : > { %v1575_v54 = vadd.f32 %v1339_v40, %v718_v48 }
 0x12a   : > { %v737_v56 = vpop.f32.mrf.mxu1 }
 0x12b   : > { %v783_v61 = vsel %vm326_vm1, %v1575_v54, -inf  ;;  %v1588_v4 = vadd.f32 %v1339_v40, %v737_v56 }
 0x12c   : > { %784 = vmax.xlane.f32.xlu2 %v783_v61 }
 0x12d   : > { %v786_v18 = vsel %vm326_vm1, %v1588_v4, -inf }
 0x130   : > { %v720_v7 = vpop.f32.mrf.mxu0 }
 0x131   : > { %v756_v9 = vpop.f32.mrf.mxu2 }
 0x132   : > { %v1593_v11 = vadd.f32 %v1339_v40, %v756_v9  ;;  %v739_v12 = vpop.f32.mrf.mxu1 }
 0x133   : > { %v775_v17 = vpop.f32.mrf.mxu3 }
 0x134   : > { %v1598_v19 = vadd.f32 %v1339_v40, %v775_v17  ;;  %787 = vmax.xlane.f32.xlu2 %v786_v18  ;;  %v789_v20 = vsel %vm326_vm1, %v1593_v11, -inf  ;;  %v1618_v40 = vld [vmem:[#allocation2] sm:$0xff] }
 0x135   : > { %790 = vmax.xlane.f32.xlu0 %v789_v20 }
 0x136   : > { %v792_v25 = vsel %vm326_vm1, %v1598_v19, -inf }
 0x137   : > { %793 = vmax.xlane.f32.xlu1 %v792_v25 }
 0x139   : > { %v758_v32 = vpop.f32.mrf.mxu2 }
 0x13b   : > { %v777_v36 = vpop.f32.mrf.mxu3 }
 0x19f   : > { %v785_v41 = vpop.xlane.xlu2 %784 }
 0x1a0   : > { %v1621_v42 = vmax.f32 %v1618_v40, %v785_v41 }
 0x1a2   : > { %v799_v43 = vsub.f32 %v1618_v40, %v1621_v42  ;;  %989 = vst.msk [vmem:[#allocation2] sm:$0xff] %vm317_vm2, %v1621_v42  ;;  %813 = vperm.xlu2 %1337, %v1621_v42   ;;  %v844_v42 = vld [vmem:[#allocation3 + $0x8] sm:$0xff] }
 0x1a4   : > { %v803_v22 = vmul.f32 1.442695, %v799_v43 }
 0x1a7   : > { %v788_v46 = vpop.xlane.xlu2 %787 }
 0x1a8   : > { %v796_v47 = vmax.f32 %v780_v44, %v788_v46  ;;  %v791_v48 = vpop.xlane.xlu0 %790 }
 0x1a9   : > { %v797_v50 = vmax.f32 %v781_v45, %v791_v48 }
 0x1aa   : > { %v800_v52 = vsub.f32 %v780_v44, %v796_v47  ;;  %990 = vst.msk [vmem:[#allocation2 + $0x8] sm:$0xff] %vm317_vm2, %v796_v47  ;;  %v794_v53 = vpop.xlane.xlu1 %793 }
 0x1ab   : > { %v801_v55 = vsub.f32 %v781_v45, %v797_v50  ;;  %991 = vst.msk [vmem:[#allocation2 + $0x10] sm:$0xff] %vm317_vm2, %v797_v50  ;;  %v798_v56 = vmax.f32 %v782_v49, %v794_v53  ;;  %823 = vperm.xlu0 %1336, %v797_v50   ;;  %v873_v53 = vld [vmem:[#allocation4 + $0x8] sm:$0xff] }
 0x1ac   : > { %v805_v1 = vmul.f32 1.442695, %v800_v52 }
 0x1ad   : > { %v802_v57 = vsub.f32 %v782_v49, %v798_v56  ;;  %992 = vst.msk [vmem:[#allocation2 + $0x18] sm:$0xff] %vm317_vm2, %v798_v56  ;;  %828 = vperm.xlu1 %1338, %v798_v56   ;;  %v807_v0 = vmul.f32 1.442695, %v801_v55  ;;  %v874_v49 = vld [vmem:[#allocation4 + $0x10] sm:$0xff] }
 0x1af   : > { %v809_v23 = vmul.f32 1.442695, %v802_v57 }
 0x1b5   : > { %818 = vperm.xlu1 %1338, %v796_v47  }
 0x1fc   : > { %v814_v58 = vpop.permute.xlu2 %813 }
 0x1fd   : > { %v831_v59 = vsub.f32 %v1575_v54, %v814_v58 }
 0x1ff   : > { %v835_v60 = vmul.f32 1.442695, %v831_v59 }
 0x201   : > { %1340 = vpow2.f32 %v835_v60 }
 0x202   : > { %1342 = vpow2.f32 %v807_v0  ;;  %v872_v0 = vld [vmem:[#allocation4] sm:$0xff] }
 0x203   : > { %1344 = vpow2.f32 %v805_v1 }
 0x207   : > { %v1341_v61 = vpop.eup %1340 }
 0x208   : > { %v851_v62 = vsel %vm326_vm1, %v1341_v61, 0.0  ;;  %v900_v63 = vpack.c.bf16 %v1341_v61, %v1341_v61  ;;  %v1343_v6 = vpop.eup %1342 }
 0x209   : > { %852 = vadd.xlane.f32.xlu2 %v851_v62  ;;  %v1345_v9 = vpop.eup %1344  ;;  %v849_v36 = vmul.f32 %v1343_v6, %v845_v34 }
 0x20a   : > { %1295 = vmatmul.msk.bf16.vlgmr.msrb.gmra.mxu0 %vm326_vm1, %v900_v63  ;;  %v848_v44 = vmul.f32 %v1345_v9, %v844_v42 }
 0x21d   : > { %v824_v2 = vpop.permute.xlu0 %823 }
 0x21e   : > { %v833_v3 = vsub.f32 %v1593_v11, %v824_v2 }
 0x21f   : > { %v829_v5 = vpop.permute.xlu1 %828 }
 0x220   : > { %v839_v7 = vmul.f32 1.442695, %v833_v3  ;;  %v834_v54 = vsub.f32 %v1598_v19, %v829_v5 }
 0x221   : > { %888 = vperm.xlu2 %1337, %v1343_v6  }
 0x222   : > { %1346 = vpow2.f32 %v839_v7  ;;  %v841_v8 = vmul.f32 1.442695, %v834_v54  ;;  %v875_v7 = vld [vmem:[#allocation4 + $0x18] sm:$0xff] }
 0x224   : > { %1348 = vpow2.f32 %v841_v8 }
 0x227   : > { %v819_v10 = vpop.permute.xlu1 %818 }
 0x228   : > { %v1347_v12 = vpop.eup %1346  ;;  %v832_v14 = vsub.f32 %v1588_v4, %v819_v10 }
 0x229   : > { %883 = vperm.xlu2 %1337, %v1345_v9   ;;  %v857_v15 = vsel %vm326_vm1, %v1347_v12, 0.0  ;;  %v902_v16 = vpack.c.bf16 %v1347_v12, %v1347_v12 }
 0x22a   : > { %v1349_v11 = vpop.eup %1348  ;;  %v837_v17 = vmul.f32 1.442695, %v832_v14  ;;  %858 = vadd.xlane.f32.xlu0 %v857_v15 }
 0x22b   : > { %1297 = vmatmul.msk.bf16.vlgmr.msrb.gmra.mxu2 %vm326_vm1, %v902_v16  ;;  %v860_v18 = vsel %vm326_vm1, %v1349_v11, 0.0  ;;  %v903_v19 = vpack.c.bf16 %v1349_v11, %v1349_v11 }
 0x22c   : > { %1350 = vpow2.f32 %v837_v17  ;;  %861 = vadd.xlane.f32.xlu1 %v860_v18 }
 0x22d   : > { %1298 = vmatmul.msk.bf16.vlgmr.msrb.gmra.mxu3 %vm326_vm1, %v903_v19  ;;  %1352 = vpow2.f32 %v803_v22 }
 0x22e   : > { %1354 = vpow2.f32 %v809_v23 }
 0x232   : > { %v1351_v20 = vpop.eup %1350 }
 0x233   : > { %v854_v21 = vsel %vm326_vm1, %v1351_v20, 0.0  ;;  %v901_v4 = vpack.c.bf16 %v1351_v20, %v1351_v20  ;;  %v1353_v24 = vpop.eup %1352 }
 0x234   : > { %855 = vadd.xlane.f32.xlu0 %v854_v21  ;;  %v1355_v25 = vpop.eup %1354  ;;  %v847_v27 = vmul.f32 %v1353_v24, %v843_v26 }
 0x235   : > { %1296 = vmatmul.msk.bf16.vlgmr.msrb.gmra.mxu1 %vm326_vm1, %v901_v4  ;;  %v850_v39 = vmul.f32 %v1355_v25, %v846_v35 }
 0x245   : > { %878 = vperm.xlu1 %1338, %v1353_v24  }
 0x248   : > { %893 = vperm.xlu0 %1336, %v1355_v25  }
 0x27c   : > { %v853_v28 = vpop.xlane.xlu2 %852 }
 0x27d   : > { %v863_v29 = vadd.f32 %v853_v28, %v847_v27 }
 0x27f   : > { %868 = vst.msk [vmem:[#allocation3] sm:$0xff] %vm317_vm2, %v863_v29 }
 0x284   : > { %v889_v43 = vpop.permute.xlu2 %888 }
 0x285   : > { %v898_v50 = vmul.f32 %v889_v43, %v874_v49 }
 0x286   : > { %v1000_v51 = vld [vmem:[#allocation3] sm:$0xff] }
 0x287   : > { %v920_v30 = vpop.f32.mrf.mxu0  ;;  %1356 = vrcp.f32 %v1000_v51 }
 0x28c   : > { %v884_v55 = vpop.permute.xlu2 %883 }
 0x28d   : > { %v1357_v31 = vpop.eup %1356  ;;  %v897_v60 = vmul.f32 %v884_v55, %v873_v53 }
 0x28e   : > { %1010 = vperm.xlu1 %1338, %v1357_v31  }
 0x28f   : > { %v922_v32 = vpop.f32.mrf.mxu0 }
 0x29d   : > { %v859_v37 = vpop.xlane.xlu0 %858 }
 0x29e   : > { %v865_v38 = vadd.f32 %v859_v37, %v849_v36 }
 0x29f   : > { %v862_v40 = vpop.xlane.xlu1 %861 }
 0x2a0   : > { %870 = vst.msk [vmem:[#allocation3 + $0x10] sm:$0xff] %vm317_vm2, %v865_v38  ;;  %v866_v41 = vadd.f32 %v862_v40, %v850_v39 }
 0x2a2   : > { %871 = vst.msk [vmem:[#allocation3 + $0x18] sm:$0xff] %vm317_vm2, %v866_v41 }
 0x2a7   : > { %v856_v45 = vpop.xlane.xlu0 %855  ;;  %v1002_v46 = vld [vmem:[#allocation3 + $0x10] sm:$0xff] }
 0x2a8   : > { %v864_v47 = vadd.f32 %v856_v45, %v848_v44  ;;  %1358 = vrcp.f32 %v1002_v46 }
 0x2a9   : > { %v1003_v48 = vld [vmem:[#allocation3 + $0x18] sm:$0xff] }
 0x2aa   : > { %869 = vst.msk [vmem:[#allocation3 + $0x8] sm:$0xff] %vm317_vm2, %v864_v47  ;;  %1360 = vrcp.f32 %v1003_v48 }
 0x2ae   : > { %v1359_v52 = vpop.eup %1358  ;;  %v958_v56 = vpop.f32.mrf.mxu2 }
 0x2af   : > { %v983_v57 = vadd.f32 %v958_v56, %v898_v50  ;;  %1020 = vperm.xlu0 %1336, %v1359_v52  }
 0x2b0   : > { %v1361_v58 = vpop.eup %1360  ;;  %v977_v59 = vpop.f32.mrf.mxu3 }
 0x2b1   : > { %987 = vst.msk [vmem:[#allocation4 + $0x10] sm:$0xff] %vm326_vm1, %v983_v57  ;;  %1025 = vperm.xlu2 %1337, %v1361_v58   ;;  %v1001_v61 = vld [vmem:[#allocation3 + $0x8] sm:$0xff] }
 0x2b2   : > { %v939_v62 = vpop.f32.mrf.mxu1  ;;  %1362 = vrcp.f32 %v1001_v61 }
 0x2b3   : > { %v982_v63 = vadd.f32 %v939_v62, %v897_v60 }
 0x2b5   : > { %986 = vst.msk [vmem:[#allocation4 + $0x8] sm:$0xff] %vm326_vm1, %v982_v63 }
 0x2b6   : > { %v960_v1 = vpop.f32.mrf.mxu2 }
 0x2b7   : > { %v879_v2 = vpop.permute.xlu1 %878 }
 0x2b8   : > { %v1363_v3 = vpop.eup %1362  ;;  %v896_v5 = vmul.f32 %v879_v2, %v872_v0  ;;  %v979_v6 = vpop.f32.mrf.mxu3  ;;  %v998_v15 = vld [vmem:[#allocation4 + $0x10] sm:$0xff] }
 0x2b9   : > { %1015 = vperm.xlu0 %1336, %v1363_v3  }
 0x2ba   : > { %v981_v54 = vadd.f32 %v920_v30, %v896_v5  ;;  %v941_v8 = vpop.f32.mrf.mxu1  ;;  %v894_v9 = vpop.permute.xlu0 %893 }
 0x2bb   : > { %v899_v10 = vmul.f32 %v894_v9, %v875_v7 }
 0x2bc   : > { %985 = vst.msk [vmem:[#allocation4] sm:$0xff] %vm326_vm1, %v981_v54  ;;  %v997_v26 = vld [vmem:[#allocation4 + $0x8] sm:$0xff] }
 0x2bd   : > { %v984_v12 = vadd.f32 %v977_v59, %v899_v10 }
 0x2bf   : > { %988 = vst.msk [vmem:[#allocation4 + $0x18] sm:$0xff] %vm326_vm1, %v984_v12 }
 0x2c3   : > { %v996_v17 = vld [vmem:[#allocation4] sm:$0xff] }
 0x2c6   : > { %v999_v21 = vld [vmem:[#allocation4 + $0x18] sm:$0xff] }
 0x300   : > { %v1011_v14 = vpop.permute.xlu1 %1010 }
 0x301   : > { %v1028_v18 = vmul.f32 %v1011_v14, %v996_v17 }
 0x303   : > { %v1035_v4 = vrot.slane %v1028_v18, 4 }
 0x30b   : > { %v1026_v20 = vpop.permute.xlu2 %1025 }
 0x30c   : > { %v1031_v22 = vmul.f32 %v1026_v20, %v999_v21 }
 0x30e   : > { %v1045_v28 = vrot.slane %v1031_v22, 4 }
 0x321   : > { %v1021_v16 = vpop.permute.xlu0 %1020 }
 0x322   : > { %v1030_v11 = vmul.f32 %v1021_v16, %v998_v15 }
 0x324   : > { %v1032_v19 = vrot.slane %v1030_v11, 4  ;;  %v1036_v24 = vsel %vm362_vm0, %v1030_v11, %v1035_v4 }
 0x325   : > { %v1044_v51 = vperm.slane %v1036_v24, %v1465_v13 }
 0x326   : > { %v1034_v23 = vsel %vm362_vm0, %v1032_v19, %v1028_v18 }
 0x327   : > { %v1040_v25 = vperm.slane %v1034_v23, %v1465_v13  ;;  %v1071_v36 = vrot.slane %v1044_v51, 4 }
 0x329   : > { %v1059_v32 = vrot.slane %v1040_v25, 4 }
 0x32b   : > { %v1016_v27 = vpop.permute.xlu0 %1015 }
 0x32c   : > { %v1029_v29 = vmul.f32 %v1016_v27, %v997_v26 }
 0x32e   : > { %v1046_v30 = vsel %vm362_vm0, %v1045_v28, %v1029_v29  ;;  %v1047_v31 = vrot.slane %v1029_v29, 4 }
 0x32f   : > { %v1052_v34 = vperm.slane %v1046_v30, %v1465_v13 }
 0x330   : > { %v1048_v35 = vsel %vm362_vm0, %v1031_v22, %v1047_v31 }
 0x331   : > { %v1056_v37 = vperm.slane %v1048_v35, %v1465_v13  ;;  %v1057_v38 = vrot.slane %v1052_v34, 4  ;;  %v1060_v39 = vsel %vm362_vm0, %v1052_v34, %v1059_v32 }
 0x332   : > { %v1068_v40 = vperm.slane %v1060_v39, %v1471_v33 }
 0x333   : > { %v1058_v41 = vsel %vm362_vm0, %v1057_v38, %v1040_v25  ;;  %v1069_v42 = vrot.slane %v1056_v37, 4  ;;  %v1072_v43 = vsel %vm362_vm0, %v1056_v37, %v1071_v36 }
 0x334   : > { %v1064_v44 = vperm.slane %v1058_v41, %v1471_v33  ;;  %v1080_v45 = vperm.slane %v1072_v43, %v1471_v33  ;;  %v1083_v46 = vrot.slane %v1068_v40, 4 }
 0x335   : > { %v1070_v47 = vsel %vm362_vm0, %v1069_v42, %v1044_v51 }
 0x336   : > { %v1076_v48 = vperm.slane %v1070_v47, %v1471_v33  ;;  %v1081_v49 = vrot.slane %v1064_v44, 4  ;;  %v1084_v50 = vsel %vm362_vm0, 0.0, %v1083_v46  ;;  %v1087_v52 = vrot.slane %v1080_v45, 4 }
 0x337   : > { %v1089_v53 = vsel %vm362_vm0, %v1083_v46, %v1064_v44  ;;  %v1094_v55 = vrot.slane %v1084_v50, 4 }
 0x338   : > { %v1088_v56 = vsel %vm362_vm0, 0.0, %v1087_v52  ;;  %v1082_v57 = vsel %vm362_vm0, 0.0, %v1081_v49  ;;  %v1085_v58 = vrot.slane %v1076_v48, 4  ;;  %v1093_v59 = vperm.slane %v1089_v53, %v1465_v13 }
 0x339   : > { %v1105_v60 = vrot.slane %v1088_v56, 4  ;;  %v1095_v61 = vsel %vm362_vm0, %v1094_v55, %v1082_v57  ;;  %v1100_v62 = vsel %vm362_vm0, %v1087_v52, %v1076_v48 }
 0x33a   : > { %v1086_v63 = vsel %vm362_vm0, 0.0, %v1085_v58  ;;  %v1099_v0 = vperm.slane %v1095_v61, %v1465_v13  ;;  %v1104_v1 = vperm.slane %v1100_v62, %v1465_v13  ;;  %v1113_v2 = vrot.slane %v1093_v59, 4 }
 0x33b   : > { %v1106_v3 = vsel %vm362_vm0, %v1105_v60, %v1086_v63 }
 0x33c   : > { %v1110_v5 = vperm.slane %v1106_v3, %v1465_v13  ;;  %v1114_v6 = vsel %vm362_vm0, %v1099_v0, %v1113_v2  ;;  %v1125_v7 = vrot.slane %v1104_v1, 4  ;;  %v1111_v54 = vrot.slane %v1099_v0, 4 }
 0x33d   : > { %v1122_v8 = vperm.slane %v1114_v6, %v1471_v33 }
 0x33e   : > { %v1126_v9 = vsel %vm362_vm0, %v1110_v5, %v1125_v7  ;;  %v1112_v10 = vsel %vm362_vm0, %v1111_v54, %v1093_v59  ;;  %v1123_v12 = vrot.slane %v1110_v5, 4 }
 0x33f   : > { %v1134_v14 = vperm.slane %v1126_v9, %v1471_v33  ;;  %v1141_v15 = vrot.slane %v1122_v8, 4  ;;  %v1118_v16 = vperm.slane %v1112_v10, %v1471_v33 }
 0x340   : > { %v1124_v11 = vsel %vm362_vm0, %v1123_v12, %v1104_v1 }
 0x341   : > { %v1142_v13 = vsel %vm362_vm0, %v1134_v14, %v1141_v15  ;;  %v1139_v17 = vrot.slane %v1134_v14, 4  ;;  %v1130_v18 = vperm.slane %v1124_v11, %v1471_v33  ;;  %v1137_v19 = vrot.slane %v1118_v16, 4 }
 0x342   : > { %1152 = vrot.lane.b32.xlu0 %v1142_v13, %s1396_s11 }
 0x343   : > { %v1140_v20 = vsel %vm362_vm0, %v1139_v17, %v1122_v8  ;;  %v1135_v21 = vrot.slane %v1130_v18, 4  ;;  %v1138_v4 = vsel %vm362_vm0, %v1130_v18, %v1137_v19 }
 0x344   : > { %1148 = vrot.lane.b32.xlu2 %v1140_v20, %s1397_s12  ;;  %1144 = vrot.lane.b32.xlu1 %v1138_v4, %s1398_s13 }
 0x345   : > { %v1136_v22 = vsel %vm362_vm0, %v1135_v21, %v1118_v16 }
 0x39e   : > { %v1149_v24 = vpop.permute.xlu2 %1148 }
 0x3b4   : > { %v1153_v25 = vpop.permute.xlu0 %1152 }
 0x3b6   : > { %v1145_v23 = vpop.permute.xlu1 %1144 }
 0x3b7   : > { %v1155_v33 = vsel %vm326_vm1, %v1136_v22, %v1145_v23 }
 0x3b8   : > { %v1157_v26 = vsel %vm1156_vm4, %v1155_v33, %v1149_v24 }
 0x3b9   : > { %v1159_v27 = vsel %vm1158_vm5, %v1157_v26, %v1153_v25 }
 0x3ba   : > { %v1160_v28 = vpack.c.bf16 %v1159_v27, %v1159_v27 }
 0x3bc   : > { %1162 = vst.msk [vmem:[%s311_s20] sm:$0xf] %vm1161_vm6, %v1160_v28 }
 0x3bd PF: > { %s14_s17 = sadd.s32 1, %s1386_s17   ;;  %s1713_s15 = smov %s1382_s16 }
 0x3be   : > { %p11_p5 = scmp.ge.s32.totalorder %s14_s17, 4   ;;  %s1714_s16 = smov %s1716_s18 }
 0x3c0   :  { %13 = sbr.rel (!%p11_p5) target bundleno = 2 (0x2), region = 83 }

// kernel: _lambda_.73
= control target key start
LH: loop header
LB: loop body
LE: loop exit
PB: predicated region body
PF: predicated region fallthrough
CT: control target
= control target key end

     0   :  { %vm65_vm0 = vcmask 261120   ;;  %s417_s0 = inlined_call_operand.vmem [shape: bf16[16,32], index: 0, kind: input, shape index: {}]   ;;  %s418_s1 = inlined_call_operand.vmem [shape: bf16[64,32], index: 1, kind: input, shape index: {}]   ;;  %s419_s2 = inlined_call_operand.vmem [shape: s32[16,1], index: 2, kind: input, shape index: {}]   ;;  %s420_s3 = inlined_call_operand.hbm [shape: f32[16,64], index: 3, kind: output, shape index: {0}]   ;;  %s421_s4 = inlined_call_operand.vmem [shape: f32[16,1], index: 4, kind: output, shape index: {1}]   ;;  %s422_s5 = inlined_call_operand.vmem [shape: f32[16,1], index: 5, kind: output, shape index: {2}]  }
   0x1   :  { %v260_v0 = vld [vmem:[%s418_s1 + $0x18] sm:$0xff] }
   0x2   :  { %11 = vsyncpa [#allocation6], 0  ;;  %v79_v1 = vsel %vm65_vm0, %v260_v0, 0  ;;  %v100_v2 = vld [vmem:[%s419_s2] sm:$0xff]  ;;  %v308_v3 = vmov 0   ;;  %vm23_vm1 = vcmask 7168   ;;  %v102_v15 = vlaneseq }
   0x3   :  { %85 = vmatpush.bf16.xpose.msra.mxu0 %v79_v1  ;;  %268 = vset.pattern.permute.xlu2 %v308_v3  ;;  %vm181_vm2 = vcmp.ne.s32.totalorder %v100_v2, 4294967196  ;;  %v259_v4 = vld [vmem:[%s418_s1 + $0x10] sm:$0xff]  ;;  %v309_v5 = vmov 0.0   ;;  %v101_v7 = vld [vmem:[%s419_s2 + $0x8] sm:$0xff]  ;;  %v257_v12 = vld [vmem:[%s418_s1] sm:$0xff]  ;;  %vm97_vm4 = vcmask 523264  }
   0x4   :  { %110 = vperm.xlu2 %268, %v100_v2   ;;  %v354_v6 = vsel %vm181_vm2, 1.0, %v309_v5  ;;  %26 = vst.msk [vmem:[#allocation3] sm:$0xff] %vm23_vm1, %v309_v5  ;;  %267 = vset.pattern.permute.xlu1 %v308_v3  ;;  %vm182_vm3 = vcmp.ne.s32.totalorder %v101_v7, 4294967196  ;;  %v76_v8 = vsel %vm65_vm0, %v259_v4, 0  ;;  %v258_v10 = vld [vmem:[%s418_s1 + $0x8] sm:$0xff]  ;;  %v70_v13 = vsel %vm65_vm0, %v257_v12, 0 }
   0x5   :  { %205 = vst.msk [vmem:[%s422_s5] sm:$0xff] %vm23_vm1, %v354_v6  ;;  %269 = vset.pattern.permute.xlu0 %v308_v3  ;;  %v369_v9 = vsel %vm182_vm3, 1.0, %v309_v5  ;;  %v73_v11 = vsel %vm65_vm0, %v258_v10, 0  ;;  %v256_v14 = vld [vmem:[%s417_s0] sm:$0xff]  ;;  %v103_v16 = vand.u32 127, %v102_v15  ;;  %v310_v26 = vmov -inf  }
   0x6   :  { %27 = vst.msk [vmem:[#allocation3 + $0x8] sm:$0xff] %vm23_vm1, %v309_v5  ;;  %s311_s0 = smov [#allocation5]   ;;  %s213_s11 = sshll.u32 %s420_s3, 4  ;;  %s214_s11 = int_to_ptr.hbm [resolvable:$true] %s213_s11 }
   0x7   :  { %28 = vst.msk [vmem:[#allocation4] sm:$0xff] %vm23_vm1, %v309_v5  ;;  %s211_s1 = sshll.u32 %s311_s0, 4  ;;  %s312_s12 = smov 128   ;;  %s212_s1 = int_to_ptr.vmem [resolvable:$true] %s211_s1 }
   0x8   :  { %29 = vst.msk [vmem:[#allocation4 + $0x8] sm:$0xff] %vm23_vm1, %v309_v5  ;;  %s313_s13 = smov 8  }
   0x9   :  { %206 = vst.msk [vmem:[%s422_s5 + $0x8] sm:$0xff] %vm23_vm1, %v369_v9 }
   0xa   :  { %24 = vst.msk [vmem:[#allocation2] sm:$0xff] %vm23_vm1, %v310_v26 }
   0xb   :  { %86 = vmatpush.bf16.xpose.msra.mxu0 %v76_v8  ;;  %25 = vst.msk [vmem:[#allocation2 + $0x8] sm:$0xff] %vm23_vm1, %v310_v26  ;;  %v140_v54 = vld [vmem:[#allocation3] sm:$0xff] }
   0xc   :  { %113 = vperm.xlu2 %268, %v101_v7  }
   0xd   :  { %v141_v59 = vld [vmem:[#allocation3 + $0x8] sm:$0xff] }
   0xe   :  { %v107_v29 = vld [vmem:[#allocation4] sm:$0xff] }
   0xf   :  { %v108_v60 = vld [vmem:[#allocation4 + $0x8] sm:$0xff] }
  0x11   :  { %v130_v28 = vld [vmem:[#allocation2] sm:$0xff] }
  0x12   :  { %v131_v35 = vld [vmem:[#allocation2 + $0x8] sm:$0xff] }
  0x13   :  { %87 = vmatpush.bf16.xpose.msra.mxu0 %v73_v11 }
  0x1b   :  { %88 = vmatpush.bf16.xpose.msra.mxu0 %v70_v13 }
  0x22   :  { %253 = vmatmul.msk.bf16.vlgmr.msra.gmra.mxu0 %vm65_vm0, %v256_v14 }
  0x5e   :  { %v111_v17 = vpop.permute.xlu2 %110 }
  0x5f   :  { %vm115_vm5 = vcmp.eq.s32.totalorder %v103_v16, %v111_v17 }
  0x66   :  { %v114_v27 = vpop.permute.xlu2 %113 }
  0x67   :  { %vm116_vm6 = vcmp.eq.s32.totalorder %v103_v16, %v114_v27 }
  0x9f   :  { %v90_v18 = vpop.f32.mrf.mxu0 }
  0xa0   :  { %v95_v19 = vmul.f32 0.17677669, %v90_v18 }
  0xa2   :  { %98 = vst.msk [vmem:[#allocation5] sm:$0xff] %vm97_vm4, %v95_v19  ;;  %v132_v20 = vsel %vm97_vm4, %v95_v19, -inf  ;;  %v117_v21 = vsel %vm115_vm5, %v95_v19, 0.0 }
  0xa3   :  { %133 = vmax.xlane.f32.xlu0 %v132_v20  ;;  %v119_v22 = vsel %vm97_vm4, %v117_v21, 0.0 }
  0xa4   :  { %120 = vadd.xlane.f32.xlu2 %v119_v22 }
  0xa7   :  { %v92_v23 = vpop.f32.mrf.mxu0 }
  0xa8   :  { %v96_v24 = vmul.f32 0.17677669, %v92_v23 }
  0xaa   :  { %99 = vst.msk [vmem:[#allocation5 + $0x8] sm:$0xff] %vm97_vm4, %v96_v24  ;;  %v135_v25 = vsel %vm97_vm4, %v96_v24, -inf  ;;  %v118_v47 = vsel %vm116_vm6, %v96_v24, 0.0 }
  0xab   :  { %136 = vmax.xlane.f32.xlu0 %v135_v25  ;;  %v122_v49 = vsel %vm97_vm4, %v118_v47, 0.0  ;;  %219 = dma.vmem_to_hbm [thread:$0]  %s212_s1, 256, %s214_s11, [#allocation6], %s312_s12, %s312_s12, %s313_s13  }
 0x116   :  { %v134_v30 = vpop.xlane.xlu0 %133 }
 0x117   :  { %v138_v31 = vmax.f32 %v130_v28, %v134_v30  ;;  %v121_v32 = vpop.xlane.xlu2 %120 }
 0x118   :  { %v125_v33 = vadd.f32 %v121_v32, %v107_v29 }
 0x119   :  { %v142_v34 = vsub.f32 %v130_v28, %v138_v31  ;;  %176 = vst.msk [vmem:[#allocation2] sm:$0xff] %vm23_vm1, %v138_v31  ;;  %152 = vperm.xlu1 %267, %v138_v31  }
 0x11a   :  { %128 = vst.msk [vmem:[#allocation4] sm:$0xff] %vm23_vm1, %v125_v33 }
 0x11b   :  { %v144_v51 = vmul.f32 1.442695, %v142_v34 }
 0x11e   :  { %v137_v36 = vpop.xlane.xlu0 %136 }
 0x11f   :  { %v139_v37 = vmax.f32 %v131_v35, %v137_v36 }
 0x120   :  { %v187_v5 = vld [vmem:[#allocation2] sm:$0xff] }
 0x121   :  { %v143_v38 = vsub.f32 %v131_v35, %v139_v37  ;;  %177 = vst.msk [vmem:[#allocation2 + $0x8] sm:$0xff] %vm23_vm1, %v139_v37  ;;  %157 = vperm.xlu1 %267, %v139_v37   ;;  %v197_v10 = vld [vmem:[#allocation4] sm:$0xff] }
 0x123   :  { %v146_v52 = vmul.f32 1.442695, %v143_v38 }
 0x128   :  { %v188_v15 = vld [vmem:[#allocation2 + $0x8] sm:$0xff] }
 0x18b   :  { %v153_v39 = vpop.permute.xlu1 %152 }
 0x18c   :  { %v160_v40 = vsub.f32 %v95_v19, %v153_v39 }
 0x18e   :  { %v162_v41 = vmul.f32 1.442695, %v160_v40 }
 0x190   :  { %270 = vpow2.f32 %v162_v41 }
 0x193   :  { %v158_v42 = vpop.permute.xlu1 %157 }
 0x194   :  { %v161_v43 = vsub.f32 %v96_v24, %v158_v42 }
 0x196   :  { %v271_v44 = vpop.eup %270  ;;  %v164_v45 = vmul.f32 1.442695, %v161_v43 }
 0x197   :  { %v166_v46 = vsel %vm97_vm4, %v271_v44, 0.0 }
 0x198   :  { %272 = vpow2.f32 %v164_v45  ;;  %167 = vadd.xlane.f32.xlu0 %v166_v46 }
 0x199   :  { %274 = vpow2.f32 %v144_v51 }
 0x19a   :  { %276 = vpow2.f32 %v146_v52 }
 0x19e   :  { %v273_v48 = vpop.eup %272 }
 0x19f   :  { %v169_v50 = vsel %vm97_vm4, %v273_v48, 0.0  ;;  %v275_v53 = vpop.eup %274 }
 0x1a0   :  { %123 = vadd.xlane.f32.xlu0 %v122_v49  ;;  %170 = vadd.xlane.f32.xlu1 %v169_v50  ;;  %v148_v55 = vmul.f32 %v275_v53, %v140_v54  ;;  %v277_v58 = vpop.eup %276 }
 0x1a1   :  { %v149_v61 = vmul.f32 %v277_v58, %v141_v59 }
 0x20b   :  { %v168_v56 = vpop.xlane.xlu0 %167 }
 0x20c   :  { %v172_v57 = vadd.f32 %v168_v56, %v148_v55 }
 0x20e   :  { %174 = vst.msk [vmem:[#allocation3] sm:$0xff] %vm23_vm1, %v172_v57 }
 0x213   :  { %v124_v62 = vpop.xlane.xlu0 %123  ;;  %v171_v63 = vpop.xlane.xlu1 %170 }
 0x214   :  { %v126_v0 = vadd.f32 %v124_v62, %v108_v60  ;;  %v173_v1 = vadd.f32 %v171_v63, %v149_v61 }
 0x215   :  { %v189_v2 = vld [vmem:[#allocation3] sm:$0xff] }
 0x216   :  { %278 = vlog2.f32 %v189_v2  ;;  %129 = vst.msk [vmem:[#allocation4 + $0x8] sm:$0xff] %vm23_vm1, %v126_v0 }
 0x217   :  { %175 = vst.msk [vmem:[#allocation3 + $0x8] sm:$0xff] %vm23_vm1, %v173_v1 }
 0x21c   :  { %v279_v3 = vpop.eup %278 }
 0x21d   :  { %v192_v4 = vmul.f32 0.6931472, %v279_v3  ;;  %v198_v17 = vld [vmem:[#allocation4 + $0x8] sm:$0xff] }
 0x21e   :  { %v190_v7 = vld [vmem:[#allocation3 + $0x8] sm:$0xff] }
 0x21f   :  { %v195_v8 = vadd.f32 %v192_v4, %v187_v5  ;;  %280 = vlog2.f32 %v190_v7 }
 0x221   :  { %v199_v11 = vsub.f32 %v195_v8, %v197_v10 }
 0x223   :  { %v201_v12 = vmul.f32 %v354_v6, %v199_v11 }
 0x225   :  { %v281_v13 = vpop.eup %280  ;;  %203 = vst.msk [vmem:[%s421_s4] sm:$0xff] %vm23_vm1, %v201_v12 }
 0x226   :  { %v194_v14 = vmul.f32 0.6931472, %v281_v13 }
 0x228   :  { %v196_v16 = vadd.f32 %v194_v14, %v188_v15 }
 0x22a   :  { %v200_v18 = vsub.f32 %v196_v16, %v198_v17 }
 0x22c   :  { %v202_v19 = vmul.f32 %v369_v9, %v200_v18 }
 0x22e   :  { %204 = vst.msk [vmem:[%s421_s4 + $0x8] sm:$0xff] %vm23_vm1, %v202_v19 }
 0x22f   :  { %306 = dma.done.wait [#allocation6], 256  }
 0x230   :  { %307 = vsyncadd [#allocation6], 4294967040 }
 0x231   :  { %232 = vsyncpa [#allocation6], 1 }

</bundles_post_ra>
